<compile_context>
chip_gen: v5e
topology: v5e:2x2
jax: 0.10.0
libtpu: 0.0.40
codegen_flags: <defaults>
</compile_context>

<pallas_src>
import jax
import jax.numpy as jnp
import numpy as np
from jax import lax
from jax.experimental import pallas as pl
from jax.experimental.pallas import tpu as pltpu


def _round_up(n: int, k: int) -> int:
    return ((n + k - 1) // k) * k


# ----------------------------- Pallas kernel -------------------------------

def _make_moe_ffn_kernel(tH: int):
    """Grid = (row_tiles, H_tiles).  Rows are (token, expert) pairs sorted and
    grouped by expert (groups padded to the row tile), so every row tile
    belongs to exactly one expert; its expert id is scalar-prefetched and
    consumed by the weight index_maps (not by the kernel body)."""

    def kernel(gid_ref, x_ref, w13_ref, w2_ref, o_ref):
        del gid_ref                      # only used by the index_maps
        hi = pl.program_id(1)

        @pl.when(hi == 0)
        def _():
            o_ref[...] = jnp.zeros_like(o_ref)

        x = x_ref[...]                   # (tT, D)     bf16
        w13 = w13_ref[0]                 # (D, 2*tH)   bf16  [w1 tile | w3 tile]
        w2 = w2_ref[0]                   # (tH, D)     bf16

        # One fused MXU pass for both gate projections (f32 accumulation).
        h13 = jnp.dot(x, w13, preferred_element_type=jnp.float32)   # (tT, 2tH)
        h1 = h13[:, :tH]
        h3 = h13[:, tH:]
        g = (h1 * jax.nn.sigmoid(h1)) * h3                          # SiLU gate, f32

        # Down projection; output block stays VMEM-resident across the H axis.
        o_ref[...] += jnp.dot(g.astype(x.dtype), w2,
                              preferred_element_type=jnp.float32)

    return kernel


# ---------------------------- tile selection --------------------------------

def _pick_tiles(T: int, D: int, H: int, E: int, vmem_budget: int):
    # Hidden tile: keep tH = H when small (fewer grid steps), else a
    # 128-multiple divisor.
    if H <= 512 or H % 128 != 0:
        # TODO(synk): pad H to a multiple of 128 instead of whole-dim blocks
        # for large, non-aligned hidden dims.
        tH = H
    else:
        tH = next((c for c in (512, 384, 256, 128) if H % c == 0), H)

    # Row tile over (token, expert) pairs: target ~tokens-per-expert, clamped
    # to [128, 512].  Bigger tiles raise arithmetic intensity (weights are the
    # dominant HBM stream) until the kernel is compute-bound.
    tT = max(128, min(512, _round_up(max(1, (2 * T) // E), 128)))

    def step_bytes(tt, th):
        x_b = 2 * tt * D * 2             # bf16, double buffered
        w13_b = 2 * D * (2 * th) * 2     # fused w1|w3, double buffered
        w2_b = 2 * th * D * 2
        o_b = 2 * tt * D * 4             # f32 resident output (conservative)
        return x_b + w13_b + w2_b + o_b

    budget = int(vmem_budget * 0.8)      # headroom for internal scratch
    while step_bytes(tT, tH) > budget and tT > 128:
        tT //= 2
    while (step_bytes(tT, tH) > budget and tH > 128 and tH % 2 == 0
           and H % (tH // 2) == 0):
        tH //= 2
    return tT, tH


# ------------------------------- wrapper -----------------------------------

def moe_feed_forward(x, gate_w, w1, w2, w3, *, compute_dtype=jnp.bfloat16):
    """x: (..., D). gate_w: (E, D). w1/w2/w3: (E, H, D) (PyTorch layout).

    Returns the flattened (T, D) output in f32, matching MOEFeedForward.forward.
    """
    D = x.shape[-1]
    x2 = x.reshape(-1, D).astype(jnp.float32)
    T = x2.shape[0]
    E, H, _ = w1.shape
    K = 2                                  # num_activated_experts

    # ---- gating: tiny (T,D)x(D,E) GEMM + top-2 + softmax, plain JAX ----
    scores = jnp.dot(x2, gate_w.astype(jnp.float32).T)            # (T, E)
    expert_weights, expert_indices = lax.top_k(scores, K)         # (T, K)
    expert_weights = jax.nn.softmax(expert_weights, axis=-1)      # (T, K)

    # ---- VMEM budget / tile selection (per-generation: v7x has 64 MiB) ----
    try:
        vmem_cap = int(pltpu.get_tpu_info().vmem_capacity_bytes)
    except Exception:
        vmem_cap = 64 * 1024 * 1024
    vmem_budget = int(min(vmem_cap * 3 // 4, 100 * 1024 * 1024))
    tT, tH = _pick_tiles(T, D, H, E, vmem_budget)
    if H % tH != 0:
        tH = H
    nH = H // tH

    # ---- sort (token, expert) pairs by expert; pad groups to row tiles ----
    flat_e = expert_indices.reshape(-1).astype(jnp.int32)         # (K*T,)
    flat_w = expert_weights.reshape(-1)                           # (K*T,) f32
    flat_t = jnp.repeat(jnp.arange(T, dtype=jnp.int32), K)        # (K*T,)

    order = jnp.argsort(flat_e)
    sorted_e = flat_e[order]
    sorted_t = flat_t[order]
    sorted_w = flat_w[order]

    counts = jnp.bincount(flat_e, length=E).astype(jnp.int32)     # (E,)
    padded_counts = ((counts + tT - 1) // tT) * tT
    padded_ends = jnp.cumsum(padded_counts)
    padded_starts = padded_ends - padded_counts
    group_starts = jnp.cumsum(counts) - counts

    rank = jnp.arange(K * T, dtype=jnp.int32) - group_starts[sorted_e]
    dest = padded_starts[sorted_e] + rank                         # unique rows

    R = _round_up(K * T, tT) + E * tT      # static bound >= sum(padded_counts)
    n_row_tiles = R // tT

    # Per-row-tile expert id (scalar prefetch -> SMEM -> index_maps).
    tile_start = jnp.arange(n_row_tiles, dtype=jnp.int32) * tT
    tile_gid = jnp.searchsorted(padded_ends, tile_start, side="right")
    tile_gid = jnp.minimum(tile_gid, E - 1).astype(jnp.int32)

    # Padded, expert-sorted activations; padding rows are exact zeros so they
    # contribute exactly zero through the FFN.
    xc = x2.astype(compute_dtype)
    x_sorted = jnp.zeros((R, D), compute_dtype).at[dest].set(xc[sorted_t])

    # ---- one-time weight prep: bf16, w1/w3 fused per hidden tile ----
    w1t = jnp.swapaxes(w1, 1, 2).astype(compute_dtype)            # (E, D, H)
    w3t = jnp.swapaxes(w3, 1, 2).astype(compute_dtype)            # (E, D, H)
    w13 = jnp.stack(
        [w1t.reshape(E, D, nH, tH), w3t.reshape(E, D, nH, tH)], axis=3
    ).reshape(E, D, 2 * H)                                        # per-tile [w1|w3]
    w2c = w2.astype(compute_dtype)                                # (E, H, D)

    kernel = _make_moe_ffn_kernel(tH)
    y_sorted = pl.pallas_call(
        kernel,
        out_shape=jax.ShapeDtypeStruct((R, D), jnp.float32),
        grid_spec=pltpu.PrefetchScalarGridSpec(
            num_scalar_prefetch=1,
            grid=(n_row_tiles, nH),
            in_specs=[
                pl.BlockSpec((tT, D), lambda ti, hi, gid: (ti, 0)),              # x rows
                pl.BlockSpec((1, D, 2 * tH),
                             lambda ti, hi, gid: (gid[ti], 0, hi)),              # [w1|w3]
                pl.BlockSpec((1, tH, D),
                             lambda ti, hi, gid: (gid[ti], hi, 0)),              # w2
            ],
            out_specs=pl.BlockSpec((tT, D), lambda ti, hi, gid: (ti, 0)),
        ),
        compiler_params=pltpu.CompilerParams(
            dimension_semantics=("parallel", "arbitrary"),
            vmem_limit_bytes=int(vmem_budget),
        ),
    )(tile_gid, x_sorted, w13, w2c)

    # ---- apply routing weights in f32, scatter-add back to token order ----
    y_pairs = y_sorted[dest]                                       # (K*T, D) f32
    out = jnp.zeros((T, D), jnp.float32).at[sorted_t].add(
        y_pairs * sorted_w[:, None])
    return out


# ---------------------------- pure-JAX reference ----------------------------

def moe_feed_forward_ref(x, gate_w, w1, w2, w3):
    """Float32 reference, mirrors the PyTorch module exactly."""
    D = x.shape[-1]
    x2 = x.reshape(-1, D).astype(jnp.float32)
    scores = x2 @ gate_w.astype(jnp.float32).T
    ew, ei = lax.top_k(scores, 2)
    ew = jax.nn.softmax(ew, axis=-1)
    w1g = jnp.swapaxes(w1[ei], -1, -2)     # (T, 2, D, H)
    w3g = jnp.swapaxes(w3[ei], -1, -2)     # (T, 2, D, H)
    w2g = w2[ei]                           # (T, 2, H, D)
    x1 = jax.nn.silu(jnp.einsum("ti,taio->tao", x2, w1g))
    x3 = jnp.einsum("ti,taio->tao", x2, w3g)
    eo = jnp.einsum("tao,taoi->tai", x1 * x3, w2g)
    return jnp.einsum("tai,ta->ti", eo, ew)


# --------------------------------- main -------------------------------------

if __name__ == "__main__":
    # Small config that still exercises every code path:
    #   T = 2*128 = 256 tokens, E = 8 experts, H = 512 hidden, D = 128.
    dim, hidden_dim, num_experts = 128, 512, 8
    batch, seq = 2, 128

    key = jax.random.PRNGKey(0)
    kx, kg, k1, k2, k3 = jax.random.split(key, 5)

    x = jax.random.normal(kx, (batch, seq, dim), dtype=jnp.float32)
    gate_w = jax.random.normal(kg, (num_experts, dim), dtype=jnp.float32) * 0.1
    w1 = jax.random.normal(k1, (num_experts, hidden_dim, dim), dtype=jnp.float32) * 0.05
    w2 = jax.random.normal(k2, (num_experts, hidden_dim, dim), dtype=jnp.float32) * 0.05
    w3 = jax.random.normal(k3, (num_experts, hidden_dim, dim), dtype=jnp.float32) * 0.05

    out = jax.block_until_ready(jax.jit(moe_feed_forward)(x, gate_w, w1, w2, w3))
    ref = jax.block_until_ready(moe_feed_forward_ref(x, gate_w, w1, w2, w3))

    # bf16 matmuls vs f32 reference -> loose tolerance (routing errors would
    # be O(1), far above this).
    np.testing.assert_allclose(np.asarray(out), np.asarray(ref),
                               rtol=5e-2, atol=5e-2)

    assert out.shape == (batch * seq, dim)
    print("KERNEL_OK")
</pallas_src>

<mosaic_0001>
module attributes {stable_mosaic.version = 11 : i64} {
  func.func @kernel(%arg0: i32, %arg1: i32, %arg2: memref<12xi32, #tpu.memory_space<smem>>, %arg3: memref<128x128xbf16, #tpu.memory_space<vmem>>, %arg4: memref<1x128x1024xbf16, #tpu.memory_space<vmem>>, %arg5: memref<1x512x128xbf16, #tpu.memory_space<vmem>>, %arg6: memref<128x128xf32, #tpu.memory_space<vmem>>) attributes {dimension_semantics = [#tpu.dimension_semantics<parallel>, #tpu.dimension_semantics<arbitrary>], iteration_bounds = array<i64: 12, 1>, scalar_prefetch = 1 : i64, scratch_operands = 0 : i64, tpu.core_type = #tpu.core_type<tc>, window_params = [{transform_indices = @transform_0, window_bounds = array<i64: 128, 128>}, {transform_indices = @transform_1, window_bounds = array<i64: 1, 128, 1024>}, {transform_indices = @transform_2, window_bounds = array<i64: 1, 512, 128>}, {transform_indices = @transform_3, window_bounds = array<i64: 128, 128>}]} {
    %c0_i32 = arith.constant 0 : i32
    %0 = arith.cmpi eq, %arg1, %c0_i32 : i32
    %1 = arith.extui %0 : i1 to i32
    %c0_i32_0 = arith.constant 0 : i32
    %2 = arith.cmpi ne, %1, %c0_i32_0 : i32
    scf.if %2 {
      %cst_14 = arith.constant 0.000000e+00 : f32
      %23 = vector.broadcast %cst_14 : f32 to vector<128x128xf32>
      %c0_15 = arith.constant 0 : index
      %c0_16 = arith.constant 0 : index
      %24 = vector.load %arg6[%c0_15, %c0_16] : memref<128x128xf32, #tpu.memory_space<vmem>>, vector<128x128xf32>
      tpu.vector_store %arg6[%c0_15, %c0_16], %23 {strides = array<i32>} : memref<128x128xf32, #tpu.memory_space<vmem>>, vector<128x128xf32>,
    } else {
    }
    %c0 = arith.constant 0 : index
    %c0_1 = arith.constant 0 : index
    %3 = vector.load %arg3[%c0, %c0_1] : memref<128x128xbf16, #tpu.memory_space<vmem>>, vector<128x128xbf16>
    %c0_2 = arith.constant 0 : index
    %c0_3 = arith.constant 0 : index
    %c0_4 = arith.constant 0 : index
    %4 = vector.load %arg4[%c0_2, %c0_3, %c0_4] : memref<1x128x1024xbf16, #tpu.memory_space<vmem>>, vector<1x128x1024xbf16>
    %5 = vector.shape_cast %4 : vector<1x128x1024xbf16> to vector<128x1024xbf16>
    %c0_5 = arith.constant 0 : index
    %c0_6 = arith.constant 0 : index
    %c0_7 = arith.constant 0 : index
    %6 = vector.load %arg5[%c0_5, %c0_6, %c0_7] : memref<1x512x128xbf16, #tpu.memory_space<vmem>>, vector<1x512x128xbf16>
    %7 = vector.shape_cast %6 : vector<1x512x128xbf16> to vector<512x128xbf16>
    %cst = arith.constant dense<0.000000e+00> : vector<128x1024xf32>
    %8 = tpu.matmul %3, %5, %cst {dimension_numbers = #tpu.dot_dimension_numbers<[1], [0], [0], [1], [0, 0, 1, 1], [], []>} : vector<128x128xbf16>, vector<128x1024xbf16>, vector<128x1024xf32> -> vector<128x1024xf32>
    %9 = vector.extract_strided_slice %8 {offsets = [0, 0], sizes = [128, 512], strides = [1, 1]} : vector<128x1024xf32> to vector<128x512xf32>
    %10 = vector.extract_strided_slice %8 {offsets = [0, 512], sizes = [128, 512], strides = [1, 1]} : vector<128x1024xf32> to vector<128x512xf32>
    %11 = arith.negf %9 : vector<128x512xf32>
    %12 = math.exp %11 : vector<128x512xf32>
    %cst_8 = arith.constant 1.000000e+00 : f32
    %13 = vector.broadcast %cst_8 : f32 to vector<128x512xf32>
    %14 = arith.addf %13, %12 : vector<128x512xf32>
    %15 = arith.divf %13, %14 : vector<128x512xf32>
    %16 = arith.mulf %9, %15 : vector<128x512xf32>
    %17 = arith.mulf %16, %10 : vector<128x512xf32>
    %c0_9 = arith.constant 0 : index
    %c0_10 = arith.constant 0 : index
    %18 = vector.load %arg6[%c0_9, %c0_10] : memref<128x128xf32, #tpu.memory_space<vmem>>, vector<128x128xf32>
    %19 = arith.truncf %17 : vector<128x512xf32> to vector<128x512xbf16>
    %cst_11 = arith.constant dense<0.000000e+00> : vector<128x128xf32>
    %20 = tpu.matmul %19, %7, %cst_11 {dimension_numbers = #tpu.dot_dimension_numbers<[1], [0], [0], [1], [0, 0, 1, 1], [], []>} : vector<128x512xbf16>, vector<512x128xbf16>, vector<128x128xf32> -> vector<128x128xf32>
    %21 = arith.addf %18, %20 : vector<128x128xf32>
    %c0_12 = arith.constant 0 : index
    %c0_13 = arith.constant 0 : index
    %22 = vector.load %arg6[%c0_12, %c0_13] : memref<128x128xf32, #tpu.memory_space<vmem>>, vector<128x128xf32>
    tpu.vector_store %arg6[%c0_12, %c0_13], %21 {strides = array<i32>} : memref<128x128xf32, #tpu.memory_space<vmem>>, vector<128x128xf32>,
    return
  }
  func.func @transform_0(%arg0: i32, %arg1: i32, %arg2: memref<12xi32, #tpu.memory_space<smem>>) -> (i32, i32) {
    %c0_i32 = arith.constant 0 : i32
    %c0_i32_0 = arith.constant 0 : i32
    return %arg0, %c0_i32 : i32, i32
  }
  func.func @transform_1(%arg0: i32, %arg1: i32, %arg2: memref<12xi32, #tpu.memory_space<smem>>) -> (i32, i32, i32) {
    %0 = arith.index_cast %arg0 : i32 to index
    %1 = memref.load %arg2[%0] : memref<12xi32, #tpu.memory_space<smem>>
    %c0_i32 = arith.constant 0 : i32
    %c0_i32_0 = arith.constant 0 : i32
    return %1, %c0_i32, %arg1 : i32, i32, i32
  }
  func.func @transform_2(%arg0: i32, %arg1: i32, %arg2: memref<12xi32, #tpu.memory_space<smem>>) -> (i32, i32, i32) {
    %0 = arith.index_cast %arg0 : i32 to index
    %1 = memref.load %arg2[%0] : memref<12xi32, #tpu.memory_space<smem>>
    %c0_i32 = arith.constant 0 : i32
    %c0_i32_0 = arith.constant 0 : i32
    return %1, %arg1, %c0_i32 : i32, i32, i32
  }
  func.func @transform_3(%arg0: i32, %arg1: i32, %arg2: memref<12xi32, #tpu.memory_space<smem>>) -> (i32, i32) {
    %c0_i32 = arith.constant 0 : i32
    %c0_i32_0 = arith.constant 0 : i32
    return %arg0, %c0_i32 : i32, i32
  }
}

</mosaic_0001>

<bundles_post_ra>
// kernel: custom-call
= control target key start
LH: loop header
LB: loop body
LE: loop exit
PB: predicated region body
PF: predicated region fallthrough
CT: control target
= control target key end

     0   :  { %s6_s0 = inlined_call_operand.vmem [shape: u32[12], index: 0, kind: output, shape index: {}]  }

// kernel: moe_feed_forward.1
= control target key start
LH: loop header
LB: loop body
LE: loop exit
PB: predicated region body
PF: predicated region fallthrough
CT: control target
= control target key end

     0   :  { %s4039_s18 = smov [#allocation3]   ;;  %s6912_s0 = inlined_call_operand.vmem [shape: s32[12], index: 0, kind: input, shape index: {}]   ;;  %s6913_s1 = inlined_call_operand.vmem [shape: bf16[1536,128], index: 1, kind: input, shape index: {}]   ;;  %s6914_s2 = inlined_call_operand.vmem [shape: bf16[8,128,1024], index: 2, kind: input, shape index: {}]   ;;  %s6915_s3 = inlined_call_operand.vmem [shape: bf16[8,512,128], index: 3, kind: input, shape index: {}]   ;;  %s6916_s4 = inlined_call_operand.vmem [shape: f32[1536,128], index: 4, kind: output, shape index: {}]  }
   0x1   :  { %s10_s17 = sshll.u32 %s6912_s0, 4  ;;  %s11_s17 = int_to_ptr.vmem [resolvable:$true] %s10_s17 }
   0x2   :  { %13 = dma.vmem_to_smem %s11_s17, 16, %s4039_s18, [#allocation2] }
   0x3   :  { %4025 = dma.done.wait [#allocation2], 16 }
   0x4   :  { %4026 = vsyncadd [#allocation2], 4294967280 }
   0x5   :  { %16 = sfence }
   0x6   :  { %s4068_s19 = smov 0   ;;  %s4070_s20 = smov 0  }
   0x7   :  { %s4072_s21 = smov 0  }
   0x8 LB: > { %s34_s0 = sadd.s32 1, %s4033_s20  ;;  %p3122_p0 = scmp.ge.s32.totalorder %s4037_s21, 1  ;;  %s4037_s21 = sphi %s4072_s21, %s22_s21   ;;  %s4033_s20 = sphi %s4070_s20, %s7395_s20   ;;  %s4029_s19 = sphi %s4068_s19, %s7394_s19  }
   0x9   : > { %p36_p1 = scmp.ge.s32.totalorder %s34_s0, 12  ;;  %p201_p2 = scmp.lt.s32.totalorder %s4037_s21, 13 }
   0xb   : > { %s7397_s0 = smov (%p36_p1, %s34_s0), 0  ;;  %p202_p3 = pnand %p3122_p0, %p201_p2 }
   0xd   : > { %205 = sbr.rel (%p202_p3) target bundleno = 676 (0x2a4), region = 32 }
  0x12   : > { %s251_s22 = sld [smem:[#allocation3 + %s4029_s19]]  ;;  %s3123_s27 = sshll.u32 %s4029_s19, 4 }
  0x13   : > { %p4137_p5 = scmp.lt.s32.totalorder %s3123_s27, 191  ;;  %s263_s7 = sld [smem:[#allocation3 + %s4029_s19]] }
  0x15   : > { %s7401_s27 = smov (!%p4137_p5, %s3123_s27), 191 }
  0x16   : > { %s3124_s29 = sshll.u32 %s7401_s27, 2  ;;  %s3130_s12 = sshll.u32 %s7401_s27, 3 }
  0x17   : > { %s4174_s6 = scalar_lea.vmem %s6913_s1, %s3124_s29  ;;  %s6885_s15 = scalar_lea.vmem %s6916_s4, %s3130_s12 }
  0x18   : > { %p253_p4 = scmp.lt.s32.totalorder %s251_s22, 7 }
  0x19   : > { %p265_p6 = scmp.lt.s32.totalorder %s263_s7, 7 }
  0x1a   : > { %s7399_s22 = smov (!%p253_p4, %s251_s22), 7 }
  0x1b   : > { %s3613_s23 = sshll.u32 %s7399_s22, 9  ;;  %s7403_s7 = smov (!%p265_p6, %s263_s7), 7 }
  0x1c   : > { %s4092_s26 = scalar_lea.vmem %s6914_s2, %s3613_s23  ;;  %s3614_s8 = sshll.u32 %s7403_s7, 8 }
  0x1d   : > { %v3389_v0 = vld [vmem:[%s4092_s26 + $0x1c0] sm:$0xf]  ;;  %v3679_v2 = vld [vmem:[%s4092_s26 + $0x1c4] sm:$0xf]  ;;  %v3397_v5 = vld [vmem:[%s4092_s26 + $0x1c8] sm:$0xf]  ;;  %s4317_s11 = scalar_lea.vmem %s6915_s3, %s3614_s8 }
  0x1e   : > { %v3683_v1 = vld [vmem:[%s4092_s26 + $0x1dc] sm:$0xf0]  ;;  %v3391_v4 = vld [vmem:[%s4092_s26 + $0x1e0] sm:$0xf0]  ;;  %v3684_v6 = vld [vmem:[%s4092_s26 + $0x1e4] sm:$0xf0] }
  0x1f   : > { %v3390_v3 = vor.u32 %v3683_v1, %v3389_v0  ;;  %v3394_v7 = vor.u32 %v3679_v2, %v3391_v4  ;;  %v3398_v8 = vor.u32 %v3684_v6, %v3397_v5  ;;  %v3680_v9 = vld [vmem:[%s4092_s26 + $0x1cc] sm:$0xf]  ;;  %v3357_v11 = vld [vmem:[%s4092_s26 + $0x180] sm:$0xf]  ;;  %v3671_v14 = vld [vmem:[%s4092_s26 + $0x184] sm:$0xf] }
  0x20   : > { %v3399_v10 = vld [vmem:[%s4092_s26 + $0x1e8] sm:$0xf0]  ;;  %v3675_v13 = vld [vmem:[%s4092_s26 + $0x19c] sm:$0xf0]  ;;  %v3359_v15 = vld [vmem:[%s4092_s26 + $0x1a0] sm:$0xf0] }
  0x21   : > { %813 = vmatpush.bf16.msra.mxu0 %v3390_v3  ;;  %v3402_v12 = vor.u32 %v3680_v9, %v3399_v10  ;;  %862 = vmatpush.bf16.msra.mxu1 %v3394_v7  ;;  %v3358_v16 = vor.u32 %v3675_v13, %v3357_v11  ;;  %v3362_v17 = vor.u32 %v3671_v14, %v3359_v15  ;;  %v3365_v18 = vld [vmem:[%s4092_s26 + $0x188] sm:$0xf]  ;;  %v3672_v20 = vld [vmem:[%s4092_s26 + $0x18c] sm:$0xf]  ;;  %v3325_v23 = vld [vmem:[%s4092_s26 + $0x140] sm:$0xf] }
  0x22   : > { %911 = vmatpush.bf16.msra.mxu2 %v3398_v8  ;;  %v3676_v19 = vld [vmem:[%s4092_s26 + $0x1a4] sm:$0xf0]  ;;  %v3367_v22 = vld [vmem:[%s4092_s26 + $0x1a8] sm:$0xf0]  ;;  %v3667_v24 = vld [vmem:[%s4092_s26 + $0x15c] sm:$0xf0] }
  0x23   : > { %960 = vmatpush.bf16.msra.mxu3 %v3402_v12  ;;  %v3366_v21 = vor.u32 %v3676_v19, %v3365_v18  ;;  %v3370_v25 = vor.u32 %v3672_v20, %v3367_v22  ;;  %v3663_v26 = vld [vmem:[%s4092_s26 + $0x144] sm:$0xf]  ;;  %v3333_v28 = vld [vmem:[%s4092_s26 + $0x148] sm:$0xf]  ;;  %v3326_v29 = vor.u32 %v3667_v24, %v3325_v23  ;;  %v3664_v31 = vld [vmem:[%s4092_s26 + $0x14c] sm:$0xf] }
  0x24   : > { %v3327_v27 = vld [vmem:[%s4092_s26 + $0x160] sm:$0xf0]  ;;  %v3668_v30 = vld [vmem:[%s4092_s26 + $0x164] sm:$0xf0]  ;;  %v3335_v32 = vld [vmem:[%s4092_s26 + $0x168] sm:$0xf0] }
  0x25   : > { %814 = vmatpush.bf16.msra.mxu0 %v3358_v16  ;;  %863 = vmatpush.bf16.msra.mxu1 %v3362_v17  ;;  %v3330_v33 = vor.u32 %v3663_v26, %v3327_v27  ;;  %v3334_v34 = vor.u32 %v3668_v30, %v3333_v28  ;;  %v3293_v35 = vld [vmem:[%s4092_s26 + $0x100] sm:$0xf]  ;;  %v3655_v37 = vld [vmem:[%s4092_s26 + $0x104] sm:$0xf]  ;;  %v3338_v38 = vor.u32 %v3664_v31, %v3335_v32  ;;  %v3301_v40 = vld [vmem:[%s4092_s26 + $0x108] sm:$0xf] }
  0x26   : > { %912 = vmatpush.bf16.msra.mxu2 %v3366_v21  ;;  %v3659_v36 = vld [vmem:[%s4092_s26 + $0x11c] sm:$0xf0]  ;;  %v3295_v39 = vld [vmem:[%s4092_s26 + $0x120] sm:$0xf0]  ;;  %v3660_v41 = vld [vmem:[%s4092_s26 + $0x124] sm:$0xf0] }
  0x27   : > { %961 = vmatpush.bf16.msra.mxu3 %v3370_v25  ;;  %v3656_v42 = vld [vmem:[%s4092_s26 + $0x10c] sm:$0xf]  ;;  %v3294_v44 = vor.u32 %v3659_v36, %v3293_v35  ;;  %v3298_v45 = vor.u32 %v3655_v37, %v3295_v39  ;;  %v3302_v46 = vor.u32 %v3660_v41, %v3301_v40  ;;  %v3261_v47 = vld [vmem:[%s4092_s26 + $0xc0] sm:$0xf]  ;;  %v3647_v49 = vld [vmem:[%s4092_s26 + $0xc4] sm:$0xf] }
  0x28   : > { %v3303_v43 = vld [vmem:[%s4092_s26 + $0x128] sm:$0xf0]  ;;  %v3651_v48 = vld [vmem:[%s4092_s26 + $0xdc] sm:$0xf0]  ;;  %v3263_v51 = vld [vmem:[%s4092_s26 + $0xe0] sm:$0xf0] }
  0x29   : > { %815 = vmatpush.bf16.msra.mxu0 %v3326_v29  ;;  %864 = vmatpush.bf16.msra.mxu1 %v3330_v33  ;;  %v3306_v50 = vor.u32 %v3656_v42, %v3303_v43  ;;  %v3269_v52 = vld [vmem:[%s4092_s26 + $0xc8] sm:$0xf]  ;;  %v3648_v54 = vld [vmem:[%s4092_s26 + $0xcc] sm:$0xf]  ;;  %v3262_v56 = vor.u32 %v3651_v48, %v3261_v47  ;;  %v3266_v57 = vor.u32 %v3647_v49, %v3263_v51  ;;  %v3229_v59 = vld [vmem:[%s4092_s26 + $0x80] sm:$0xf] }
  0x2a   : > { %913 = vmatpush.bf16.msra.mxu2 %v3334_v34  ;;  %v3652_v53 = vld [vmem:[%s4092_s26 + $0xe4] sm:$0xf0]  ;;  %v3271_v55 = vld [vmem:[%s4092_s26 + $0xe8] sm:$0xf0]  ;;  %v3643_v60 = vld [vmem:[%s4092_s26 + $0x9c] sm:$0xf0] }
  0x2b   : > { %962 = vmatpush.bf16.msra.mxu3 %v3338_v38  ;;  %v3270_v58 = vor.u32 %v3652_v53, %v3269_v52  ;;  %v3639_v61 = vld [vmem:[%s4092_s26 + $0x84] sm:$0xf]  ;;  %v3274_v62 = vor.u32 %v3648_v54, %v3271_v55  ;;  %v3237_v0 = vld [vmem:[%s4092_s26 + $0x88] sm:$0xf]  ;;  %v3640_v2 = vld [vmem:[%s4092_s26 + $0x8c] sm:$0xf]  ;;  %v3230_v4 = vor.u32 %v3643_v60, %v3229_v59 }
  0x2c   : > { %v3231_v63 = vld [vmem:[%s4092_s26 + $0xa0] sm:$0xf0]  ;;  %v3644_v1 = vld [vmem:[%s4092_s26 + $0xa4] sm:$0xf0]  ;;  %v3239_v3 = vld [vmem:[%s4092_s26 + $0xa8] sm:$0xf0] }
  0x2d   : > { %816 = vmatpush.bf16.msra.mxu0 %v3294_v44  ;;  %865 = vmatpush.bf16.msra.mxu1 %v3298_v45  ;;  %v3234_v5 = vor.u32 %v3639_v61, %v3231_v63  ;;  %v3238_v6 = vor.u32 %v3644_v1, %v3237_v0  ;;  %v3197_v7 = vld [vmem:[%s4092_s26 + $0x40] sm:$0xf]  ;;  %v3631_v9 = vld [vmem:[%s4092_s26 + $0x44] sm:$0xf]  ;;  %v3242_v10 = vor.u32 %v3640_v2, %v3239_v3  ;;  %v3205_v12 = vld [vmem:[%s4092_s26 + $0x48] sm:$0xf] }
  0x2e   : > { %914 = vmatpush.bf16.msra.mxu2 %v3302_v46  ;;  %v3635_v8 = vld [vmem:[%s4092_s26 + $0x5c] sm:$0xf0]  ;;  %v3199_v11 = vld [vmem:[%s4092_s26 + $0x60] sm:$0xf0]  ;;  %v3636_v13 = vld [vmem:[%s4092_s26 + $0x64] sm:$0xf0] }
  0x2f   : > { %963 = vmatpush.bf16.msra.mxu3 %v3306_v50  ;;  %v3632_v14 = vld [vmem:[%s4092_s26 + $0x4c] sm:$0xf]  ;;  %v3198_v16 = vor.u32 %v3635_v8, %v3197_v7  ;;  %v3165_v17 = vld [vmem:[%s4092_s26] sm:$0xf]  ;;  %v3202_v18 = vor.u32 %v3631_v9, %v3199_v11  ;;  %v3206_v19 = vor.u32 %v3636_v13, %v3205_v12  ;;  %v3623_v21 = vld [vmem:[%s4092_s26 + $0x4] sm:$0xf] }
  0x30   : > { %v3207_v15 = vld [vmem:[%s4092_s26 + $0x68] sm:$0xf0]  ;;  %v3627_v20 = vld [vmem:[%s4092_s26 + $0x1c] sm:$0xf0]  ;;  %v3167_v22 = vld [vmem:[%s4092_s26 + $0x20] sm:$0xf0] }
  0x31   : > { %817 = vmatpush.bf16.msra.mxu0 %v3262_v56  ;;  %866 = vmatpush.bf16.msra.mxu1 %v3266_v57  ;;  %v3210_v23 = vor.u32 %v3632_v14, %v3207_v15  ;;  %v3173_v24 = vld [vmem:[%s4092_s26 + $0x8] sm:$0xf]  ;;  %v3624_v26 = vld [vmem:[%s4092_s26 + $0xc] sm:$0xf]  ;;  %v3413_v28 = vld [vmem:[%s4092_s26 + $0x1d8] sm:$0xf]  ;;  %v3166_v30 = vor.u32 %v3627_v20, %v3165_v17  ;;  %v3170_v33 = vor.u32 %v3623_v21, %v3167_v22 }
  0x32   : > { %915 = vmatpush.bf16.msra.mxu2 %v3270_v58  ;;  %v3628_v25 = vld [vmem:[%s4092_s26 + $0x24] sm:$0xf0]  ;;  %v3175_v27 = vld [vmem:[%s4092_s26 + $0x28] sm:$0xf0]  ;;  %v3686_v29 = vld [vmem:[%s4092_s26 + $0x1f4] sm:$0xf0] }
  0x33   : > { %964 = vmatpush.bf16.msra.mxu3 %v3274_v62  ;;  %v3682_v31 = vld [vmem:[%s4092_s26 + $0x1dc] sm:$0xf]  ;;  %v3174_v34 = vor.u32 %v3628_v25, %v3173_v24  ;;  %v4182_v35 = vld [vmem:[%s4174_s6] sm:$0xff]  ;;  %v3178_v36 = vor.u32 %v3624_v26, %v3175_v27  ;;  %v3414_v37 = vor.u32 %v3686_v29, %v3413_v28  ;;  %v3405_v38 = vld [vmem:[%s4092_s26 + $0x1d0] sm:$0xf] }
  0x34   : > { %v3415_v32 = vld [vmem:[%s4092_s26 + $0x1f8] sm:$0xf0]  ;;  %v3685_v39 = vld [vmem:[%s4092_s26 + $0x1ec] sm:$0xf0]  ;;  %v3681_v40 = vld [vmem:[%s4092_s26 + $0x1d4] sm:$0xf] }
  0x35   : > { %818 = vmatpush.bf16.msra.mxu0 %v3230_v4  ;;  %867 = vmatpush.bf16.msra.mxu1 %v3234_v5  ;;  %v3418_v41 = vor.u32 %v3682_v31, %v3415_v32  ;;  %v3407_v42 = vld [vmem:[%s4092_s26 + $0x1f0] sm:$0xf0]  ;;  %v3381_v43 = vld [vmem:[%s4092_s26 + $0x198] sm:$0xf]  ;;  %v3674_v45 = vld [vmem:[%s4092_s26 + $0x19c] sm:$0xf]  ;;  %v3406_v47 = vor.u32 %v3685_v39, %v3405_v38 }
  0x36   : > { %916 = vmatpush.bf16.msra.mxu2 %v3238_v6  ;;  %v3678_v44 = vld [vmem:[%s4092_s26 + $0x1b4] sm:$0xf0]  ;;  %v3383_v46 = vld [vmem:[%s4092_s26 + $0x1b8] sm:$0xf0]  ;;  %v3410_v48 = vor.u32 %v3681_v40, %v3407_v42  ;;  %v3373_v50 = vld [vmem:[%s4092_s26 + $0x190] sm:$0xf] }
  0x37   : > { %965 = vmatpush.bf16.msra.mxu3 %v3242_v10  ;;  %v3382_v49 = vor.u32 %v3678_v44, %v3381_v43  ;;  %v3677_v51 = vld [vmem:[%s4092_s26 + $0x1ac] sm:$0xf0]  ;;  %v3386_v52 = vor.u32 %v3674_v45, %v3383_v46  ;;  %v3673_v53 = vld [vmem:[%s4092_s26 + $0x194] sm:$0xf]  ;;  %v3349_v56 = vld [vmem:[%s4092_s26 + $0x158] sm:$0xf] }
  0x38   : > { %v3375_v54 = vld [vmem:[%s4092_s26 + $0x1b0] sm:$0xf0]  ;;  %v3374_v55 = vor.u32 %v3677_v51, %v3373_v50  ;;  %v3670_v57 = vld [vmem:[%s4092_s26 + $0x174] sm:$0xf0]  ;;  %v3666_v58 = vld [vmem:[%s4092_s26 + $0x15c] sm:$0xf] }
  0x39   : > { %819 = vmatpush.bf16.msra.mxu0 %v3198_v16  ;;  %868 = vmatpush.bf16.msra.mxu1 %v3202_v18  ;;  %v3378_v59 = vor.u32 %v3673_v53, %v3375_v54  ;;  %v3350_v60 = vor.u32 %v3670_v57, %v3349_v56  ;;  %v3351_v61 = vld [vmem:[%s4092_s26 + $0x178] sm:$0xf0]  ;;  %v3341_v62 = vld [vmem:[%s4092_s26 + $0x150] sm:$0xf]  ;;  %v3665_v1 = vld [vmem:[%s4092_s26 + $0x154] sm:$0xf] }
  0x3a   : > { %917 = vmatpush.bf16.msra.mxu2 %v3206_v19  ;;  %v3669_v63 = vld [vmem:[%s4092_s26 + $0x16c] sm:$0xf0]  ;;  %v3354_v0 = vor.u32 %v3666_v58, %v3351_v61  ;;  %v3343_v2 = vld [vmem:[%s4092_s26 + $0x170] sm:$0xf0]  ;;  %v4209_v5 = vld [vmem:[%s4174_s6 + $0x8] sm:$0xff] }
  0x3b   : > { %966 = vmatpush.bf16.msra.mxu3 %v3210_v23  ;;  %v3342_v3 = vor.u32 %v3669_v63, %v3341_v62  ;;  %v3346_v4 = vor.u32 %v3665_v1, %v3343_v2  ;;  %v3317_v6 = vld [vmem:[%s4092_s26 + $0x118] sm:$0xf]  ;;  %v3658_v8 = vld [vmem:[%s4092_s26 + $0x11c] sm:$0xf]  ;;  %v3309_v11 = vld [vmem:[%s4092_s26 + $0x110] sm:$0xf] }
  0x3c   : > { %v3662_v7 = vld [vmem:[%s4092_s26 + $0x134] sm:$0xf0]  ;;  %v3319_v10 = vld [vmem:[%s4092_s26 + $0x138] sm:$0xf0]  ;;  %v3661_v12 = vld [vmem:[%s4092_s26 + $0x12c] sm:$0xf0] }
  0x3d   : > { %820 = vmatpush.bf16.msra.mxu0 %v3166_v30  ;;  %869 = vmatpush.bf16.msra.mxu1 %v3170_v33  ;;  %v3318_v9 = vor.u32 %v3662_v7, %v3317_v6  ;;  %v3322_v13 = vor.u32 %v3658_v8, %v3319_v10  ;;  %v3310_v14 = vor.u32 %v3661_v12, %v3309_v11  ;;  %v3657_v15 = vld [vmem:[%s4092_s26 + $0x114] sm:$0xf]  ;;  %v3285_v19 = vld [vmem:[%s4092_s26 + $0xd8] sm:$0xf]  ;;  %v3650_v21 = vld [vmem:[%s4092_s26 + $0xdc] sm:$0xf] }
  0x3e   : > { %918 = vmatpush.bf16.msra.mxu2 %v3174_v34  ;;  %v3311_v16 = vld [vmem:[%s4092_s26 + $0x130] sm:$0xf0]  ;;  %v3654_v20 = vld [vmem:[%s4092_s26 + $0xf4] sm:$0xf0]  ;;  %v3287_v23 = vld [vmem:[%s4092_s26 + $0xf8] sm:$0xf0] }
  0x3f   : > { %967 = vmatpush.bf16.msra.mxu3 %v3178_v36  ;;  %v3314_v17 = vor.u32 %v3657_v15, %v3311_v16  ;;  %v4224_v18 = vld [vmem:[%s4174_s6 + $0x10] sm:$0xff]  ;;  %v3286_v22 = vor.u32 %v3654_v20, %v3285_v19  ;;  %v3290_v26 = vor.u32 %v3650_v21, %v3287_v23  ;;  %v4239_v31 = vld [vmem:[%s4174_s6 + $0x18] sm:$0xff]  ;;  %v4254_v45 = vld [vmem:[%s4174_s6 + $0x20] sm:$0xff] }
  0x40   : > { %821 = vmatmul.bf16.vlgmr.msra.gmra.mxu0 %v4182_v35  ;;  %870 = vmatmul.bf16.vlgmr.msra.gmra.mxu1 %v4182_v35  ;;  %v3277_v24 = vld [vmem:[%s4092_s26 + $0xd0] sm:$0xf]  ;;  %v3649_v28 = vld [vmem:[%s4092_s26 + $0xd4] sm:$0xf]  ;;  %v3253_v32 = vld [vmem:[%s4092_s26 + $0x98] sm:$0xf] }
  0x41   : > { %919 = vmatmul.bf16.vlgmr.msra.gmra.mxu2 %v4182_v35  ;;  %1009 = vmatpush.bf16.msrb.mxu0 %v3406_v47  ;;  %v3653_v25 = vld [vmem:[%s4092_s26 + $0xec] sm:$0xf0]  ;;  %v3279_v29 = vld [vmem:[%s4092_s26 + $0xf0] sm:$0xf0]  ;;  %v3646_v33 = vld [vmem:[%s4092_s26 + $0xb4] sm:$0xf0] }
  0x42   : > { %1107 = vmatpush.bf16.msrb.mxu2 %v3414_v37  ;;  %968 = vmatmul.bf16.vlgmr.msra.gmra.mxu3 %v4182_v35  ;;  %v3278_v27 = vor.u32 %v3653_v25, %v3277_v24  ;;  %v3282_v30 = vor.u32 %v3649_v28, %v3279_v29  ;;  %v3642_v34 = vld [vmem:[%s4092_s26 + $0x9c] sm:$0xf]  ;;  %v3254_v36 = vor.u32 %v3646_v33, %v3253_v32  ;;  %v3245_v38 = vld [vmem:[%s4092_s26 + $0x90] sm:$0xf]  ;;  %v3641_v42 = vld [vmem:[%s4092_s26 + $0x94] sm:$0xf] }
  0x43   : > { %1156 = vmatpush.bf16.msrb.mxu3 %v3418_v41  ;;  %1058 = vmatpush.bf16.msrb.mxu1 %v3410_v48  ;;  %v3255_v37 = vld [vmem:[%s4092_s26 + $0xb8] sm:$0xf0]  ;;  %v3645_v39 = vld [vmem:[%s4092_s26 + $0xac] sm:$0xf0]  ;;  %v3247_v43 = vld [vmem:[%s4092_s26 + $0xb0] sm:$0xf0] }
  0x44   : > { %v3258_v40 = vor.u32 %v3642_v34, %v3255_v37  ;;  %v3246_v41 = vor.u32 %v3645_v39, %v3245_v38  ;;  %v3250_v44 = vor.u32 %v3641_v42, %v3247_v43  ;;  %v3221_v46 = vld [vmem:[%s4092_s26 + $0x58] sm:$0xf]  ;;  %v3634_v48 = vld [vmem:[%s4092_s26 + $0x5c] sm:$0xf]  ;;  %v3213_v51 = vld [vmem:[%s4092_s26 + $0x50] sm:$0xf] }
  0x45   : > { %1010 = vmatpush.bf16.msrb.mxu0 %v3374_v55  ;;  %v3638_v47 = vld [vmem:[%s4092_s26 + $0x74] sm:$0xf0]  ;;  %v3223_v50 = vld [vmem:[%s4092_s26 + $0x78] sm:$0xf0]  ;;  %v3633_v55 = vld [vmem:[%s4092_s26 + $0x54] sm:$0xf] }
  0x46   : > { %1108 = vmatpush.bf16.msrb.mxu2 %v3382_v49  ;;  %v3222_v49 = vor.u32 %v3638_v47, %v3221_v46  ;;  %v3226_v53 = vor.u32 %v3634_v48, %v3223_v50  ;;  %v3215_v56 = vld [vmem:[%s4092_s26 + $0x70] sm:$0xf0]  ;;  %v4269_v58 = vld [vmem:[%s4174_s6 + $0x28] sm:$0xff]  ;;  %v3626_v61 = vld [vmem:[%s4092_s26 + $0x1c] sm:$0xf] }
  0x47   : > { %1157 = vmatpush.bf16.msrb.mxu3 %v3386_v52  ;;  %1059 = vmatpush.bf16.msrb.mxu1 %v3378_v59  ;;  %v3637_v52 = vld [vmem:[%s4092_s26 + $0x6c] sm:$0xf0]  ;;  %v3218_v57 = vor.u32 %v3633_v55, %v3215_v56  ;;  %v3189_v59 = vld [vmem:[%s4092_s26 + $0x18] sm:$0xf]  ;;  %v3191_v63 = vld [vmem:[%s4092_s26 + $0x38] sm:$0xf0] }
  0x48   : > { %v3214_v54 = vor.u32 %v3637_v52, %v3213_v51  ;;  %v3629_v1 = vld [vmem:[%s4092_s26 + $0x2c] sm:$0xf0]  ;;  %v3194_v2 = vor.u32 %v3626_v61, %v3191_v63  ;;  %v3183_v6 = vld [vmem:[%s4092_s26 + $0x30] sm:$0xf0]  ;;  %v3710_v15 = vld [vmem:[%s4317_s11 + $0xb8] sm:$0xff] }
  0x49   : > { %1011 = vmatpush.bf16.msrb.mxu0 %v3342_v3  ;;  %v4284_v8 = vld [vmem:[%s4174_s6 + $0x30] sm:$0xff]  ;;  %v3718_v16 = vld [vmem:[%s4317_s11 + $0xf8] sm:$0xff] }
  0x4a   : > { %1109 = vmatpush.bf16.msrb.mxu2 %v3350_v60  ;;  %v3630_v60 = vld [vmem:[%s4092_s26 + $0x34] sm:$0xf0] }
  0x4b   : > { %1158 = vmatpush.bf16.msrb.mxu3 %v3354_v0  ;;  %1060 = vmatpush.bf16.msrb.mxu1 %v3346_v4  ;;  %v3190_v62 = vor.u32 %v3630_v60, %v3189_v59  ;;  %v3181_v0 = vld [vmem:[%s4092_s26 + $0x10] sm:$0xf]  ;;  %v3625_v4 = vld [vmem:[%s4092_s26 + $0x14] sm:$0xf] }
  0x4c   : > { %v3182_v3 = vor.u32 %v3629_v1, %v3181_v0  ;;  %v3186_v7 = vor.u32 %v3625_v4, %v3183_v6 }
  0x4d   : > { %1012 = vmatpush.bf16.msrb.mxu0 %v3310_v14 }
  0x4e   : > { %1110 = vmatpush.bf16.msrb.mxu2 %v3318_v9  ;;  %v4291_v9 = vld [vmem:[%s4174_s6 + $0x38] sm:$0xff] }
  0x4f   : > { %1159 = vmatpush.bf16.msrb.mxu3 %v3322_v13  ;;  %1061 = vmatpush.bf16.msrb.mxu1 %v3314_v17 }
  0x50   : > { %826 = vmatmul.bf16.gmra.mxu0 %v4209_v5  ;;  %875 = vmatmul.bf16.gmra.mxu1 %v4209_v5 }
  0x51   : > { %924 = vmatmul.bf16.gmra.mxu2 %v4209_v5  ;;  %1013 = vmatpush.bf16.msrb.mxu0 %v3278_v27  ;;  %v3702_v27 = vld [vmem:[%s4317_s11 + $0x78] sm:$0xff] }
  0x52   : > { %973 = vmatmul.bf16.gmra.mxu3 %v4209_v5  ;;  %1111 = vmatpush.bf16.msrb.mxu2 %v3286_v22 }
  0x53   : > { %1160 = vmatpush.bf16.msrb.mxu3 %v3290_v26  ;;  %1062 = vmatpush.bf16.msrb.mxu1 %v3282_v30  ;;  %v3694_v26 = vld [vmem:[%s4317_s11 + $0x38] sm:$0xff] }
  0x55   : > { %1014 = vmatpush.bf16.msrb.mxu0 %v3246_v41 }
  0x56   : > { %1112 = vmatpush.bf16.msrb.mxu2 %v3254_v36 }
  0x57   : > { %1161 = vmatpush.bf16.msrb.mxu3 %v3258_v40  ;;  %1063 = vmatpush.bf16.msrb.mxu1 %v3250_v44 }
  0x59   : > { %1015 = vmatpush.bf16.msrb.mxu0 %v3214_v54 }
  0x5a   : > { %1113 = vmatpush.bf16.msrb.mxu2 %v3222_v49 }
  0x5b   : > { %1162 = vmatpush.bf16.msrb.mxu3 %v3226_v53  ;;  %1064 = vmatpush.bf16.msrb.mxu1 %v3218_v57 }
  0x5d   : > { %1016 = vmatpush.bf16.msrb.mxu0 %v3182_v3 }
  0x5e   : > { %1114 = vmatpush.bf16.msrb.mxu2 %v3190_v62 }
  0x5f   : > { %1163 = vmatpush.bf16.msrb.mxu3 %v3194_v2  ;;  %1065 = vmatpush.bf16.msrb.mxu1 %v3186_v7 }
  0x60   : > { %831 = vmatmul.bf16.gmra.mxu0 %v4224_v18  ;;  %880 = vmatmul.bf16.gmra.mxu1 %v4224_v18 }
  0x61   : > { %929 = vmatmul.bf16.gmra.mxu2 %v4224_v18  ;;  %2789 = vmatpush.bf16.msra.mxu0 %v3694_v26 }
  0x62   : > { %978 = vmatmul.bf16.gmra.mxu3 %v4224_v18  ;;  %2887 = vmatpush.bf16.msra.mxu2 %v3710_v15 }
  0x63   : > { %2936 = vmatpush.bf16.msra.mxu3 %v3718_v16  ;;  %2838 = vmatpush.bf16.msra.mxu1 %v3702_v27 }
  0x70   : > { %836 = vmatmul.bf16.gmra.mxu0 %v4239_v31  ;;  %885 = vmatmul.bf16.gmra.mxu1 %v4239_v31 }
  0x71   : > { %934 = vmatmul.bf16.gmra.mxu2 %v4239_v31 }
  0x72   : > { %983 = vmatmul.bf16.gmra.mxu3 %v4239_v31 }
  0x80   : > { %841 = vmatmul.bf16.gmra.mxu0 %v4254_v45  ;;  %890 = vmatmul.bf16.gmra.mxu1 %v4254_v45 }
  0x81   : > { %939 = vmatmul.bf16.gmra.mxu2 %v4254_v45 }
  0x82   : > { %988 = vmatmul.bf16.gmra.mxu3 %v4254_v45 }
  0x90   : > { %846 = vmatmul.bf16.gmra.mxu0 %v4269_v58  ;;  %895 = vmatmul.bf16.gmra.mxu1 %v4269_v58 }
  0x91   : > { %944 = vmatmul.bf16.gmra.mxu2 %v4269_v58 }
  0x92   : > { %993 = vmatmul.bf16.gmra.mxu3 %v4269_v58 }
  0xa0   : > { %851 = vmatmul.bf16.gmra.mxu0 %v4284_v8  ;;  %900 = vmatmul.bf16.gmra.mxu1 %v4284_v8 }
  0xa1   : > { %949 = vmatmul.bf16.gmra.mxu2 %v4284_v8 }
  0xa2   : > { %998 = vmatmul.bf16.gmra.mxu3 %v4284_v8 }
  0xb0   : > { %856 = vmatmul.bf16.gmra.mxu0 %v4291_v9  ;;  %905 = vmatmul.bf16.gmra.mxu1 %v4291_v9 }
  0xb1   : > { %954 = vmatmul.bf16.gmra.mxu2 %v4291_v9 }
  0xb2   : > { %1003 = vmatmul.bf16.gmra.mxu3 %v4291_v9 }
  0xbd   : > { %v4306_v10 = vpop.f32.mrf.mxu0  ;;  %v4309_v12 = vpop.f32.mrf.mxu1 }
  0xbe   : > { %v3419_v11 = vmul.f32 -1.442695, %v4306_v10  ;;  %v3420_v13 = vmul.f32 -1.442695, %v4309_v12 }
  0xc0   : > { %1017 = vmatmul.bf16.vlgmr.msrb.gmra.mxu0 %v4182_v35  ;;  %1066 = vmatmul.bf16.vlgmr.msrb.gmra.mxu1 %v4182_v35  ;;  %3745 = vpow2.f32 %v3419_v11 }
  0xc1   : > { %1115 = vmatmul.bf16.vlgmr.msrb.gmra.mxu2 %v4182_v35  ;;  %3747 = vpow2.f32 %v3420_v13  ;;  %v3701_v13 = vld [vmem:[%s4317_s11 + $0x70] sm:$0xff] }
  0xc2   : > { %1164 = vmatmul.bf16.vlgmr.msrb.gmra.mxu3 %v4182_v35  ;;  %2839 = vmatpush.bf16.msra.mxu1 %v3701_v13 }
  0xc4   : > { %v4312_v35 = vpop.f32.mrf.mxu2 }
  0xc5   : > { %v4320_v14 = vpop.f32.mrf.mxu3  ;;  %v4331_v22 = vpop.f32.mrf.mxu0 }
  0xc6   : > { %v3746_v17 = vpop.eup %3745  ;;  %v3422_v19 = vmul.f32 -1.442695, %v4320_v14  ;;  %v3423_v24 = vmul.f32 -1.442695, %v4331_v22  ;;  %v4337_v25 = vpop.f32.mrf.mxu1 }
  0xc7   : > { %v3748_v20 = vpop.eup %3747  ;;  %v4328_v21 = vadd.f32 1.0, %v3746_v17 }
  0xc8   : > { %v4333_v23 = vadd.f32 1.0, %v3748_v20 }
  0xc9   : > { %vm1466_vm0 = vweird.f32 %v4328_v21  ;;  %v1472_v60 = vand.u32 2147483648, %v4328_v21 }
  0xca   : > { %v1485_v61 = vand.u32 2147483647, %v4333_v23  ;;  %vm1481_vm1 = vweird.f32 %v4333_v23  ;;  %v1487_v1 = vand.u32 2147483648, %v4333_v23 }
  0xcb   : > { %v1473_v17 = vor.u32 1.1754944e-38, %v1472_v60 }
  0xcc   : > { %v4341_v28 = vpop.f32.mrf.mxu2  ;;  %vm4416_vm4 = vcmp.eq.f32.partialorder %v1485_v61, 8.507059e+37 }
  0xcd   : > { %v3425_v30 = vmul.f32 -1.442695, %v4341_v28  ;;  %v4350_v36 = vpop.f32.mrf.mxu3  ;;  %v4360_v41 = vpop.f32.mrf.mxu0 }
  0xce   : > { %v3426_v40 = vmul.f32 -1.442695, %v4350_v36  ;;  %v4363_v43 = vpop.f32.mrf.mxu1  ;;  %v3427_v46 = vmul.f32 -1.442695, %v4360_v41 }
  0xcf   : > { %v3428_v4 = vmul.f32 -1.442695, %v4363_v43 }
  0xd0   : > { %1022 = vmatmul.bf16.gmra.mxu0 %v4209_v5  ;;  %1071 = vmatmul.bf16.gmra.mxu1 %v4209_v5 }
  0xd1   : > { %1120 = vmatmul.bf16.gmra.mxu2 %v4209_v5 }
  0xd2   : > { %1169 = vmatmul.bf16.gmra.mxu3 %v4209_v5  ;;  %v3421_v5 = vmul.f32 -1.442695, %v4312_v35 }
  0xd4   : > { %3749 = vpow2.f32 %v3421_v5  ;;  %v4390_v62 = vpop.f32.mrf.mxu2 }
  0xd5   : > { %3751 = vpow2.f32 %v3422_v19  ;;  %v4392_v63 = vpop.f32.mrf.mxu3  ;;  %v4403_v6 = vpop.f32.mrf.mxu0 }
  0xd6   : > { %3753 = vrcp.f32 %v4328_v21  ;;  %v4405_v7 = vpop.f32.mrf.mxu1 }
  0xd7   : > { %3755 = vrcp.f32 %v4333_v23  ;;  %v3432_v26 = vmul.f32 -1.442695, %v4405_v7 }
  0xd8   : > { %3757 = vpow2.f32 %v3423_v24 }
  0xda   : > { %v3750_v29 = vpop.eup %3749 }
  0xdb   : > { %v3752_v32 = vpop.eup %3751  ;;  %v4346_v33 = vadd.f32 1.0, %v3750_v29  ;;  %v1488_v29 = vor.u32 1.1754944e-38, %v1487_v1 }
  0xdc   : > { %v4348_v34 = vpop.eup %3753  ;;  %v4352_v37 = vadd.f32 1.0, %v3752_v32 }
  0xdd   : > { %v4354_v38 = vpop.eup %3755  ;;  %v1462_v39 = vmul.f32 %v4348_v34, %v4328_v21  ;;  %vm1467_vm2 = vweird.f32 %v4348_v34  ;;  %v1502_v20 = vand.u32 2147483648, %v4346_v33  ;;  %vm1496_vm7 = vweird.f32 %v4346_v33  ;;  %v4484_v1 = vpop.f32.mrf.mxu3 }
  0xde   : > { %v3758_v42 = vpop.eup %3757  ;;  %v1477_v44 = vmul.f32 %v4354_v38, %v4333_v23  ;;  %v1517_v24 = vand.u32 2147483648, %v4352_v37  ;;  %vm4426_vm5 = vmor %vm1466_vm0, %vm1467_vm2  ;;  %vm1482_vm6 = vweird.f32 %v4354_v38  ;;  %vm1511_vm9 = vweird.f32 %v4352_v37 }
  0xdf   : > { %v1463_v48 = vsub.f32 1.0, %v1462_v39  ;;  %v4372_v49 = vadd.f32 1.0, %v3758_v42  ;;  %vm4452_vm8 = vmor %vm1481_vm1, %vm1482_vm6 }
  0xe0   : > { %1027 = vmatmul.bf16.gmra.mxu0 %v4224_v18  ;;  %1076 = vmatmul.bf16.gmra.mxu1 %v4224_v18  ;;  %v1478_v52 = vsub.f32 1.0, %v1477_v44 }
  0xe1   : > { %1125 = vmatmul.bf16.gmra.mxu2 %v4224_v18  ;;  %v1464_v54 = vmul.f32 %v4348_v34, %v1463_v48  ;;  %v1515_v48 = vand.u32 2147483647, %v4352_v37  ;;  %vm1526_vm14 = vweird.f32 %v4372_v49 }
  0xe2   : > { %1174 = vmatmul.bf16.gmra.mxu3 %v4224_v18  ;;  %v3424_v18 = vmul.f32 -1.442695, %v4337_v25  ;;  %v1479_v0 = vmul.f32 %v4354_v38, %v1478_v52 }
  0xe3   : > { %v1465_v2 = vadd.f32 %v4348_v34, %v1464_v54  ;;  %vm4495_vm12 = vcmp.eq.f32.partialorder %v1515_v48, 8.507059e+37 }
  0xe4   : > { %3759 = vpow2.f32 %v3424_v18  ;;  %v1480_v27 = vadd.f32 %v4354_v38, %v1479_v0  ;;  %v1500_v18 = vand.u32 2147483647, %v4346_v33  ;;  %v4482_v0 = vpop.f32.mrf.mxu2 }
  0xe5   : > { %3761 = vpow2.f32 %v3425_v30  ;;  %v1469_v30 = vsel %vm4426_vm5, %v4348_v34, %v1465_v2 }
  0xe6   : > { %3763 = vrcp.f32 %v4346_v33  ;;  %v1484_v23 = vsel %vm4452_vm8, %v4354_v38, %v1480_v27  ;;  %vm4469_vm10 = vcmp.eq.f32.partialorder %v1500_v18, 8.507059e+37  ;;  %v3430_v38 = vmul.f32 -1.442695, %v4392_v63  ;;  %v4503_v27 = vpop.f32.mrf.mxu0  ;;  %v4505_v18 = vpop.f32.mrf.mxu1 }
  0xe7   : > { %3765 = vrcp.f32 %v4352_v37 }
  0xe8   : > { %3767 = vpow2.f32 %v3426_v40  ;;  %v3717_v40 = vld [vmem:[%s4317_s11 + $0xf0] sm:$0xff] }
  0xe9   : > { %3769 = vpow2.f32 %v3427_v46  ;;  %2937 = vmatpush.bf16.msra.mxu3 %v3717_v40 }
  0xea   : > { %v3760_v47 = vpop.eup %3759  ;;  %3771 = vrcp.f32 %v4372_v49 }
  0xeb   : > { %v3762_v50 = vpop.eup %3761  ;;  %v4376_v53 = vadd.f32 1.0, %v3760_v47  ;;  %v4456_v47 = vor.u32 1.1754944e-38, %v1502_v20 }
  0xec   : > { %v4374_v51 = vpop.eup %3763  ;;  %v4385_v57 = vadd.f32 1.0, %v3762_v50  ;;  %v4460_v50 = vor.u32 1.1754944e-38, %v1517_v24  ;;  %v1530_v24 = vand.u32 2147483647, %v4372_v49 }
  0xed   : > { %v4380_v55 = vpop.eup %3765  ;;  %v1492_v56 = vmul.f32 %v4374_v51, %v4346_v33  ;;  %3773 = vrcp.f32 %v4376_v53  ;;  %vm1497_vm11 = vweird.f32 %v4374_v51  ;;  %vm1541_vm0 = vweird.f32 %v4376_v53 }
  0xee   : > { %v3768_v59 = vpop.eup %3767  ;;  %v1507_v3 = vmul.f32 %v4380_v55, %v4352_v37  ;;  %3775 = vrcp.f32 %v4385_v57  ;;  %vm1512_vm13 = vweird.f32 %v4380_v55  ;;  %vm4518_vm15 = vmor %vm1496_vm7, %vm1497_vm11  ;;  %v1545_v48 = vand.u32 2147483647, %v4376_v53 }
  0xef   : > { %v3770_v11 = vpop.eup %3769  ;;  %v1493_v5 = vsub.f32 1.0, %v1492_v56  ;;  %v4412_v15 = vadd.f32 1.0, %v3768_v59  ;;  %3777 = vpow2.f32 %v3428_v4  ;;  %v1532_v56 = vand.u32 2147483648, %v4372_v49  ;;  %vm4544_vm1 = vmor %vm1511_vm9, %vm1512_vm13 }
  0xf0   : > { %1032 = vmatmul.bf16.gmra.mxu0 %v4239_v31  ;;  %1081 = vmatmul.bf16.gmra.mxu1 %v4239_v31  ;;  %v4414_v16 = vpop.eup %3771  ;;  %v1508_v32 = vsub.f32 1.0, %v1507_v3  ;;  %v4436_v39 = vadd.f32 1.0, %v3770_v11  ;;  %v3429_v59 = vmul.f32 -1.442695, %v4390_v62  ;;  %v3431_v4 = vmul.f32 -1.442695, %v4403_v6 }
  0xf1   : > { %1130 = vmatmul.bf16.gmra.mxu2 %v4239_v31  ;;  %v1494_v44 = vmul.f32 %v4374_v51, %v1493_v5  ;;  %v1522_v46 = vmul.f32 %v4414_v16, %v4372_v49  ;;  %3779 = vrcp.f32 %v4412_v15  ;;  %v3693_v11 = vld [vmem:[%s4317_s11 + $0x30] sm:$0xff]  ;;  %vm1527_vm2 = vweird.f32 %v4414_v16 }
  0xf2   : > { %1179 = vmatmul.bf16.gmra.mxu3 %v4239_v31  ;;  %v1470_v31 = vand.u32 2147483647, %v4328_v21  ;;  %v3709_v21 = vld [vmem:[%s4317_s11 + $0xb0] sm:$0xff]  ;;  %v1509_v60 = vmul.f32 %v4380_v55, %v1508_v32  ;;  %3781 = vrcp.f32 %v4436_v39  ;;  %v1547_v32 = vand.u32 2147483648, %v4376_v53  ;;  %2790 = vmatpush.bf16.msra.mxu0 %v3693_v11  ;;  %vm4591_vm7 = vmor %vm1526_vm14, %vm1527_vm2 }
  0xf3   : > { %v4441_v42 = vpop.eup %3773  ;;  %2888 = vmatpush.bf16.msra.mxu2 %v3709_v21  ;;  %v1495_v2 = vadd.f32 %v4374_v51, %v1494_v44  ;;  %v1523_v3 = vsub.f32 1.0, %v1522_v46  ;;  %3783 = vpow2.f32 %v3429_v59  ;;  %vm4570_vm6 = vcmp.eq.f32.partialorder %v1545_v48, 8.507059e+37  ;;  %v4605_v48 = vpop.f32.mrf.mxu1 }
  0xf4   : > { %vm4407_vm3 = vcmp.eq.f32.partialorder %v1470_v31, 8.507059e+37  ;;  %v4462_v52 = vpop.eup %3775  ;;  %v1537_v61 = vmul.f32 %v4441_v42, %v4376_v53  ;;  %v1510_v19 = vadd.f32 %v4380_v55, %v1509_v60  ;;  %3785 = vpow2.f32 %v3430_v38 }
  0xf5   : > { %v1474_v54 = vsel %vm4407_vm3, %v1473_v17, %v1469_v30  ;;  %v3778_v5 = vpop.eup %3777  ;;  %v1499_v44 = vsel %vm4518_vm15, %v4374_v51, %v1495_v2  ;;  %v1524_v46 = vmul.f32 %v4414_v16, %v1523_v3  ;;  %3787 = vpow2.f32 %v3431_v4 }
  0xf6   : > { %v4493_v17 = vmul.f32 %v1474_v54, %v4306_v10  ;;  %v1489_v10 = vsel %vm4416_vm4, %v1488_v29, %v1484_v23  ;;  %v4523_v29 = vor.u32 1.1754944e-38, %v1532_v56  ;;  %v1538_v40 = vsub.f32 1.0, %v1537_v61 }
  0xf7   : > { %v4507_v30 = vpop.eup %3779  ;;  %v4529_v34 = vadd.f32 1.0, %v3778_v5  ;;  %3789 = vpow2.f32 %v3432_v26  ;;  %v4538_v56 = vmul.f32 %v1489_v10, %v4309_v12  ;;  %vm4549_vm3 = vcmp.eq.f32.partialorder %v1530_v24, 8.507059e+37  ;;  %v4576_v24 = vpop.f32.mrf.mxu2 }
  0xf8   : > { %6983 = vst [vmem:[#allocation5_spill] sm:$0xff] %v4493_v17  ;;  %v4531_v33 = vpop.eup %3781  ;;  %v1567_v23 = vmul.f32 %v4507_v30, %v4412_v15  ;;  %v4553_v60 = vor.u32 1.1754944e-38, %v1547_v32  ;;  %v3433_v61 = vmul.f32 -1.442695, %v4482_v0  ;;  %v1504_v12 = vsel %vm4469_vm10, %v4456_v47, %v1499_v44 }
  0xf9   : > { %6988 = vst [vmem:[#allocation6_spill] sm:$0xff] %v4538_v56  ;;  %v1514_v37 = vsel %vm4544_vm1, %v4380_v55, %v1510_v19  ;;  %v1539_v38 = vmul.f32 %v4441_v42, %v1538_v40  ;;  %v1560_v2 = vand.u32 2147483647, %v4385_v57  ;;  %v3784_v3 = vpop.eup %3783  ;;  %v1525_v4 = vadd.f32 %v4414_v16, %v1524_v46  ;;  %v4603_v46 = vpop.f32.mrf.mxu0 }
  0xfa   : > { %vm1556_vm4 = vweird.f32 %v4385_v57  ;;  %v1582_v11 = vmul.f32 %v4531_v33, %v4436_v39  ;;  %3791 = vrcp.f32 %v4529_v34  ;;  %v3786_v31 = vpop.eup %3785  ;;  %vm1542_vm5 = vweird.f32 %v4441_v42 }
  0xfb   : > { %v1568_v13 = vsub.f32 1.0, %v1567_v23  ;;  %v3434_v5 = vmul.f32 -1.442695, %v4484_v1  ;;  %v3788_v26 = vpop.eup %3787  ;;  %v4581_v10 = vmul.f32 %v1504_v12, %v4312_v35  ;;  %v1519_v32 = vsel %vm4495_vm12, %v4460_v50, %v1514_v37  ;;  %vm4627_vm10 = vmor %vm1541_vm0, %vm1542_vm5 }
  0xfc   : > { %v1562_v21 = vand.u32 2147483648, %v4385_v57  ;;  %3793 = vpow2.f32 %v3433_v61  ;;  %v1540_v44 = vadd.f32 %v4441_v42, %v1539_v38  ;;  %vm4596_vm8 = vcmp.eq.f32.partialorder %v1560_v2, 8.507059e+37 }
  0xfd   : > { %6995 = vst [vmem:[#allocation7_spill] sm:$0xff] %v4581_v10  ;;  %v3790_v19 = vpop.eup %3789  ;;  %v1575_v50 = vand.u32 2147483647, %v4412_v15  ;;  %v4601_v20 = vadd.f32 1.0, %v3784_v3  ;;  %v1529_v49 = vsel %vm4591_vm7, %v4414_v16, %v1525_v4  ;;  %vm1557_vm9 = vweird.f32 %v4462_v52 }
  0xfe   : > { %v4612_v23 = vadd.f32 1.0, %v3786_v31  ;;  %v1569_v61 = vmul.f32 %v4507_v30, %v1568_v13  ;;  %v4616_v12 = vadd.f32 1.0, %v3788_v26  ;;  %3795 = vpow2.f32 %v3434_v5  ;;  %vm4649_vm12 = vmor %vm1556_vm4, %vm1557_vm9 }
  0xff   : > { %v4621_v38 = vmul.f32 %v1519_v32, %v4320_v14  ;;  %v1563_v2 = vor.u32 1.1754944e-38, %v1562_v21  ;;  %vm1571_vm11 = vweird.f32 %v4412_v15  ;;  %v4632_v3 = vadd.f32 1.0, %v3790_v19  ;;  %v4679_v19 = vpop.f32.mrf.mxu2 }
 0x100   : > { %1037 = vmatmul.bf16.gmra.mxu0 %v4254_v45  ;;  %1086 = vmatmul.bf16.gmra.mxu1 %v4254_v45  ;;  %v4618_v37 = vpop.eup %3791  ;;  %v1534_v14 = vsel %vm4549_vm3, %v4523_v29, %v1529_v49  ;;  %v1544_v53 = vsel %vm4627_vm10, %v4441_v42, %v1540_v44  ;;  %v1577_v4 = vand.u32 2147483648, %v4412_v15  ;;  %3797 = vrcp.f32 %v4601_v20  ;;  %7008 = vst [vmem:[#allocation10_spill] sm:$0xff] %v4679_v19 }
 0x101   : > { %1135 = vmatmul.bf16.gmra.mxu2 %v4254_v45  ;;  %7000 = vst [vmem:[#allocation8_spill] sm:$0xff] %v4621_v38  ;;  %vm1572_vm13 = vweird.f32 %v4507_v30  ;;  %vm4654_vm14 = vcmp.eq.f32.partialorder %v1575_v50, 8.507059e+37  ;;  %3799 = vrcp.f32 %v4612_v23  ;;  %v1597_v59 = vmul.f32 %v4618_v37, %v4529_v34 }
 0x102   : > { %1184 = vmatmul.bf16.gmra.mxu3 %v4254_v45  ;;  %v1552_v45 = vmul.f32 %v4462_v52, %v4385_v57  ;;  %v1570_v57 = vadd.f32 %v4507_v30, %v1569_v61  ;;  %3801 = vrcp.f32 %v4616_v12  ;;  %v1590_v13 = vand.u32 2147483647, %v4436_v39  ;;  %vm4689_vm0 = vmor %vm1571_vm11, %vm1572_vm13  ;;  %v4707_v61 = vpop.f32.mrf.mxu1 }
 0x103   : > { %v1592_v5 = vand.u32 2147483648, %v4436_v39  ;;  %3803 = vrcp.f32 %v4632_v3  ;;  %v1578_v32 = vor.u32 1.1754944e-38, %v1577_v4  ;;  %vm1586_vm15 = vweird.f32 %v4436_v39 }
 0x104   : > { %v1553_v54 = vsub.f32 1.0, %v1552_v45  ;;  %v4578_v45 = vpop.f32.mrf.mxu3  ;;  %vm1587_vm1 = vweird.f32 %v4531_v33  ;;  %v3435_v44 = vmul.f32 -1.442695, %v4503_v27  ;;  %v1574_v35 = vsel %vm4689_vm0, %v4507_v30, %v1570_v57 }
 0x105   : > { %v1598_v15 = vsub.f32 1.0, %v1597_v59  ;;  %vm4711_vm2 = vcmp.eq.f32.partialorder %v1590_v13, 8.507059e+37  ;;  %vm4727_vm3 = vmor %vm1586_vm15, %vm1587_vm1  ;;  %vm1601_vm4 = vweird.f32 %v4529_v34  ;;  %v1605_v31 = vand.u32 2147483647, %v4529_v34 }
 0x106   : > { %v1554_v55 = vmul.f32 %v4462_v52, %v1553_v54  ;;  %v1583_v54 = vsub.f32 1.0, %v1582_v11  ;;  %v3794_v11 = vpop.eup %3793  ;;  %v1622_v59 = vand.u32 2147483648, %v4601_v20  ;;  %vm1616_vm7 = vweird.f32 %v4601_v20 }
 0x107   : > { %v3796_v26 = vpop.eup %3795  ;;  %v4677_v21 = vadd.f32 1.0, %v3794_v11  ;;  %v1599_v57 = vmul.f32 %v4618_v37, %v1598_v15  ;;  %vm4755_vm5 = vcmp.eq.f32.partialorder %v1605_v31, 8.507059e+37  ;;  %v4775_v11 = vpop.f32.mrf.mxu2  ;;  %vm1631_vm9 = vweird.f32 %v4612_v23 }
 0x108   : > { %v1555_v51 = vadd.f32 %v4462_v52, %v1554_v55  ;;  %v1584_v42 = vmul.f32 %v4531_v33, %v1583_v54  ;;  %v1549_v55 = vsel %vm4570_vm6, %v4553_v60, %v1544_v53  ;;  %v4696_v50 = vpop.eup %3797  ;;  %v3436_v54 = vmul.f32 -1.442695, %v4505_v18 }
 0x109   : > { %v4699_v49 = vmul.f32 %v1549_v55, %v4337_v25  ;;  %v4709_v16 = vpop.eup %3799  ;;  %v1607_v25 = vand.u32 2147483648, %v4529_v34  ;;  %v4716_v53 = vadd.f32 1.0, %v3796_v26  ;;  %3805 = vrcp.f32 %v4677_v21  ;;  %v3692_v26 = vld [vmem:[%s4317_s11 + $0x28] sm:$0xff] }
 0x10a   : > { %v4718_v4 = vpop.eup %3801  ;;  %v1612_v39 = vmul.f32 %v4696_v50, %v4601_v20  ;;  %3807 = vpow2.f32 %v3435_v44  ;;  %v1627_v55 = vmul.f32 %v4709_v16, %v4612_v23  ;;  %vm1602_vm6 = vweird.f32 %v4618_v37  ;;  %2791 = vmatpush.bf16.msra.mxu0 %v3692_v26 }
 0x10b   : > { %7011 = vst [vmem:[#allocation11_spill] sm:$0xff] %v4699_v49  ;;  %3809 = vpow2.f32 %v3436_v54  ;;  %v4747_v13 = vor.u32 1.1754944e-38, %v1607_v25  ;;  %v1642_v29 = vmul.f32 %v4718_v4, %v4616_v12  ;;  %v1600_v54 = vadd.f32 %v4618_v37, %v1599_v57  ;;  %v3708_v57 = vld [vmem:[%s4317_s11 + $0xa8] sm:$0xff]  ;;  %vm4804_vm10 = vmor %vm1601_vm4, %vm1602_vm6 }
 0x10c   : > { %v4681_v40 = vpop.f32.mrf.mxu3  ;;  %3811 = vrcp.f32 %v4716_v53  ;;  %v1613_v44 = vsub.f32 1.0, %v1612_v39  ;;  %v1635_v25 = vand.u32 2147483647, %v4612_v23  ;;  %v3439_v39 = vmul.f32 -1.442695, %v4603_v46  ;;  %2889 = vmatpush.bf16.msra.mxu2 %v3708_v57 }
 0x10d   : > { %vm1646_vm11 = vweird.f32 %v4616_v12  ;;  %v1665_v10 = vand.u32 2147483647, %v4632_v3  ;;  %vm1647_vm1 = vweird.f32 %v4718_v4 }
 0x10e   : > { %vm4839_vm15 = vcmp.eq.f32.partialorder %v1635_v25, 8.507059e+37  ;;  %v3700_v25 = vld [vmem:[%s4317_s11 + $0x68] sm:$0xff]  ;;  %vm4899_vm6 = vmor %vm1646_vm11, %vm1647_vm1 }
 0x10f   : > { %2840 = vmatpush.bf16.msra.mxu1 %v3700_v25 }
 0x110   : > { %1042 = vmatmul.bf16.gmra.mxu0 %v4269_v58  ;;  %1091 = vmatmul.bf16.gmra.mxu1 %v4269_v58 }
 0x111   : > { %1140 = vmatmul.bf16.gmra.mxu2 %v4269_v58 }
 0x112   : > { %1189 = vmatmul.bf16.gmra.mxu3 %v4269_v58  ;;  %v1559_v58 = vsel %vm4649_vm12, %v4462_v52, %v1555_v51  ;;  %v4674_v52 = vmul.f32 %v1534_v14, %v4331_v22  ;;  %v1585_v22 = vadd.f32 %v4531_v33, %v1584_v42  ;;  %v4705_v51 = vpop.f32.mrf.mxu0  ;;  %v1593_v14 = vor.u32 1.1754944e-38, %v1592_v5  ;;  %v4734_v42 = vpop.eup %3803 }
 0x113   : > { %v1564_v60 = vsel %vm4596_vm8, %v1563_v2, %v1559_v58  ;;  %v1657_v47 = vmul.f32 %v4734_v42, %v4632_v3  ;;  %v4769_v15 = vpop.eup %3805  ;;  %v4772_v2 = vor.u32 1.1754944e-38, %v1622_v59  ;;  %v3716_v59 = vld [vmem:[%s4317_s11 + $0xe8] sm:$0xff]  ;;  %vm1617_vm8 = vweird.f32 %v4696_v50 }
 0x114   : > { %7007 = vst [vmem:[#allocation9_spill] sm:$0xff] %v4674_v52  ;;  %v4721_v30 = vmul.f32 %v1564_v60, %v4341_v28  ;;  %v1579_v28 = vsel %vm4654_vm14, %v1578_v32, %v1574_v35  ;;  %v1589_v58 = vsel %vm4727_vm3, %v4531_v33, %v1585_v22  ;;  %v3437_v33 = vmul.f32 -1.442695, %v4576_v24  ;;  %v3808_v31 = vpop.eup %3807  ;;  %2938 = vmatpush.bf16.msra.mxu3 %v3716_v59  ;;  %vm4865_vm4 = vmor %vm1616_vm7, %vm1617_vm8 }
 0x115   : > { %v1594_v5 = vsel %vm4711_vm2, %v1593_v14, %v1589_v58  ;;  %v1620_v32 = vand.u32 2147483647, %v4601_v20  ;;  %v1637_v60 = vand.u32 2147483648, %v4612_v23  ;;  %v4765_v22 = vmul.f32 %v1579_v28, %v4350_v36  ;;  %v4777_v36 = vpop.f32.mrf.mxu3 }
 0x116   : > { %7014 = vst [vmem:[#allocation12_spill] sm:$0xff] %v4721_v30  ;;  %v3438_v35 = vmul.f32 -1.442695, %v4578_v45  ;;  %v1628_v14 = vsub.f32 1.0, %v1627_v55  ;;  %v4780_v28 = vmul.f32 %v1594_v5, %v4360_v41  ;;  %v1643_v58 = vsub.f32 1.0, %v1642_v29  ;;  %v3810_v55 = vpop.eup %3809 }
 0x117   : > { %7019 = vst [vmem:[#allocation13_spill] sm:$0xff] %v4765_v22  ;;  %3813 = vpow2.f32 %v3437_v33  ;;  %v4790_v38 = vor.u32 1.1754944e-38, %v1637_v60  ;;  %v1652_v41 = vand.u32 2147483648, %v4616_v12  ;;  %v1658_v5 = vsub.f32 1.0, %v1657_v47  ;;  %v4795_v33 = vpop.f32.mrf.mxu1 }
 0x118   : > { %7020 = vst [vmem:[#allocation14_spill] sm:$0xff] %v4777_v36  ;;  %v1614_v60 = vmul.f32 %v4696_v50, %v1613_v44  ;;  %v1650_v47 = vand.u32 2147483647, %v4616_v12  ;;  %v1629_v34 = vmul.f32 %v4709_v16, %v1628_v14  ;;  %vm1661_vm12 = vweird.f32 %v4632_v3 }
 0x119   : > { %7021 = vst [vmem:[#allocation15_spill] sm:$0xff] %v4780_v28  ;;  %v4798_v28 = vpop.eup %3811  ;;  %v4817_v30 = vadd.f32 1.0, %v3808_v31  ;;  %3815 = vpow2.f32 %v3438_v35  ;;  %v1644_v44 = vmul.f32 %v4718_v4, %v1643_v58  ;;  %v1672_v56 = vmul.f32 %v4769_v15, %v4677_v21 }
 0x11a   : > { %v4793_v29 = vpop.f32.mrf.mxu0  ;;  %v4822_v49 = vadd.f32 1.0, %v3810_v55  ;;  %3817 = vpow2.f32 %v3439_v39  ;;  %vm4824_vm13 = vcmp.eq.f32.partialorder %v1620_v32, 8.507059e+37  ;;  %v1659_v22 = vmul.f32 %v4734_v42, %v1658_v5 }
 0x11b   : > { %7022 = vst [vmem:[#allocation16_spill] sm:$0xff] %v4793_v29  ;;  %v1687_v35 = vmul.f32 %v4798_v28, %v4716_v53  ;;  %v1615_v32 = vadd.f32 %v4696_v50, %v1614_v60  ;;  %vm1632_vm14 = vweird.f32 %v4709_v16  ;;  %vm4843_vm0 = vcmp.eq.f32.partialorder %v1650_v47, 8.507059e+37 }
 0x11c   : > { %v1667_v59 = vand.u32 2147483648, %v4632_v3  ;;  %v1630_v55 = vadd.f32 %v4709_v16, %v1629_v34  ;;  %vm1662_vm2 = vweird.f32 %v4734_v42  ;;  %vm4851_vm3 = vcmp.eq.f32.partialorder %v1665_v10, 8.507059e+37 }
 0x11d   : > { %v3814_v14 = vpop.eup %3813  ;;  %3819 = vrcp.f32 %v4817_v30  ;;  %v1673_v5 = vsub.f32 1.0, %v1672_v56  ;;  %v3441_v60 = vmul.f32 -1.442695, %v4679_v19  ;;  %v1688_v34 = vsub.f32 1.0, %v1687_v35  ;;  %v4872_v56 = vpop.f32.mrf.mxu2  ;;  %vm4916_vm8 = vmor %vm1661_vm12, %vm1662_vm2 }
 0x11e   : > { %3821 = vrcp.f32 %v4822_v49  ;;  %v4870_v17 = vadd.f32 1.0, %v3814_v14  ;;  %v1680_v35 = vand.u32 2147483647, %v4677_v21  ;;  %v1619_v14 = vsel %vm4865_vm4, %v4696_v50, %v1615_v32 }
 0x11f   : > { %v3816_v47 = vpop.eup %3815  ;;  %vm1676_vm7 = vweird.f32 %v4677_v21  ;;  %v4907_v26 = vpop.f32.mrf.mxu1  ;;  %vm1692_vm11 = vweird.f32 %v4798_v28  ;;  %vm1691_vm12 = vweird.f32 %v4716_v53  ;;  %vm1721_vm1 = vweird.f32 %v4822_v49 }
 0x120   : > { %1047 = vmatmul.bf16.gmra.mxu0 %v4284_v8  ;;  %1096 = vmatmul.bf16.gmra.mxu1 %v4284_v8  ;;  %v3818_v52 = vpop.eup %3817  ;;  %v4921_v32 = vadd.f32 1.0, %v3816_v47 }
 0x121   : > { %1145 = vmatmul.bf16.gmra.mxu2 %v4284_v8  ;;  %v4930_v3 = vadd.f32 1.0, %v3818_v52 }
 0x122   : > { %1194 = vmatmul.bf16.gmra.mxu3 %v4284_v8  ;;  %v1604_v8 = vsel %vm4804_vm10, %v4618_v37, %v1600_v54  ;;  %v4828_v37 = vor.u32 1.1754944e-38, %v1652_v41  ;;  %v3440_v54 = vmul.f32 -1.442695, %v4605_v48  ;;  %v1645_v41 = vadd.f32 %v4718_v4, %v1644_v44  ;;  %v4874_v44 = vpop.f32.mrf.mxu3 }
 0x123   : > { %v1609_v31 = vsel %vm4755_vm5, %v4747_v13, %v1604_v8  ;;  %v1660_v8 = vadd.f32 %v4734_v42, %v1659_v22  ;;  %vm4883_vm5 = vmor %vm1631_vm9, %vm1632_vm14  ;;  %v1668_v22 = vor.u32 1.1754944e-38, %v1667_v59  ;;  %v4905_v59 = vpop.f32.mrf.mxu0  ;;  %vm4938_vm9 = vcmp.eq.f32.partialorder %v1680_v35, 8.507059e+37 }
 0x124   : > { %3823 = vpow2.f32 %v3440_v54  ;;  %v4877_v19 = vmul.f32 %v1609_v31, %v4363_v43  ;;  %v3442_v54 = vmul.f32 -1.442695, %v4681_v40  ;;  %v1634_v43 = vsel %vm4883_vm5, %v4709_v16, %v1630_v55  ;;  %v4923_v55 = vpop.eup %3819 }
 0x125   : > { %v1682_v31 = vand.u32 2147483648, %v4677_v21  ;;  %v1649_v50 = vsel %vm4899_vm6, %v4718_v4, %v1645_v41  ;;  %v1674_v16 = vmul.f32 %v4769_v15, %v1673_v5  ;;  %3825 = vpow2.f32 %v3441_v60  ;;  %v4933_v41 = vpop.eup %3821 }
 0x126   : > { %7035 = vst [vmem:[#allocation17_spill] sm:$0xff] %v4877_v19  ;;  %v1664_v25 = vsel %vm4916_vm8, %v4734_v42, %v1660_v8  ;;  %v1689_v4 = vmul.f32 %v4798_v28, %v1688_v34  ;;  %3827 = vrcp.f32 %v4870_v17  ;;  %v1624_v5 = vsel %vm4824_vm13, %v4772_v2, %v1619_v14  ;;  %v4989_v14 = vpop.f32.mrf.mxu2 }
 0x127   : > { %v1695_v42 = vand.u32 2147483647, %v4716_v53  ;;  %3829 = vpow2.f32 %v3442_v54  ;;  %v1639_v52 = vsel %vm4839_vm15, %v4790_v38, %v1634_v43  ;;  %v1654_v10 = vsel %vm4843_vm0, %v4828_v37, %v1649_v50  ;;  %vm5004_vm15 = vmor %vm1691_vm12, %vm1692_vm11 }
 0x128   : > { %vm1677_vm10 = vweird.f32 %v4769_v15  ;;  %v1697_v2 = vand.u32 2147483648, %v4716_v53  ;;  %v1669_v57 = vsel %vm4851_vm3, %v1668_v22, %v1664_v25  ;;  %v1675_v8 = vadd.f32 %v4769_v15, %v1674_v16 }
 0x129   : > { %v1702_v34 = vmul.f32 %v4923_v55, %v4817_v30  ;;  %3831 = vrcp.f32 %v4921_v32  ;;  %v1690_v38 = vadd.f32 %v4798_v28, %v1689_v4  ;;  %v1717_v37 = vmul.f32 %v4933_v41, %v4822_v49  ;;  %vm4980_vm13 = vmor %vm1676_vm7, %vm1677_vm10  ;;  %v5016_v4 = vpop.f32.mrf.mxu1 }
 0x12a   : > { %v3824_v47 = vpop.eup %3823  ;;  %3833 = vrcp.f32 %v4930_v3  ;;  %v4966_v39 = vmul.f32 %v1624_v5, %v4390_v62  ;;  %v1683_v13 = vor.u32 1.1754944e-38, %v1682_v31  ;;  %v4974_v35 = vmul.f32 %v1639_v52, %v4392_v63  ;;  %v4991_v43 = vpop.f32.mrf.mxu3  ;;  %7056 = vst [vmem:[#allocation24_spill] sm:$0xff] %v5016_v4 }
 0x12b   : > { %v3826_v58 = vpop.eup %3825  ;;  %v4969_v20 = vadd.f32 1.0, %v3824_v47  ;;  %vm4984_vm14 = vcmp.eq.f32.partialorder %v1695_v42, 8.507059e+37  ;;  %v1698_v53 = vor.u32 1.1754944e-38, %v1697_v2  ;;  %v1712_v54 = vand.u32 2147483648, %v4817_v30  ;;  %7050 = vst [vmem:[#allocation20_spill] sm:$0xff] %v4991_v43  ;;  %v5014_v25 = vpop.f32.mrf.mxu0 }
 0x12c   : > { %7044 = vst [vmem:[#allocation18_spill] sm:$0xff] %v4966_v39  ;;  %v4971_v22 = vpop.eup %3827  ;;  %v4994_v23 = vmul.f32 %v1654_v10, %v4403_v6  ;;  %v4997_v21 = vmul.f32 %v1669_v57, %v4405_v7  ;;  %v1679_v31 = vsel %vm4980_vm13, %v4769_v15, %v1675_v8  ;;  %v1703_v12 = vsub.f32 1.0, %v1702_v34 }
 0x12d   : > { %7045 = vst [vmem:[#allocation19_spill] sm:$0xff] %v4974_v35  ;;  %v3830_v63 = vpop.eup %3829  ;;  %v1694_v16 = vsel %vm5004_vm15, %v4798_v28, %v1690_v38  ;;  %vm1706_vm0 = vweird.f32 %v4817_v30  ;;  %v1718_v6 = vsub.f32 1.0, %v1717_v37  ;;  %v5012_v7 = vadd.f32 1.0, %v3826_v58 }
 0x12e   : > { %7051 = vst [vmem:[#allocation21_spill] sm:$0xff] %v4994_v23  ;;  %v1710_v5 = vand.u32 2147483647, %v4817_v30  ;;  %v1732_v42 = vmul.f32 %v4971_v22, %v4870_v17  ;;  %3835 = vrcp.f32 %v4969_v20  ;;  %v1684_v47 = vsel %vm4938_vm9, %v1683_v13, %v1679_v31 }
 0x12f   : > { %7052 = vst [vmem:[#allocation22_spill] sm:$0xff] %v4997_v21  ;;  %v5018_v15 = vpop.eup %3831  ;;  %v5029_v52 = vor.u32 1.1754944e-38, %v1712_v54  ;;  %v1727_v10 = vand.u32 2147483648, %v4822_v49  ;;  %v5032_v2 = vadd.f32 1.0, %v3830_v63  ;;  %v1699_v57 = vsel %vm4984_vm14, %v1698_v53, %v1694_v16 }
 0x130   : > { %1052 = vmatmul.bf16.gmra.mxu0 %v4291_v9  ;;  %1101 = vmatmul.bf16.gmra.mxu1 %v4291_v9  ;;  %7055 = vst [vmem:[#allocation23_spill] sm:$0xff] %v5014_v25  ;;  %v5025_v28 = vpop.eup %3833  ;;  %v1704_v8 = vmul.f32 %v4923_v55, %v1703_v12  ;;  %v1725_v34 = vand.u32 2147483647, %v4822_v49  ;;  %v3443_v38 = vmul.f32 -1.442695, %v4705_v51  ;;  %v1719_v37 = vmul.f32 %v4933_v41, %v1718_v6 }
 0x131   : > { %1150 = vmatmul.bf16.gmra.mxu2 %v4291_v9  ;;  %v1747_v60 = vmul.f32 %v5018_v15, %v4921_v32  ;;  %3837 = vrcp.f32 %v5012_v7  ;;  %v3444_v58 = vmul.f32 -1.442695, %v4707_v61  ;;  %v5045_v13 = vmul.f32 %v1684_v47, %v4482_v0  ;;  %v5073_v47 = vpop.f32.mrf.mxu2 }
 0x132   : > { %1199 = vmatmul.bf16.gmra.mxu3 %v4291_v9  ;;  %v1733_v9 = vsub.f32 1.0, %v1732_v42  ;;  %v1762_v62 = vmul.f32 %v5025_v28, %v4930_v3  ;;  %v3445_v53 = vmul.f32 -1.442695, %v4775_v11  ;;  %vm5050_vm2 = vcmp.eq.f32.partialorder %v1710_v5, 8.507059e+37  ;;  %7063 = vst [vmem:[#allocation27_spill] sm:$0xff] %v5073_v47 }
 0x133   : > { %7057 = vst [vmem:[#allocation25_spill] sm:$0xff] %v5045_v13  ;;  %v5054_v63 = vor.u32 1.1754944e-38, %v1727_v10  ;;  %v1740_v31 = vand.u32 2147483647, %v4870_v17  ;;  %v1742_v50 = vand.u32 2147483648, %v4870_v17  ;;  %3839 = vrcp.f32 %v5032_v2 }
 0x134   : > { %v5059_v0 = vpop.eup %3835  ;;  %v5062_v12 = vmul.f32 %v1699_v57, %v4484_v1  ;;  %vm1707_vm3 = vweird.f32 %v4923_v55  ;;  %vm1722_vm4 = vweird.f32 %v4933_v41  ;;  %vm5066_vm5 = vcmp.eq.f32.partialorder %v1725_v34, 8.507059e+37  ;;  %v5075_v1 = vpop.f32.mrf.mxu3 }
 0x135   : > { %vm1736_vm6 = vweird.f32 %v4870_v17  ;;  %3841 = vpow2.f32 %v3443_v38  ;;  %v1705_v6 = vadd.f32 %v4923_v55, %v1704_v8  ;;  %v1720_v5 = vadd.f32 %v4933_v41, %v1719_v37  ;;  %7064 = vst [vmem:[#allocation28_spill] sm:$0xff] %v5075_v1  ;;  %vm5085_vm7 = vmor %vm1706_vm0, %vm1707_vm3  ;;  %v3707_v8 = vld [vmem:[%s4317_s11 + $0xa0] sm:$0xff] }
 0x136   : > { %7060 = vst [vmem:[#allocation26_spill] sm:$0xff] %v5062_v12  ;;  %v1748_v42 = vsub.f32 1.0, %v1747_v60  ;;  %3843 = vpow2.f32 %v3444_v58  ;;  %v1734_v10 = vmul.f32 %v4971_v22, %v1733_v9  ;;  %v1763_v57 = vsub.f32 1.0, %v1762_v62  ;;  %v5095_v9 = vpop.f32.mrf.mxu0  ;;  %v5097_v62 = vpop.f32.mrf.mxu1  ;;  %vm5103_vm9 = vmor %vm1721_vm1, %vm1722_vm4  ;;  %2890 = vmatpush.bf16.msra.mxu2 %v3707_v8 }
 0x137   : > { %3845 = vpow2.f32 %v3445_v53  ;;  %v3446_v34 = vmul.f32 -1.442695, %v4777_v36  ;;  %v5079_v12 = vpop.eup %3837  ;;  %vm1751_vm8 = vweird.f32 %v4921_v32  ;;  %v1755_v38 = vand.u32 2147483647, %v4921_v32  ;;  %7067 = vst [vmem:[#allocation29_spill] sm:$0xff] %v5097_v62  ;;  %v3699_v36 = vld [vmem:[%s4317_s11 + $0x60] sm:$0xff] }
 0x138   : > { %v1757_v37 = vand.u32 2147483648, %v4921_v32  ;;  %v1777_v60 = vmul.f32 %v5059_v0, %v4969_v20  ;;  %v3447_v58 = vmul.f32 -1.442695, %v4793_v29  ;;  %vm5107_vm10 = vcmp.eq.f32.partialorder %v1740_v31, 8.507059e+37  ;;  %2841 = vmatpush.bf16.msra.mxu1 %v3699_v36 }
 0x139   : > { %v1743_v35 = vor.u32 1.1754944e-38, %v1742_v50  ;;  %vm1766_vm11 = vweird.f32 %v4930_v3  ;;  %v1770_v13 = vand.u32 2147483647, %v4930_v3  ;;  %v1772_v21 = vand.u32 2147483648, %v4930_v3  ;;  %v5114_v39 = vpop.eup %3839 }
 0x13a   : > { %v1709_v49 = vsel %vm5085_vm7, %v4923_v55, %v1705_v6  ;;  %v1724_v31 = vsel %vm5103_vm9, %v4933_v41, %v1720_v5  ;;  %vm1737_vm12 = vweird.f32 %v4971_v22  ;;  %v1749_v50 = vmul.f32 %v5018_v15, %v1748_v42  ;;  %v3715_v55 = vld [vmem:[%s4317_s11 + $0xe0] sm:$0xff] }
 0x13b   : > { %v3842_v19 = vpop.eup %3841  ;;  %v1735_v23 = vadd.f32 %v4971_v22, %v1734_v10  ;;  %v1764_v62 = vmul.f32 %v5025_v28, %v1763_v57  ;;  %v1792_v1 = vmul.f32 %v5079_v12, %v5012_v7  ;;  %3847 = vpow2.f32 %v3446_v34  ;;  %2939 = vmatpush.bf16.msra.mxu3 %v3715_v55  ;;  %vm5149_vm15 = vmor %vm1736_vm6, %vm1737_vm12 }
 0x13c   : > { %v3844_v6 = vpop.eup %3843  ;;  %vm5130_vm13 = vcmp.eq.f32.partialorder %v1755_v38, 8.507059e+37  ;;  %v1758_v5 = vor.u32 1.1754944e-38, %v1757_v37  ;;  %v1778_v42 = vsub.f32 1.0, %v1777_v60  ;;  %3849 = vpow2.f32 %v3447_v58  ;;  %v3691_v38 = vld [vmem:[%s4317_s11 + $0x20] sm:$0xff] }
 0x13d   : > { %v3448_v10 = vmul.f32 -1.442695, %v4795_v33  ;;  %v3846_v30 = vpop.eup %3845  ;;  %v1714_v57 = vsel %vm5050_vm2, %v5029_v52, %v1709_v49  ;;  %vm1752_vm14 = vweird.f32 %v5018_v15  ;;  %v1773_v34 = vor.u32 1.1754944e-38, %v1772_v21  ;;  %2792 = vmatpush.bf16.msra.mxu0 %v3691_v38 }
 0x13e   : > { %v3449_v29 = vmul.f32 -1.442695, %v4872_v56  ;;  %v1729_v37 = vsel %vm5066_vm5, %v5054_v63, %v1724_v31  ;;  %v1750_v21 = vadd.f32 %v5018_v15, %v1749_v50  ;;  %vm1767_vm0 = vweird.f32 %v5025_v28  ;;  %v5175_v50 = vpop.f32.mrf.mxu3  ;;  %vm5184_vm3 = vmor %vm1751_vm8, %vm1752_vm14 }
 0x13f   : > { %vm5155_vm1 = vcmp.eq.f32.partialorder %v1770_v13, 8.507059e+37  ;;  %vm1781_vm2 = vweird.f32 %v4969_v20  ;;  %v5160_v16 = vadd.f32 1.0, %v3842_v19  ;;  %v1739_v17 = vsel %vm5149_vm15, %v4971_v22, %v1735_v23  ;;  %v5173_v19 = vpop.f32.mrf.mxu2  ;;  %7079 = vst [vmem:[#allocation31_spill] sm:$0xff] %v5175_v50  ;;  %vm5202_vm4 = vmor %vm1766_vm11, %vm1767_vm0 }
 0x140   : > { %v1765_v63 = vadd.f32 %v5025_v28, %v1764_v62  ;;  %v1793_v60 = vsub.f32 1.0, %v1792_v1  ;;  %v5166_v58 = vadd.f32 1.0, %v3844_v6  ;;  %v1779_v13 = vmul.f32 %v5059_v0, %v1778_v42  ;;  %7078 = vst [vmem:[#allocation30_spill] sm:$0xff] %v5173_v19 }
 0x141   : > { %v1807_v49 = vmul.f32 %v5114_v39, %v5032_v2  ;;  %v5171_v31 = vadd.f32 1.0, %v3846_v30  ;;  %3851 = vpow2.f32 %v3448_v10  ;;  %v3848_v22 = vpop.eup %3847  ;;  %v5178_v23 = vmul.f32 %v1714_v57, %v4503_v27 }
 0x142   : > { %v1785_v1 = vand.u32 2147483647, %v4969_v20  ;;  %v1787_v62 = vand.u32 2147483648, %v4969_v20  ;;  %3853 = vpow2.f32 %v3449_v29  ;;  %v3850_v8 = vpop.eup %3849  ;;  %v5191_v55 = vmul.f32 %v1729_v37, %v4505_v18  ;;  %v5207_v29 = vpop.f32.mrf.mxu0 }
 0x143   : > { %7080 = vst [vmem:[#allocation32_spill] sm:$0xff] %v5178_v23  ;;  %v1744_v27 = vsel %vm5107_vm10, %v1743_v35, %v1739_v17  ;;  %v1754_v32 = vsel %vm5184_vm3, %v5018_v15, %v1750_v21  ;;  %3855 = vrcp.f32 %v5160_v16  ;;  %v5209_v18 = vpop.f32.mrf.mxu1  ;;  %v1769_v35 = vsel %vm5202_vm4, %v5025_v28, %v1765_v63  ;;  %v3698_v23 = vld [vmem:[%s4317_s11 + $0x58] sm:$0xff] }
 0x144   : > { %7083 = vst [vmem:[#allocation33_spill] sm:$0xff] %v5191_v55  ;;  %vm1782_vm5 = vweird.f32 %v5059_v0  ;;  %v1794_v15 = vmul.f32 %v5079_v12, %v1793_v60  ;;  %3857 = vrcp.f32 %v5166_v58  ;;  %v1780_v3 = vadd.f32 %v5059_v0, %v1779_v13  ;;  %v3690_v55 = vld [vmem:[%s4317_s11 + $0x18] sm:$0xff]  ;;  %2842 = vmatpush.bf16.msra.mxu1 %v3698_v23 }
 0x145   : > { %7086 = vst [vmem:[#allocation34_spill] sm:$0xff] %v5207_v29  ;;  %v1808_v53 = vsub.f32 1.0, %v1807_v49  ;;  %3859 = vrcp.f32 %v5171_v31  ;;  %v5219_v42 = vadd.f32 1.0, %v3848_v22  ;;  %v1759_v10 = vsel %vm5130_vm13, %v1758_v5, %v1754_v32  ;;  %vm5241_vm7 = vmor %vm1781_vm2, %vm1782_vm5  ;;  %2793 = vmatpush.bf16.msra.mxu0 %v3690_v55 }
 0x146   : > { %7087 = vst [vmem:[#allocation35_spill] sm:$0xff] %v5209_v18  ;;  %vm5223_vm6 = vcmp.eq.f32.partialorder %v1785_v1, 8.507059e+37  ;;  %v1788_v28 = vor.u32 1.1754944e-38, %v1787_v62  ;;  %v5227_v57 = vadd.f32 1.0, %v3850_v8  ;;  %v5230_v37 = vmul.f32 %v1744_v27, %v4576_v24  ;;  %v5284_v27 = vpop.f32.mrf.mxu3 }
 0x147   : > { %v3852_v38 = vpop.eup %3851  ;;  %v1800_v54 = vand.u32 2147483647, %v5012_v7  ;;  %v1802_v21 = vand.u32 2147483648, %v5012_v7  ;;  %v1815_v17 = vand.u32 2147483647, %v5032_v2  ;;  %v1774_v41 = vsel %vm5155_vm1, %v1773_v34, %v1769_v35  ;;  %v5282_v8 = vpop.f32.mrf.mxu2  ;;  %7102 = vst [vmem:[#allocation40_spill] sm:$0xff] %v5284_v27 }
 0x148   : > { %7090 = vst [vmem:[#allocation36_spill] sm:$0xff] %v5230_v37  ;;  %v3854_v63 = vpop.eup %3853  ;;  %v1795_v24 = vadd.f32 %v5079_v12, %v1794_v15  ;;  %vm1797_vm8 = vweird.f32 %v5079_v12  ;;  %v1817_v60 = vand.u32 2147483648, %v5032_v2  ;;  %v5251_v49 = vmul.f32 %v1759_v10, %v4578_v45 }
 0x149   : > { %v5248_v13 = vpop.eup %3855  ;;  %v1784_v34 = vsel %vm5241_vm7, %v5059_v0, %v1780_v3  ;;  %v1809_v20 = vmul.f32 %v5114_v39, %v1808_v53  ;;  %3861 = vrcp.f32 %v5219_v42  ;;  %vm1796_vm9 = vweird.f32 %v5012_v7  ;;  %7101 = vst [vmem:[#allocation39_spill] sm:$0xff] %v5282_v8 }
 0x14a   : > { %7093 = vst [vmem:[#allocation37_spill] sm:$0xff] %v5251_v49  ;;  %v5258_v52 = vpop.eup %3857  ;;  %vm1811_vm10 = vweird.f32 %v5032_v2  ;;  %3863 = vrcp.f32 %v5227_v57  ;;  %v5263_v22 = vadd.f32 1.0, %v3852_v38  ;;  %v5268_v36 = vmul.f32 %v1774_v41, %v4603_v46  ;;  %vm5270_vm11 = vmor %vm1796_vm9, %vm1797_vm8  ;;  %v5299_v10 = vpop.f32.mrf.mxu0  ;;  %v7108_v49 = vld [vmem:[#allocation10_spill] sm:$0xff] }
 0x14b   : > { %v5265_v45 = vpop.eup %3859  ;;  %vm5274_vm12 = vcmp.eq.f32.partialorder %v1800_v54, 8.507059e+37  ;;  %v1803_v7 = vor.u32 1.1754944e-38, %v1802_v21  ;;  %vm5278_vm13 = vcmp.eq.f32.partialorder %v1815_v17, 8.507059e+37  ;;  %v1789_v46 = vsel %vm5223_vm6, %v1788_v28, %v1784_v34  ;;  %7103 = vst [vmem:[#allocation41_spill] sm:$0xff] %v5299_v10  ;;  %v5301_v30 = vpop.f32.mrf.mxu1 }
 0x14c   : > { %7094 = vst [vmem:[#allocation38_spill] sm:$0xff] %v5268_v36  ;;  %v1799_v32 = vsel %vm5270_vm11, %v5079_v12, %v1795_v24  ;;  %vm1812_vm14 = vweird.f32 %v5114_v39  ;;  %v1818_v6 = vor.u32 1.1754944e-38, %v1817_v60  ;;  %v1810_v35 = vadd.f32 %v5114_v39, %v1809_v20 }
 0x14d   : > { %v1822_v15 = vmul.f32 %v5248_v13, %v5160_v16  ;;  %v1837_v3 = vmul.f32 %v5258_v52, %v5166_v58  ;;  %v5297_v53 = vadd.f32 1.0, %v3854_v63  ;;  %7104 = vst [vmem:[#allocation42_spill] sm:$0xff] %v5301_v30  ;;  %v1852_v12 = vmul.f32 %v5265_v45, %v5171_v31  ;;  %vm5324_vm15 = vmor %vm1811_vm10, %vm1812_vm14 }
 0x14e   : > { %3865 = vrcp.f32 %v5263_v22  ;;  %v3450_v28 = vmul.f32 -1.442695, %v4874_v44  ;;  %v3451_v38 = vmul.f32 -1.442695, %v4905_v59  ;;  %v5311_v21 = vmul.f32 %v1789_v46, %v4605_v48 }
 0x14f   : > { %v5308_v54 = vpop.eup %3861  ;;  %v1832_v17 = vand.u32 2147483648, %v5160_v16  ;;  %v3452_v63 = vmul.f32 -1.442695, %v4907_v26  ;;  %v3453_v41 = vmul.f32 -1.442695, %v4989_v14  ;;  %v1804_v24 = vsel %vm5274_vm12, %v1803_v7, %v1799_v32 }
 0x150   : > { %7105 = vst [vmem:[#allocation43_spill] sm:$0xff] %v5311_v21  ;;  %v5316_v5 = vpop.eup %3863  ;;  %vm1826_vm0 = vweird.f32 %v5160_v16  ;;  %v1830_v48 = vand.u32 2147483647, %v5160_v16  ;;  %v1845_v34 = vand.u32 2147483647, %v5166_v58  ;;  %v1847_v20 = vand.u32 2147483648, %v5166_v58  ;;  %v5361_v21 = vpop.f32.mrf.mxu3 }
 0x151   : > { %v1814_v0 = vsel %vm5324_vm15, %v5114_v39, %v1810_v35  ;;  %v1823_v1 = vsub.f32 1.0, %v1822_v15  ;;  %v1838_v7 = vsub.f32 1.0, %v1837_v3  ;;  %vm1841_vm1 = vweird.f32 %v5166_v58  ;;  %7111 = vst [vmem:[#allocation45_spill] sm:$0xff] %v5361_v21 }
 0x152   : > { %3867 = vrcp.f32 %v5297_v53  ;;  %v1853_v2 = vsub.f32 1.0, %v1852_v12  ;;  %v1867_v46 = vmul.f32 %v5308_v54, %v5219_v42  ;;  %v3454_v32 = vmul.f32 -1.442695, %v4991_v43 }
 0x153   : > { %3869 = vpow2.f32 %v3450_v28  ;;  %v5341_v37 = vmul.f32 %v1804_v24, %v7108_v49  ;;  %v5343_v60 = vor.u32 1.1754944e-38, %v1832_v17  ;;  %v1882_v39 = vmul.f32 %v5316_v5, %v5227_v57  ;;  %v3706_v24 = vld [vmem:[%s4317_s11 + $0x98] sm:$0xff] }
 0x154   : > { %3871 = vpow2.f32 %v3451_v38  ;;  %v5347_v35 = vpop.eup %3865  ;;  %v1819_v15 = vsel %vm5278_vm13, %v1818_v6, %v1814_v0  ;;  %v5351_v3 = vor.u32 1.1754944e-38, %v1847_v20  ;;  %v1860_v12 = vand.u32 2147483647, %v5171_v31  ;;  %v5359_v38 = vpop.f32.mrf.mxu2  ;;  %2891 = vmatpush.bf16.msra.mxu2 %v3706_v24 }
 0x155   : > { %7109 = vst [vmem:[#allocation10_spill] sm:$0xff] %v5341_v37  ;;  %3873 = vpow2.f32 %v3452_v63  ;;  %v1824_v28 = vmul.f32 %v5248_v13, %v1823_v1  ;;  %v1839_v49 = vmul.f32 %v5258_v52, %v1838_v7  ;;  %v1862_v17 = vand.u32 2147483648, %v5171_v31  ;;  %v3714_v37 = vld [vmem:[%s4317_s11 + $0xd8] sm:$0xff]  ;;  %v5373_v1 = vpop.f32.mrf.mxu0  ;;  %v5375_v7 = vpop.f32.mrf.mxu1 }
 0x156   : > { %3875 = vpow2.f32 %v3453_v41  ;;  %7110 = vst [vmem:[#allocation44_spill] sm:$0xff] %v5359_v38  ;;  %v1854_v62 = vmul.f32 %v5265_v45, %v1853_v2  ;;  %vm1856_vm2 = vweird.f32 %v5171_v31  ;;  %v1868_v6 = vsub.f32 1.0, %v1867_v46  ;;  %2940 = vmatpush.bf16.msra.mxu3 %v3714_v37 }
 0x157   : > { %3877 = vpow2.f32 %v3454_v32  ;;  %v5368_v20 = vmul.f32 %v1819_v15, %v4681_v40  ;;  %vm1827_vm3 = vweird.f32 %v5248_v13  ;;  %v1883_v41 = vsub.f32 1.0, %v1882_v39  ;;  %7113 = vst [vmem:[#allocation47_spill] sm:$0xff] %v5373_v1 }
 0x158   : > { %v5365_v63 = vpop.eup %3867  ;;  %v1897_v0 = vmul.f32 %v5347_v35, %v5263_v22  ;;  %7114 = vst [vmem:[#allocation48_spill] sm:$0xff] %v5375_v7  ;;  %vm5377_vm4 = vcmp.eq.f32.partialorder %v1830_v48, 8.507059e+37  ;;  %vm1842_vm5 = vweird.f32 %v5258_v52  ;;  %vm5382_vm6 = vcmp.eq.f32.partialorder %v1845_v34, 8.507059e+37  ;;  %vm5406_vm10 = vmor %vm1826_vm0, %vm1827_vm3 }
 0x159   : > { %7112 = vst [vmem:[#allocation46_spill] sm:$0xff] %v5368_v20  ;;  %v3870_v2 = vpop.eup %3869  ;;  %v1875_v32 = vand.u32 2147483647, %v5219_v42  ;;  %v1877_v37 = vand.u32 2147483648, %v5219_v42  ;;  %v1892_v39 = vand.u32 2147483648, %v5227_v57  ;;  %v1825_v24 = vadd.f32 %v5248_v13, %v1824_v28  ;;  %vm5418_vm12 = vmor %vm1841_vm1, %vm1842_vm5 }
 0x15a   : > { %v3872_v15 = vpop.eup %3871  ;;  %v1840_v48 = vadd.f32 %v5258_v52, %v1839_v49  ;;  %vm5391_vm7 = vcmp.eq.f32.partialorder %v1860_v12, 8.507059e+37  ;;  %v1863_v36 = vor.u32 1.1754944e-38, %v1862_v17  ;;  %v1890_v34 = vand.u32 2147483647, %v5227_v57 }
 0x15b   : > { %v3874_v7 = vpop.eup %3873  ;;  %v1855_v1 = vadd.f32 %v5265_v45, %v1854_v62  ;;  %vm1857_vm8 = vweird.f32 %v5265_v45  ;;  %v1869_v21 = vmul.f32 %v5308_v54, %v1868_v6  ;;  %vm1871_vm9 = vweird.f32 %v5219_v42 }
 0x15c   : > { %v3876_v28 = vpop.eup %3875  ;;  %v1884_v49 = vmul.f32 %v5316_v5, %v1883_v41  ;;  %vm1886_vm11 = vweird.f32 %v5227_v57  ;;  %v1898_v17 = vsub.f32 1.0, %v1897_v0  ;;  %v5412_v62 = vadd.f32 1.0, %v3870_v2  ;;  %vm5440_vm14 = vmor %vm1856_vm2, %vm1857_vm8 }
 0x15d   : > { %v3878_v6 = vpop.eup %3877  ;;  %vm5422_vm13 = vcmp.eq.f32.partialorder %v1875_v32, 8.507059e+37  ;;  %v1878_v41 = vor.u32 1.1754944e-38, %v1877_v37  ;;  %v1893_v43 = vor.u32 1.1754944e-38, %v1892_v39  ;;  %v1912_v0 = vmul.f32 %v5365_v63, %v5297_v53  ;;  %v5489_v46 = vpop.f32.mrf.mxu1 }
 0x15e   : > { %v5428_v55 = vadd.f32 1.0, %v3872_v15  ;;  %v1829_v23 = vsel %vm5406_vm10, %v5248_v13, %v1825_v24  ;;  %v1844_v58 = vsel %vm5418_vm12, %v5258_v52, %v1840_v48  ;;  %vm1872_vm15 = vweird.f32 %v5308_v54  ;;  %v5466_v48 = vpop.f32.mrf.mxu3  ;;  %7136 = vst [vmem:[#allocation52_spill] sm:$0xff] %v5489_v46 }
 0x15f   : > { %vm5445_vm0 = vcmp.eq.f32.partialorder %v1890_v34, 8.507059e+37  ;;  %vm1901_vm1 = vweird.f32 %v5263_v22  ;;  %v5450_v13 = vadd.f32 1.0, %v3874_v7  ;;  %v1859_v52 = vsel %vm5440_vm14, %v5265_v45, %v1855_v1  ;;  %v5464_v7 = vpop.f32.mrf.mxu2  ;;  %7132 = vst [vmem:[#allocation50_spill] sm:$0xff] %v5466_v48  ;;  %vm5481_vm3 = vmor %vm1871_vm9, %vm1872_vm15 }
 0x160   : > { %v1870_v31 = vadd.f32 %v5308_v54, %v1869_v21  ;;  %vm1887_vm2 = vweird.f32 %v5316_v5  ;;  %v5457_v37 = vadd.f32 1.0, %v3876_v28  ;;  %v1885_v39 = vadd.f32 %v5316_v5, %v1884_v49  ;;  %7131 = vst [vmem:[#allocation49_spill] sm:$0xff] %v5464_v7  ;;  %v5487_v49 = vpop.f32.mrf.mxu0 }
 0x161   : > { %v1899_v15 = vmul.f32 %v5347_v35, %v1898_v17  ;;  %3879 = vrcp.f32 %v5412_v62  ;;  %v5462_v24 = vadd.f32 1.0, %v3878_v6  ;;  %v1905_v45 = vand.u32 2147483647, %v5263_v22  ;;  %7135 = vst [vmem:[#allocation51_spill] sm:$0xff] %v5487_v49 }
 0x162   : > { %v1907_v21 = vand.u32 2147483648, %v5263_v22  ;;  %v1913_v1 = vsub.f32 1.0, %v1912_v0  ;;  %3881 = vrcp.f32 %v5428_v55  ;;  %v1834_v34 = vsel %vm5377_vm4, %v5343_v60, %v1829_v23  ;;  %vm5500_vm4 = vmor %vm1886_vm11, %vm1887_vm2 }
 0x163   : > { %v1849_v28 = vsel %vm5382_vm6, %v5351_v3, %v1844_v58  ;;  %vm1902_vm5 = vweird.f32 %v5347_v35  ;;  %3883 = vrcp.f32 %v5450_v13  ;;  %v1864_v60 = vsel %vm5391_vm7, %v1863_v36, %v1859_v52 }
 0x164   : > { %v1874_v3 = vsel %vm5481_vm3, %v5308_v54, %v1870_v31  ;;  %v1920_v40 = vand.u32 2147483647, %v5297_v53  ;;  %3885 = vrcp.f32 %v5457_v37  ;;  %v1889_v36 = vsel %vm5500_vm4, %v5316_v5, %v1885_v39  ;;  %vm5540_vm7 = vmor %vm1901_vm1, %vm1902_vm5 }
 0x165   : > { %v1900_v20 = vadd.f32 %v5347_v35, %v1899_v15  ;;  %v1922_v54 = vand.u32 2147483648, %v5297_v53  ;;  %3887 = vrcp.f32 %v5462_v24  ;;  %v5513_v57 = vmul.f32 %v1834_v34, %v4705_v51  ;;  %v7148_v15 = vld [vmem:[#allocation14_spill] sm:$0xff] }
 0x166   : > { %vm5515_vm6 = vcmp.eq.f32.partialorder %v1905_v45, 8.507059e+37  ;;  %v1914_v6 = vmul.f32 %v5365_v63, %v1913_v1  ;;  %v3455_v16 = vmul.f32 -1.442695, %v5014_v25  ;;  %v5524_v5 = vmul.f32 %v1849_v28, %v4707_v61  ;;  %v7150_v1 = vld [vmem:[#allocation16_spill] sm:$0xff]  ;;  %v5599_v61 = vpop.f32.mrf.mxu1 }
 0x167   : > { %7139 = vst [vmem:[#allocation53_spill] sm:$0xff] %v5513_v57  ;;  %v5521_v0 = vpop.eup %3879  ;;  %v1879_v23 = vsel %vm5422_vm13, %v1878_v41, %v1874_v3  ;;  %v1908_v58 = vor.u32 1.1754944e-38, %v1907_v21  ;;  %v3456_v51 = vmul.f32 -1.442695, %v5016_v4  ;;  %v5532_v52 = vmul.f32 %v1864_v60, %v4775_v11  ;;  %v7152_v28 = vld [vmem:[#allocation28_spill] sm:$0xff]  ;;  %v7153_v60 = vld [vmem:[#allocation29_spill] sm:$0xff]  ;;  %v5572_v42 = vpop.f32.mrf.mxu2 }
 0x168   : > { %7142 = vst [vmem:[#allocation54_spill] sm:$0xff] %v5524_v5  ;;  %v5529_v2 = vpop.eup %3881  ;;  %v1894_v31 = vsel %vm5445_vm0, %v1893_v43, %v1889_v36  ;;  %vm1916_vm8 = vweird.f32 %v5297_v53  ;;  %v3457_v38 = vmul.f32 -1.442695, %v5073_v47  ;;  %v1904_v11 = vsel %vm5540_vm7, %v5347_v35, %v1900_v20  ;;  %v3689_v47 = vld [vmem:[%s4317_s11 + $0x10] sm:$0xff] }
 0x169   : > { %7143 = vst [vmem:[#allocation55_spill] sm:$0xff] %v5532_v52  ;;  %v5546_v41 = vpop.eup %3883  ;;  %vm5551_vm9 = vcmp.eq.f32.partialorder %v1920_v40, 8.507059e+37  ;;  %v1923_v32 = vor.u32 1.1754944e-38, %v1922_v54  ;;  %v3459_v22 = vmul.f32 -1.442695, %v5095_v9  ;;  %v5559_v45 = vmul.f32 %v1879_v23, %v7148_v15  ;;  %v5574_v40 = vpop.f32.mrf.mxu3  ;;  %v3697_v23 = vld [vmem:[%s4317_s11 + $0x50] sm:$0xff]  ;;  %2794 = vmatpush.bf16.msra.mxu0 %v3689_v47 }
 0x16a   : > { %v5556_v39 = vpop.eup %3885  ;;  %v1915_v21 = vadd.f32 %v5365_v63, %v1914_v6  ;;  %vm1917_vm10 = vweird.f32 %v5365_v63  ;;  %3889 = vpow2.f32 %v3455_v16  ;;  %v5566_v34 = vmul.f32 %v1894_v31, %v7150_v1  ;;  %7154 = vst [vmem:[#allocation56_spill] sm:$0xff] %v5572_v42  ;;  %v3705_v6 = vld [vmem:[%s4317_s11 + $0x90] sm:$0xff]  ;;  %v5597_v31 = vpop.f32.mrf.mxu0  ;;  %2843 = vmatpush.bf16.msra.mxu1 %v3697_v23 }
 0x16b   : > { %7149 = vst [vmem:[#allocation14_spill] sm:$0xff] %v5559_v45  ;;  %v5563_v35 = vpop.eup %3887  ;;  %3891 = vpow2.f32 %v3456_v51  ;;  %v5569_v12 = vmul.f32 -1.442695, %v7152_v28  ;;  %v3460_v3 = vmul.f32 -1.442695, %v7153_v60  ;;  %v1909_v36 = vsel %vm5515_vm6, %v1908_v58, %v1904_v11  ;;  %v3713_v16 = vld [vmem:[%s4317_s11 + $0xd0] sm:$0xff]  ;;  %vm5588_vm11 = vmor %vm1916_vm8, %vm1917_vm10  ;;  %2892 = vmatpush.bf16.msra.mxu2 %v3705_v6 }
 0x16c   : > { %7151 = vst [vmem:[#allocation16_spill] sm:$0xff] %v5566_v34  ;;  %v1927_v20 = vmul.f32 %v5521_v0, %v5412_v62  ;;  %v1942_v54 = vmul.f32 %v5529_v2, %v5428_v55  ;;  %3893 = vpow2.f32 %v3457_v38  ;;  %v1937_v17 = vand.u32 2147483648, %v5412_v62  ;;  %2941 = vmatpush.bf16.msra.mxu3 %v3713_v16 }
 0x16d   : > { %7155 = vst [vmem:[#allocation57_spill] sm:$0xff] %v5574_v40  ;;  %v1957_v58 = vmul.f32 %v5546_v41, %v5450_v13  ;;  %v1972_v51 = vmul.f32 %v5556_v39, %v5457_v37  ;;  %3895 = vpow2.f32 %v3459_v22  ;;  %v1919_v53 = vsel %vm5588_vm11, %v5365_v63, %v1915_v21 }
 0x16e   : > { %7158 = vst [vmem:[#allocation58_spill] sm:$0xff] %v5597_v31  ;;  %v1952_v38 = vand.u32 2147483648, %v5428_v55  ;;  %v1987_v11 = vmul.f32 %v5563_v35, %v5462_v24  ;;  %v3461_v15 = vmul.f32 -1.442695, %v5173_v19  ;;  %v5609_v1 = vmul.f32 %v1909_v36, %v4795_v33  ;;  %v5647_v23 = vpop.f32.mrf.mxu1 }
 0x16f   : > { %7159 = vst [vmem:[#allocation59_spill] sm:$0xff] %v5599_v61  ;;  %v1935_v22 = vand.u32 2147483647, %v5412_v62  ;;  %3897 = vpow2.f32 %v3460_v3  ;;  %v3462_v28 = vmul.f32 -1.442695, %v5175_v50  ;;  %v1928_v21 = vsub.f32 1.0, %v1927_v20 }
 0x170   : > { %7160 = vst [vmem:[#allocation60_spill] sm:$0xff] %v5609_v1  ;;  %v3890_v63 = vpop.eup %3889  ;;  %vm1931_vm12 = vweird.f32 %v5412_v62  ;;  %v1943_v4 = vsub.f32 1.0, %v1942_v54  ;;  %vm1946_vm13 = vweird.f32 %v5428_v55  ;;  %v1950_v6 = vand.u32 2147483647, %v5428_v55 }
 0x171   : > { %v3892_v16 = vpop.eup %3891  ;;  %v5620_v33 = vsel %vm5551_vm9, %v1923_v32, %v1919_v53  ;;  %v5622_v36 = vor.u32 1.1754944e-38, %v1937_v17  ;;  %v1958_v3 = vsub.f32 1.0, %v1957_v58  ;;  %v1973_v25 = vsub.f32 1.0, %v1972_v51  ;;  %v5632_v17 = vpop.f32.mrf.mxu2 }
 0x172   : > { %v5624_v45 = vpop.eup %3893  ;;  %v5626_v20 = vor.u32 1.1754944e-38, %v1952_v38  ;;  %v1967_v54 = vand.u32 2147483648, %v5450_v13  ;;  %v1988_v52 = vsub.f32 1.0, %v1987_v11  ;;  %3899 = vpow2.f32 %v3461_v15  ;;  %7161 = vst [vmem:[#allocation61_spill] sm:$0xff] %v5632_v17  ;;  %v5634_v47 = vpop.f32.mrf.mxu3 }
 0x173   : > { %v3896_v1 = vpop.eup %3895  ;;  %v1965_v34 = vand.u32 2147483647, %v5450_v13  ;;  %v1980_v43 = vand.u32 2147483647, %v5457_v37  ;;  %v1982_v32 = vand.u32 2147483648, %v5457_v37  ;;  %3901 = vpow2.f32 %v3462_v28  ;;  %7162 = vst [vmem:[#allocation62_spill] sm:$0xff] %v5634_v47  ;;  %v5645_v15 = vpop.f32.mrf.mxu0 }
 0x174   : > { %v1929_v58 = vmul.f32 %v5521_v0, %v1928_v21  ;;  %v1944_v51 = vmul.f32 %v5529_v2, %v1943_v4  ;;  %vm1961_vm14 = vweird.f32 %v5450_v13  ;;  %vm1976_vm15 = vweird.f32 %v5457_v37  ;;  %v7189_v37 = vld [vmem:[#allocation20_spill] sm:$0xff] }
 0x175   : > { %v3898_v53 = vpop.eup %3897  ;;  %vm1932_vm0 = vweird.f32 %v5521_v0  ;;  %v1959_v38 = vmul.f32 %v5546_v41, %v1958_v3  ;;  %v1974_v11 = vmul.f32 %v5556_v39, %v1973_v25  ;;  %v5643_v28 = vadd.f32 1.0, %v3890_v63 }
 0x176   : > { %vm5649_vm1 = vcmp.eq.f32.partialorder %v1935_v22, 8.507059e+37  ;;  %vm1947_vm2 = vweird.f32 %v5529_v2  ;;  %vm5654_vm3 = vcmp.eq.f32.partialorder %v1950_v6, 8.507059e+37  ;;  %v5658_v5 = vor.u32 1.1754944e-38, %v1967_v54  ;;  %vm5683_vm7 = vmor %vm1931_vm12, %vm1932_vm0 }
 0x177   : > { %v1989_v25 = vmul.f32 %v5563_v35, %v1988_v52  ;;  %v5661_v63 = vadd.f32 1.0, %v3896_v1  ;;  %vm5663_vm5 = vcmp.eq.f32.partialorder %v1965_v34, 8.507059e+37  ;;  %vm5667_vm4 = vcmp.eq.f32.partialorder %v1980_v43, 8.507059e+37  ;;  %vm5697_vm9 = vmor %vm1946_vm13, %vm1947_vm2  ;;  %v5759_v43 = vpop.f32.mrf.mxu1 }
 0x178   : > { %v1983_v6 = vor.u32 1.1754944e-38, %v1982_v32  ;;  %v1995_v57 = vand.u32 2147483647, %v5462_v24  ;;  %v5672_v50 = vadd.f32 1.0, %v3892_v16  ;;  %v3900_v54 = vpop.eup %3899  ;;  %v1930_v52 = vadd.f32 %v5521_v0, %v1929_v58  ;;  %v3688_v58 = vld [vmem:[%s4317_s11 + $0x8] sm:$0xff] }
 0x179   : > { %v1945_v1 = vadd.f32 %v5529_v2, %v1944_v51  ;;  %vm1962_vm6 = vweird.f32 %v5546_v41  ;;  %v5677_v34 = vadd.f32 1.0, %v3898_v53  ;;  %v3902_v19 = vpop.eup %3901  ;;  %v1960_v16 = vadd.f32 %v5546_v41, %v1959_v38  ;;  %v3696_v51 = vld [vmem:[%s4317_s11 + $0x48] sm:$0xff]  ;;  %2795 = vmatpush.bf16.msra.mxu0 %v3688_v58 }
 0x17a   : > { %v1975_v32 = vadd.f32 %v5556_v39, %v1974_v11  ;;  %vm1977_vm8 = vweird.f32 %v5556_v39  ;;  %3903 = vrcp.f32 %v5643_v28  ;;  %v1990_v53 = vadd.f32 %v5563_v35, %v1989_v25  ;;  %vm5709_vm11 = vmor %vm1961_vm14, %vm1962_vm6  ;;  %2844 = vmatpush.bf16.msra.mxu1 %v3696_v51  ;;  %v5720_v47 = vpop.f32.mrf.mxu3 }
 0x17b   : > { %vm1992_vm10 = vweird.f32 %v5563_v35  ;;  %3905 = vrcp.f32 %v5661_v63  ;;  %v3463_v38 = vmul.f32 -1.442695, %v5207_v29  ;;  %vm1991_vm12 = vweird.f32 %v5462_v24  ;;  %v5718_v29 = vpop.f32.mrf.mxu2  ;;  %vm5732_vm13 = vmor %vm1976_vm15, %vm1977_vm8 }
 0x17c   : > { %v1997_v55 = vand.u32 2147483648, %v5462_v24  ;;  %3907 = vpow2.f32 %v5569_v12  ;;  %v5716_v25 = vadd.f32 1.0, %v3900_v54  ;;  %v1934_v13 = vsel %vm5683_vm7, %v5521_v0, %v1930_v52  ;;  %vm5749_vm14 = vmor %vm1991_vm12, %vm1992_vm10  ;;  %v3687_v52 = vld [vmem:[%s4317_s11] sm:$0xff] }
 0x17d   : > { %v1949_v60 = vsel %vm5697_vm9, %v5529_v2, %v1945_v1  ;;  %3909 = vrcp.f32 %v5677_v34  ;;  %v5737_v54 = vadd.f32 1.0, %v3902_v19  ;;  %v1964_v0 = vsel %vm5709_vm11, %v5546_v41, %v1960_v16  ;;  %v3695_v41 = vld [vmem:[%s4317_s11 + $0x40] sm:$0xff]  ;;  %v5757_v1 = vpop.f32.mrf.mxu0  ;;  %2796 = vmatpush.bf16.msra.mxu0 %v3687_v52 }
 0x17e   : > { %v1979_v2 = vsel %vm5732_vm13, %v5556_v39, %v1975_v32  ;;  %3911 = vrcp.f32 %v5672_v50  ;;  %v3464_v19 = vmul.f32 -1.442695, %v5209_v18  ;;  %v1994_v24 = vsel %vm5749_vm14, %v5563_v35, %v1990_v53  ;;  %v3712_v35 = vld [vmem:[%s4317_s11 + $0xc8] sm:$0xff]  ;;  %2845 = vmatpush.bf16.msra.mxu1 %v3695_v41  ;;  %v7193_v39 = vld [vmem:[#allocation45_spill] sm:$0xff] }
 0x17f   : > { %vm5764_vm15 = vcmp.eq.f32.partialorder %v1995_v57, 8.507059e+37  ;;  %v5769_v16 = vadd.f32 1.0, %v5624_v45  ;;  %3913 = vpow2.f32 %v3463_v38  ;;  %v1939_v58 = vsel %vm5649_vm1, %v5622_v36, %v1934_v13  ;;  %v3704_v57 = vld [vmem:[%s4317_s11 + $0x88] sm:$0xff]  ;;  %2942 = vmatpush.bf16.msra.mxu3 %v3712_v35  ;;  %v3703_v13 = vld [vmem:[%s4317_s11 + $0x80] sm:$0xff]  ;;  %v5841_v35 = vpop.f32.mrf.mxu1 }
 0x180   : > { %v5771_v32 = vpop.eup %3903  ;;  %v1954_v51 = vsel %vm5654_vm3, %v5626_v20, %v1949_v60  ;;  %v1998_v62 = vor.u32 1.1754944e-38, %v1997_v55  ;;  %3915 = vrcp.f32 %v5716_v25  ;;  %v1969_v53 = vsel %vm5663_vm5, %v5658_v5, %v1964_v0  ;;  %2893 = vmatpush.bf16.msra.mxu2 %v3704_v57 }
 0x181   : > { %7183 = vst [vmem:[#allocation63_spill] sm:$0xff] %v5769_v16  ;;  %v5782_v45 = vpop.eup %3905  ;;  %v1984_v36 = vsel %vm5667_vm4, %v1983_v6, %v1979_v2  ;;  %3917 = vrcp.f32 %v5737_v54  ;;  %v3465_v60 = vmul.f32 -1.442695, %v5282_v8  ;;  %v5793_v21 = vmul.f32 %v5620_v33, %v4872_v56 }
 0x182   : > { %v3908_v20 = vpop.eup %3907  ;;  %v1999_v4 = vsel %vm5764_vm15, %v1998_v62, %v1994_v24  ;;  %3919 = vpow2.f32 %v3464_v19  ;;  %v3466_v5 = vmul.f32 -1.442695, %v5284_v27  ;;  %v5801_v22 = vmul.f32 %v1939_v58, %v4874_v44  ;;  %v5823_v0 = vpop.f32.mrf.mxu3 }
 0x183   : > { %7184 = vst [vmem:[#allocation64_spill] sm:$0xff] %v5793_v21  ;;  %v5798_v3 = vpop.eup %3909  ;;  %v5804_v6 = vmul.f32 %v1954_v51, %v4905_v59  ;;  %3921 = vrcp.f32 %v5769_v16  ;;  %v3467_v56 = vmul.f32 -1.442695, %v5299_v10  ;;  %v5811_v38 = vmul.f32 %v1969_v53, %v4907_v26  ;;  %v3711_v59 = vld [vmem:[%s4317_s11 + $0xc0] sm:$0xff]  ;;  %v5821_v12 = vpop.f32.mrf.mxu2  ;;  %v7194_v51 = vld [vmem:[#allocation47_spill] sm:$0xff] }
 0x184   : > { %7185 = vst [vmem:[#allocation65_spill] sm:$0xff] %v5801_v22  ;;  %v5808_v33 = vpop.eup %3911  ;;  %v5814_v11 = vmul.f32 %v1984_v36, %v4989_v14  ;;  %v2062_v55 = vmul.f32 %v5782_v45, %v5661_v63  ;;  %v3468_v44 = vmul.f32 -1.442695, %v5301_v30  ;;  %v5826_v19 = vmul.f32 %v1999_v4, %v7189_v37  ;;  %v7192_v14 = vld [vmem:[#allocation44_spill] sm:$0xff]  ;;  %2894 = vmatpush.bf16.msra.mxu2 %v3703_v13  ;;  %v7199_v16 = vld [vmem:[#allocation9_spill] sm:$0xff] }
 0x185   : > { %7186 = vst [vmem:[#allocation66_spill] sm:$0xff] %v5804_v6  ;;  %v3914_v2 = vpop.eup %3913  ;;  %v5828_v26 = vadd.f32 1.0, %v3908_v20  ;;  %3923 = vpow2.f32 %v3465_v60  ;;  %v3469_v52 = vmul.f32 -1.442695, %v7192_v14  ;;  %v2077_v24 = vmul.f32 %v5798_v3, %v5677_v34  ;;  %2943 = vmatpush.bf16.msra.mxu3 %v3711_v59  ;;  %v5839_v57 = vpop.f32.mrf.mxu0  ;;  %v7195_v60 = vld [vmem:[#allocation48_spill] sm:$0xff] }
 0x186   : > { %7187 = vst [vmem:[#allocation67_spill] sm:$0xff] %v5811_v38  ;;  %v5831_v41 = vpop.eup %3915  ;;  %3925 = vpow2.f32 %v3466_v5  ;;  %v3470_v58 = vmul.f32 -1.442695, %v7193_v39  ;;  %v5837_v62 = vmul.f32 -1.442695, %v7194_v51  ;;  %v2072_v36 = vand.u32 2147483648, %v5661_v63 }
 0x187   : > { %7188 = vst [vmem:[#allocation68_spill] sm:$0xff] %v5814_v11  ;;  %v5843_v53 = vpop.eup %3917  ;;  %3927 = vpow2.f32 %v3467_v56  ;;  %v5847_v20 = vmul.f32 -1.442695, %v7195_v60  ;;  %v5850_v4 = vmul.f32 -1.442695, %v5464_v7  ;;  %v2063_v37 = vsub.f32 1.0, %v2062_v55  ;;  %v5892_v10 = vpop.f32.mrf.mxu1 }
 0x188   : > { %7190 = vst [vmem:[#allocation20_spill] sm:$0xff] %v5826_v19  ;;  %v3920_v5 = vpop.eup %3919  ;;  %v2087_v13 = vand.u32 2147483648, %v5677_v34  ;;  %v5853_v59 = vadd.f32 1.0, %v3914_v2  ;;  %3929 = vpow2.f32 %v3468_v44  ;;  %v2092_v56 = vmul.f32 %v5831_v41, %v5716_v25 }
 0x189   : > { %7191 = vst [vmem:[#allocation69_spill] sm:$0xff] %v5828_v26  ;;  %v5855_v51 = vpop.eup %3921  ;;  %3931 = vrcp.f32 %v5828_v26  ;;  %v5861_v60 = vmul.f32 -1.442695, %v5466_v48  ;;  %v3475_v7 = vmul.f32 -1.442695, %v5487_v49  ;;  %vm2066_vm0 = vweird.f32 %v5661_v63 }
 0x18a   : > { %7196 = vst [vmem:[#allocation70_spill] sm:$0xff] %v5853_v59  ;;  %v2070_v55 = vand.u32 2147483647, %v5661_v63  ;;  %v2078_v27 = vsub.f32 1.0, %v2077_v24  ;;  %v2107_v44 = vmul.f32 %v5843_v53, %v5737_v54  ;;  %v5868_v8 = vor.u32 1.1754944e-38, %v2072_v36  ;;  %v5881_v6 = vpop.f32.mrf.mxu3 }
 0x18b   : > { %7197 = vst [vmem:[#allocation71_spill] sm:$0xff] %v5855_v51  ;;  %v3924_v2 = vpop.eup %3923  ;;  %vm2081_vm1 = vweird.f32 %v5677_v34  ;;  %v2085_v18 = vand.u32 2147483647, %v5677_v34  ;;  %v5872_v19 = vadd.f32 1.0, %v3920_v5  ;;  %v2064_v49 = vmul.f32 %v5782_v45, %v2063_v37  ;;  %v5879_v24 = vpop.f32.mrf.mxu2  ;;  %v7217_v34 = vld [vmem:[#allocation12_spill] sm:$0xff] }
 0x18c   : > { %v3926_v48 = vpop.eup %3925  ;;  %v5875_v11 = vor.u32 1.1754944e-38, %v2087_v13  ;;  %v2100_v38 = vand.u32 2147483647, %v5716_v25  ;;  %3933 = vrcp.f32 %v5853_v59  ;;  %v2093_v26 = vsub.f32 1.0, %v2092_v56 }
 0x18d   : > { %7198 = vst [vmem:[#allocation72_spill] sm:$0xff] %v5872_v19  ;;  %v3928_v36 = vpop.eup %3927  ;;  %v2102_v39 = vand.u32 2147483648, %v5716_v25  ;;  %v2115_v5 = vand.u32 2147483647, %v5737_v54  ;;  %3935 = vpow2.f32 %v3469_v52  ;;  %v2079_v37 = vmul.f32 %v5798_v3, %v2078_v27  ;;  %v5890_v30 = vpop.f32.mrf.mxu0  ;;  %v7203_v52 = vld [vmem:[#allocation5_spill] sm:$0xff] }
 0x18e   : > { %v3930_v14 = vpop.eup %3929  ;;  %v2108_v13 = vsub.f32 1.0, %v2107_v44  ;;  %v5886_v51 = vadd.f32 1.0, %v3924_v2  ;;  %v2489_v59 = vmul.f32 %v7199_v16, %v5757_v1  ;;  %vm5896_vm2 = vcmp.eq.f32.partialorder %v2070_v55, 8.507059e+37  ;;  %v7204_v1 = vld [vmem:[#allocation11_spill] sm:$0xff] }
 0x18f   : > { %v5894_v22 = vpop.eup %3931  ;;  %vm2096_vm3 = vweird.f32 %v5716_v25  ;;  %v2117_v27 = vand.u32 2147483648, %v5737_v54  ;;  %3937 = vrcp.f32 %v5872_v19  ;;  %v2485_v44 = vmul.f32 %v7203_v52, %v5645_v15  ;;  %v7207_v15 = vld [vmem:[#allocation6_spill] sm:$0xff] }
 0x190   : > { %7200 = vst [vmem:[#allocation9_spill] sm:$0xff] %v5894_v22  ;;  %v2490_v16 = vmul.f32 %v7204_v1, %v5759_v43  ;;  %v2065_v2 = vadd.f32 %v5782_v45, %v2064_v49  ;;  %vm2067_vm5 = vweird.f32 %v5782_v45  ;;  %vm5909_vm4 = vcmp.eq.f32.partialorder %v2085_v18, 8.507059e+37 }
 0x191   : > { %vm2111_vm6 = vweird.f32 %v5737_v54  ;;  %v5914_v22 = vadd.f32 1.0, %v3928_v36  ;;  %3939 = vpow2.f32 %v3470_v58  ;;  %v2094_v19 = vmul.f32 %v5831_v41, %v2093_v26  ;;  %vm5937_vm9 = vmor %vm2066_vm0, %vm2067_vm5 }
 0x192   : > { %v5917_v21 = vadd.f32 1.0, %v3930_v14  ;;  %v2486_v43 = vmul.f32 %v7207_v15, %v5647_v23  ;;  %v2565_v52 = vpack.c.bf16 %v2489_v59, %v2485_v44  ;;  %v5921_v49 = vpop.eup %3933  ;;  %v2080_v18 = vadd.f32 %v5798_v3, %v2079_v37  ;;  %v5952_v37 = vpop.f32.mrf.mxu3  ;;  %v7221_v59 = vld [vmem:[#allocation7_spill] sm:$0xff] }
 0x193   : > { %vm2082_vm7 = vweird.f32 %v5798_v3  ;;  %v2109_v1 = vmul.f32 %v5843_v53, %v2108_v13  ;;  %3941 = vrcp.f32 %v5886_v51  ;;  %v3936_v36 = vpop.eup %3935  ;;  %vm5927_vm8 = vcmp.eq.f32.partialorder %v2100_v38, 8.507059e+37 }
 0x194   : > { %v2103_v26 = vor.u32 1.1754944e-38, %v2102_v39  ;;  %v5931_v14 = vadd.f32 1.0, %v3926_v48  ;;  %3943 = vpow2.f32 %v3475_v7  ;;  %v2566_v23 = vpack.c.bf16 %v2490_v16, %v2486_v43  ;;  %2797 = vmatmul.bf16.vlgmr.msra.gmra.mxu0 %v2565_v52  ;;  %v5950_v48 = vpop.f32.mrf.mxu2  ;;  %vm5963_vm12 = vmor %vm2081_vm1, %vm2082_vm7 }
 0x195   : > { %vm2097_vm10 = vweird.f32 %v5831_v41  ;;  %vm5942_vm11 = vcmp.eq.f32.partialorder %v2115_v5, 8.507059e+37  ;;  %v2118_v39 = vor.u32 1.1754944e-38, %v2117_v27  ;;  %3945 = vrcp.f32 %v5914_v22  ;;  %v5954_v63 = vpop.eup %3937  ;;  %v5978_v43 = vpop.f32.mrf.mxu0 }
 0x196   : > { %7210 = vst [vmem:[#allocation5_spill] sm:$0xff] %v5931_v14  ;;  %v5948_v7 = vmul.f32 -1.442695, %v5489_v46  ;;  %v2069_v13 = vsel %vm5937_vm9, %v5782_v45, %v2065_v2  ;;  %v2095_v27 = vadd.f32 %v5831_v41, %v2094_v19  ;;  %vm2112_vm13 = vweird.f32 %v5843_v53  ;;  %2846 = vmatmul.bf16.vlgmr.msra.gmra.mxu1 %v2566_v23  ;;  %v5980_v19 = vpop.f32.mrf.mxu1  ;;  %vm6002_vm14 = vmor %vm2096_vm3, %vm2097_vm10 }
 0x197   : > { %3947 = vrcp.f32 %v5917_v21  ;;  %v3940_v44 = vpop.eup %3939  ;;  %v2084_v45 = vsel %vm5963_vm12, %v5798_v3, %v2080_v18  ;;  %v2110_v16 = vadd.f32 %v5843_v53, %v2109_v1  ;;  %v5974_v2 = vadd.f32 1.0, %v3936_v36  ;;  %vm6022_vm15 = vmor %vm2111_vm6, %vm2112_vm13 }
 0x198   : > { %v2491_v15 = vmul.f32 %v7217_v34, %v5821_v12  ;;  %3949 = vrcp.f32 %v5931_v14  ;;  %v5984_v52 = vmul.f32 -1.442695, %v5572_v42  ;;  %v5987_v23 = vmul.f32 -1.442695, %v5574_v40  ;;  %v7265_v14 = vld [vmem:[#allocation60_spill] sm:$0xff] }
 0x199   : > { %v5991_v3 = vmul.f32 %v5771_v32, %v5643_v28  ;;  %v5993_v18 = vpop.eup %3941  ;;  %v2074_v12 = vsel %vm5896_vm2, %v5868_v8, %v2069_v13  ;;  %3951 = vpow2.f32 %v5837_v62  ;;  %v6008_v36 = vmul.f32 -1.442695, %v5597_v31  ;;  %v7249_v31 = vld [vmem:[#allocation10_spill] sm:$0xff] }
 0x19a   : > { %7218 = vst [vmem:[#allocation11_spill] sm:$0xff] %v5993_v18  ;;  %v2487_v5 = vmul.f32 %v7221_v59, %v5718_v29  ;;  %v3944_v34 = vpop.eup %3943  ;;  %v2089_v8 = vsel %vm5909_vm4, %v5875_v11, %v2084_v45  ;;  %v2099_v25 = vsel %vm6002_vm14, %v5831_v41, %v2095_v27  ;;  %v6026_v56 = vadd.f32 1.0, %v3940_v44  ;;  %v7225_v27 = vld [vmem:[#allocation13_spill] sm:$0xff] }
 0x19b   : > { %3953 = vpow2.f32 %v5847_v20  ;;  %v6029_v29 = vpop.eup %3945  ;;  %v2114_v11 = vsel %vm6022_vm15, %v5843_v53, %v2110_v16  ;;  %v6036_v41 = vmul.f32 -1.442695, %v5599_v61  ;;  %v6041_v13 = vmul.f32 %v2074_v12, %v5095_v9  ;;  %v7226_v53 = vld [vmem:[#allocation29_spill] sm:$0xff] }
 0x19c   : > { %3955 = vrcp.f32 %v5974_v2  ;;  %v2567_v54 = vpack.c.bf16 %v2491_v15, %v2487_v5  ;;  %v6045_v20 = vmul.f32 -1.442695, %v5632_v17  ;;  %v2492_v44 = vmul.f32 %v7225_v27, %v5823_v0  ;;  %v7228_v15 = vld [vmem:[#allocation8_spill] sm:$0xff]  ;;  %v1126_v12 = vpop.f32.mrf.mxu2  ;;  %v7230_v5 = vld [vmem:[#allocation15_spill] sm:$0xff] }
 0x19d   : > { %v6038_v55 = vpop.eup %3947  ;;  %7224 = vst [vmem:[#allocation6_spill] sm:$0xff] %v6041_v13  ;;  %3957 = vpow2.f32 %v5850_v4  ;;  %v6050_v45 = vmul.f32 %v2089_v8, %v7226_v53  ;;  %v2104_v16 = vsel %vm5927_vm8, %v2103_v26, %v2099_v25  ;;  %v2488_v9 = vmul.f32 %v7228_v15, %v5720_v47  ;;  %v1175_v4 = vpop.f32.mrf.mxu3  ;;  %v7231_v25 = vld [vmem:[#allocation21_spill] sm:$0xff]  ;;  %v7234_v15 = vld [vmem:[#allocation22_spill] sm:$0xff] }
 0x19e   : > { %3959 = vpow2.f32 %v5861_v60  ;;  %2895 = vmatmul.bf16.vlgmr.msra.gmra.mxu2 %v2567_v54  ;;  %v6057_v1 = vpop.eup %3949  ;;  %v2119_v59 = vsel %vm5942_vm11, %v2118_v39, %v2114_v11  ;;  %v2182_v0 = vmul.f32 %v6029_v29, %v5914_v22  ;;  %v6064_v58 = vadd.f32 1.0, %v3944_v34  ;;  %v1030_v38 = vpop.f32.mrf.mxu0  ;;  %v7232_v54 = vld [vmem:[#allocation17_spill] sm:$0xff]  ;;  %v7233_v34 = vld [vmem:[#allocation18_spill] sm:$0xff] }
 0x19f   : > { %7227 = vst [vmem:[#allocation12_spill] sm:$0xff] %v6050_v45  ;;  %3961 = vrcp.f32 %v6026_v56  ;;  %v3952_v26 = vpop.eup %3951  ;;  %v2197_v60 = vmul.f32 %v6038_v55, %v5917_v21  ;;  %v2568_v47 = vpack.c.bf16 %v2492_v44, %v2488_v9  ;;  %v2493_v8 = vmul.f32 %v7230_v5, %v5839_v57  ;;  %v1079_v39 = vpop.f32.mrf.mxu1  ;;  %v7235_v44 = vld [vmem:[#allocation25_spill] sm:$0xff] }
 0x1a0   : > { %7229 = vst [vmem:[#allocation7_spill] sm:$0xff] %v6057_v1  ;;  %v2497_v62 = vmul.f32 %v7231_v25, %v5890_v30  ;;  %v2494_v27 = vmul.f32 %v7232_v54, %v5841_v35  ;;  %v6076_v53 = vmul.f32 %v7233_v34, %v5879_v24  ;;  %v2498_v40 = vmul.f32 %v7234_v15, %v5892_v10  ;;  %v7236_v30 = vld [vmem:[#allocation62_spill] sm:$0xff]  ;;  %v7237_v25 = vld [vmem:[#allocation19_spill] sm:$0xff] }
 0x1a1   : > { %v3954_v11 = vpop.eup %3953  ;;  %v6082_v9 = vmul.f32 %v7235_v44, %v5950_v48  ;;  %v6087_v5 = vmul.f32 -1.442695, %v7236_v30  ;;  %2944 = vmatmul.bf16.vlgmr.msra.gmra.mxu3 %v2568_v47  ;;  %v6091_v35 = vmul.f32 %v7237_v25, %v5881_v6  ;;  %v7238_v24 = vld [vmem:[#allocation26_spill] sm:$0xff]  ;;  %3963 = vrcp.f32 %v6064_v58  ;;  %v7241_v30 = vld [vmem:[#allocation31_spill] sm:$0xff] }
 0x1a2   : > { %v6084_v57 = vpop.eup %3955  ;;  %v2569_v54 = vpack.c.bf16 %v2497_v62, %v2493_v8  ;;  %v6095_v34 = vmul.f32 %v7238_v24, %v5952_v37  ;;  %v7239_v15 = vld [vmem:[#allocation30_spill] sm:$0xff]  ;;  %v2570_v48 = vpack.c.bf16 %v2498_v40, %v2494_v27  ;;  %v6106_v6 = vmul.f32 %v2119_v59, %v7241_v30  ;;  %v7243_v59 = vld [vmem:[#allocation32_spill] sm:$0xff] }
 0x1a3   : > { %v3958_v10 = vpop.eup %3957  ;;  %v6098_v42 = vmul.f32 %v2104_v16, %v7239_v15  ;;  %v2571_v44 = vpack.c.bf16 %v6082_v9, %v6076_v53  ;;  %v2190_v8 = vand.u32 2147483647, %v5914_v22  ;;  %v2192_v37 = vand.u32 2147483648, %v5914_v22  ;;  %v7244_v9 = vld [vmem:[#allocation33_spill] sm:$0xff]  ;;  %v7245_v15 = vld [vmem:[#allocation38_spill] sm:$0xff] }
 0x1a4   : > { %v6103_v47 = vpop.eup %3959  ;;  %7242 = vst [vmem:[#allocation29_spill] sm:$0xff] %v6106_v6  ;;  %v2183_v25 = vsub.f32 1.0, %v2182_v0  ;;  %v2198_v24 = vsub.f32 1.0, %v2197_v60  ;;  %v2207_v40 = vand.u32 2147483648, %v5917_v21  ;;  %v2212_v27 = vmul.f32 %v6084_v57, %v5974_v2  ;;  %2802 = vmatmul.bf16.gmra.mxu0 %v2569_v54  ;;  %v7246_v0 = vld [vmem:[#allocation43_spill] sm:$0xff]  ;;  %v1128_v17 = vpop.f32.mrf.mxu2  ;;  %v7247_v54 = vld [vmem:[#allocation36_spill] sm:$0xff] }
 0x1a5   : > { %7240 = vst [vmem:[#allocation13_spill] sm:$0xff] %v6098_v42  ;;  %v6112_v16 = vpop.eup %3961  ;;  %vm2186_vm0 = vweird.f32 %v5914_v22  ;;  %v6120_v53 = vmul.f32 %v7243_v59, %v5978_v43  ;;  %v6124_v30 = vmul.f32 %v7244_v9, %v5980_v19  ;;  %v6127_v62 = vmul.f32 %v7245_v15, %v1030_v38  ;;  %v1177_v61 = vpop.f32.mrf.mxu3  ;;  %v7248_v43 = vld [vmem:[#allocation37_spill] sm:$0xff]  ;;  %v7250_v9 = vld [vmem:[#allocation46_spill] sm:$0xff] }
 0x1a6   : > { %v6130_v60 = vmul.f32 %v7246_v0, %v1079_v39  ;;  %vm2201_vm1 = vweird.f32 %v5917_v21  ;;  %2851 = vmatmul.bf16.gmra.mxu1 %v2570_v48  ;;  %v6134_v46 = vmul.f32 %v7247_v54, %v1126_v12  ;;  %v6137_v59 = vmul.f32 %v7248_v43, %v1175_v4  ;;  %v1033_v0 = vpop.f32.mrf.mxu0 }
 0x1a7   : > { %v6140_v19 = vmul.f32 %v7249_v31, %v1128_v17  ;;  %v6143_v38 = vmul.f32 %v7250_v9, %v1177_v61  ;;  %v2205_v39 = vand.u32 2147483647, %v5917_v21  ;;  %v2227_v15 = vmul.f32 %v6112_v16, %v6026_v56  ;;  %v1082_v4 = vpop.f32.mrf.mxu1  ;;  %v6152_v54 = vpop.eup %3963 }
 0x1a8   : > { %v2222_v31 = vand.u32 2147483648, %v5974_v2  ;;  %v6155_v17 = vadd.f32 1.0, %v3952_v26  ;;  %v2184_v9 = vmul.f32 %v6029_v29, %v2183_v25  ;;  %v6162_v48 = vor.u32 1.1754944e-38, %v2192_v37  ;;  %v7280_v25 = vld [vmem:[#allocation14_spill] sm:$0xff] }
 0x1a9   : > { %v2213_v6 = vsub.f32 1.0, %v2212_v27  ;;  %v6164_v12 = vadd.f32 1.0, %v3954_v11  ;;  %v2199_v42 = vmul.f32 %v6038_v55, %v2198_v24  ;;  %v6167_v45 = vor.u32 1.1754944e-38, %v2207_v40 }
 0x1aa   : > { %7251 = vst [vmem:[#allocation8_spill] sm:$0xff] %v6155_v17  ;;  %v2237_v26 = vand.u32 2147483648, %v6026_v56  ;;  %3965 = vpow2.f32 %v5948_v7  ;;  %vm2216_vm2 = vweird.f32 %v5974_v2  ;;  %v2220_v61 = vand.u32 2147483647, %v5974_v2 }
 0x1ab   : > { %7252 = vst [vmem:[#allocation15_spill] sm:$0xff] %v6164_v12  ;;  %v2228_v43 = vsub.f32 1.0, %v2227_v15  ;;  %v6173_v13 = vadd.f32 1.0, %v3958_v10  ;;  %v2302_v37 = vmul.f32 %v6152_v54, %v6064_v58  ;;  %vm2187_vm3 = vweird.f32 %v6029_v29 }
 0x1ac   : > { %vm6178_vm5 = vcmp.eq.f32.partialorder %v2190_v8, 8.507059e+37  ;;  %vm6182_vm4 = vcmp.eq.f32.partialorder %v2205_v39, 8.507059e+37  ;;  %v6186_v7 = vor.u32 1.1754944e-38, %v2222_v31  ;;  %v2235_v24 = vand.u32 2147483647, %v6026_v56  ;;  %v1131_v8 = vpop.f32.mrf.mxu2  ;;  %vm6209_vm9 = vmor %vm2186_vm0, %vm2187_vm3 }
 0x1ad   : > { %7253 = vst [vmem:[#allocation21_spill] sm:$0xff] %v6173_v13  ;;  %3967 = vrcp.f32 %v6155_v17  ;;  %v2185_v10 = vadd.f32 %v6029_v29, %v2184_v9  ;;  %vm2202_vm6 = vweird.f32 %v6038_v55  ;;  %v2214_v40 = vmul.f32 %v6084_v57, %v2213_v6  ;;  %v1180_v27 = vpop.f32.mrf.mxu3 }
 0x1ae   : > { %vm2231_vm7 = vweird.f32 %v6026_v56  ;;  %3969 = vrcp.f32 %v6164_v12  ;;  %2900 = vmatmul.bf16.gmra.mxu2 %v2571_v44  ;;  %v2200_v39 = vadd.f32 %v6038_v55, %v2199_v42  ;;  %v6196_v15 = vor.u32 1.1754944e-38, %v2237_v26  ;;  %v1035_v12 = vpop.f32.mrf.mxu0  ;;  %v7263_v26 = vld [vmem:[#allocation54_spill] sm:$0xff]  ;;  %vm6236_vm11 = vmor %vm2201_vm1, %vm2202_vm6 }
 0x1af   : > { %v6199_v31 = vadd.f32 1.0, %v6103_v47  ;;  %3971 = vpow2.f32 %v5984_v52  ;;  %vm2217_vm8 = vweird.f32 %v6084_v57  ;;  %v2229_v6 = vmul.f32 %v6112_v16, %v2228_v43  ;;  %v1084_v44 = vpop.f32.mrf.mxu1  ;;  %v7262_v47 = vld [vmem:[#allocation53_spill] sm:$0xff]  ;;  %v7285_v52 = vld [vmem:[#allocation42_spill] sm:$0xff] }
 0x1b0   : > { %3973 = vrcp.f32 %v6173_v13  ;;  %v2303_v9 = vsub.f32 1.0, %v2302_v37  ;;  %v3966_v17 = vpop.eup %3965  ;;  %vm6213_vm10 = vcmp.eq.f32.partialorder %v2220_v61, 8.507059e+37  ;;  %v6218_v43 = vmul.f32 %v7262_v47, %v1033_v0  ;;  %v7264_v13 = vld [vmem:[#allocation16_spill] sm:$0xff]  ;;  %vm6271_vm14 = vmor %vm2216_vm2, %vm2217_vm8 }
 0x1b1   : > { %v6221_v37 = vmul.f32 %v7263_v26, %v1082_v4  ;;  %v6224_v1 = vmul.f32 %v7264_v13, %v1035_v12  ;;  %v6227_v18 = vmul.f32 %v7265_v14, %v1084_v44  ;;  %v2189_v22 = vsel %vm6209_vm9, %v6029_v29, %v2185_v10  ;;  %v7281_v47 = vld [vmem:[#allocation64_spill] sm:$0xff]  ;;  %v7282_v26 = vld [vmem:[#allocation65_spill] sm:$0xff]  ;;  %v7288_v13 = vld [vmem:[#allocation63_spill] sm:$0xff] }
 0x1b2   : > { %v2215_v4 = vadd.f32 %v6084_v57, %v2214_v40  ;;  %vm6241_vm12 = vcmp.eq.f32.partialorder %v2235_v24, 8.507059e+37  ;;  %v2310_v14 = vand.u32 2147483647, %v6064_v58  ;;  %3975 = vpow2.f32 %v5987_v23 }
 0x1b3   : > { %v7270_v29 = vpack.c.bf16 %v6095_v34, %v6091_v35  ;;  %v6250_v12 = vpop.eup %3967  ;;  %v2204_v21 = vsel %vm6236_vm11, %v6038_v55, %v2200_v39  ;;  %3977 = vpow2.f32 %v6008_v36  ;;  %v2577_v61 = vpack.c.bf16 %v6224_v1, %v6218_v43 }
 0x1b4   : > { %v2578_v24 = vpack.c.bf16 %v6227_v18, %v6221_v37  ;;  %v6260_v10 = vpop.eup %3969  ;;  %v2230_v23 = vadd.f32 %v6112_v16, %v2229_v6  ;;  %vm2232_vm13 = vweird.f32 %v6112_v16  ;;  %3979 = vrcp.f32 %v6199_v31  ;;  %v1133_v44 = vpop.f32.mrf.mxu2 }
 0x1b5   : > { %2949 = vmatmul.bf16.gmra.mxu3 %v7270_v29  ;;  %v6265_v35 = vadd.f32 1.0, %v3966_v17  ;;  %v3972_v34 = vpop.eup %3971  ;;  %v2304_v55 = vmul.f32 %v6152_v54, %v2303_v9  ;;  %vm2306_vm15 = vweird.f32 %v6064_v58  ;;  %v2312_v40 = vand.u32 2147483648, %v6064_v58  ;;  %vm6299_vm0 = vmor %vm2231_vm7, %vm2232_vm13 }
 0x1b6   : > { %3981 = vpow2.f32 %v6036_v41  ;;  %v7273_v17 = vpack.c.bf16 %v6127_v62, %v6120_v53  ;;  %v6282_v39 = vpop.eup %3973  ;;  %v2194_v2 = vsel %vm6178_vm5, %v6162_v48, %v2189_v22  ;;  %v2209_v6 = vsel %vm6182_vm4, %v6167_v45, %v2204_v21  ;;  %v1182_v41 = vpop.f32.mrf.mxu3  ;;  %v7296_v48 = vld [vmem:[#allocation69_spill] sm:$0xff] }
 0x1b7   : > { %v2219_v9 = vsel %vm6271_vm14, %v6084_v57, %v2215_v4  ;;  %v2017_v62 = vmul.f32 %v5808_v33, %v5672_v50  ;;  %vm6303_vm1 = vcmp.eq.f32.partialorder %v2310_v14, 8.507059e+37  ;;  %v7278_v45 = vpack.c.bf16 %v6130_v60, %v6124_v30  ;;  %v7279_v57 = vld [vmem:[#allocation55_spill] sm:$0xff]  ;;  %v6329_v60 = vpop.f32.mrf.mxu0 }
 0x1b8   : > { %2807 = vmatmul.bf16.gmra.mxu0 %v7273_v17  ;;  %v6311_v11 = vmul.f32 %v7279_v57, %v1131_v8  ;;  %v6314_v42 = vmul.f32 %v7280_v25, %v1180_v27  ;;  %v6317_v56 = vmul.f32 %v7281_v47, %v1133_v44  ;;  %v6320_v22 = vmul.f32 %v7282_v26, %v1182_v41  ;;  %v3976_v0 = vpop.eup %3975  ;;  %v6331_v8 = vpop.f32.mrf.mxu1  ;;  %v7292_v57 = vld [vmem:[#allocation45_spill] sm:$0xff]  ;;  %v7304_v47 = vld [vmem:[#allocation70_spill] sm:$0xff] }
 0x1b9   : > { %2856 = vmatmul.bf16.gmra.mxu1 %v7278_v45  ;;  %v2234_v4 = vsel %vm6299_vm0, %v6112_v16, %v2230_v23  ;;  %vm2307_vm2 = vweird.f32 %v6152_v54  ;;  %3983 = vrcp.f32 %v6265_v35  ;;  %v6327_v30 = vadd.f32 1.0, %v3972_v34  ;;  %v3978_v27 = vpop.eup %3977 }
 0x1ba   : > { %v2305_v14 = vadd.f32 %v6152_v54, %v2304_v55  ;;  %v2003_v16 = vsub.f32 1.0, %v5991_v3  ;;  %v6339_v23 = vpop.eup %3979  ;;  %v2224_v34 = vsel %vm6213_vm10, %v6186_v7, %v2219_v9  ;;  %v2313_v36 = vor.u32 1.1754944e-38, %v2312_v40  ;;  %v7284_v3 = vld [vmem:[#allocation41_spill] sm:$0xff]  ;;  %vm6362_vm3 = vmor %vm2306_vm15, %vm2307_vm2  ;;  %v7289_v40 = vld [vmem:[#allocation71_spill] sm:$0xff] }
 0x1bb   : > { %3985 = vpow2.f32 %v6045_v20  ;;  %v2018_v17 = vsub.f32 1.0, %v2017_v62  ;;  %v2239_v55 = vsel %vm6241_vm12, %v6196_v15, %v2234_v4  ;;  %v2327_v41 = vand.u32 2147483648, %v6265_v35 }
 0x1bc   : > { %v3982_v44 = vpop.eup %3981  ;;  %v6349_v53 = vadd.f32 1.0, %v3976_v0  ;;  %3987 = vpow2.f32 %v6087_v5  ;;  %v6353_v45 = vmul.f32 %v2194_v2, %v7284_v3  ;;  %v6356_v7 = vmul.f32 %v2209_v6, %v7285_v52  ;;  %v7290_v5 = vld [vmem:[#allocation44_spill] sm:$0xff]  ;;  %v6389_v4 = vpop.f32.mrf.mxu2 }
 0x1bd   : > { %v6366_v15 = vadd.f32 1.0, %v3978_v27  ;;  %v2032_v9 = vmul.f32 %v7289_v40, %v7288_v13  ;;  %v6371_v62 = vmul.f32 %v2224_v34, %v7290_v5  ;;  %v2309_v2 = vsel %vm6362_vm3, %v6152_v54, %v2305_v14 }
 0x1be   : > { %7283 = vst [vmem:[#allocation17_spill] sm:$0xff] %v6349_v53  ;;  %3989 = vrcp.f32 %v6327_v30  ;;  %v2004_v58 = vmul.f32 %v5771_v32, %v2003_v16  ;;  %v6381_v25 = vmul.f32 %v2239_v55, %v7292_v57  ;;  %v6384_v26 = vadd.f32 1.0, %v3982_v44  ;;  %v6409_v52 = vpop.f32.mrf.mxu3 }
 0x1bf   : > { %7291 = vst [vmem:[#allocation18_spill] sm:$0xff] %v6371_v62  ;;  %v6378_v6 = vpop.eup %3983  ;;  %v7294_v0 = vpack.c.bf16 %v6140_v19, %v6134_v46  ;;  %v2019_v54 = vmul.f32 %v5808_v33, %v2018_v17  ;;  %v6392_v27 = vor.u32 1.1754944e-38, %v2327_v41  ;;  %3991 = vrcp.f32 %v6349_v53  ;;  %v6403_v19 = vpop.f32.mrf.mxu0 }
 0x1c0   : > { %7293 = vst [vmem:[#allocation22_spill] sm:$0xff] %v6381_v25  ;;  %v6399_v44 = vsel %vm6303_vm1, %v2313_v36, %v2309_v2  ;;  %3993 = vrcp.f32 %v6366_v15  ;;  %v6405_v17 = vpop.f32.mrf.mxu1  ;;  %v2033_v55 = vsub.f32 1.0, %v2032_v9  ;;  %v2317_v3 = vmul.f32 %v6378_v6, %v6265_v35  ;;  %v7297_v36 = vld [vmem:[#allocation9_spill] sm:$0xff]  ;;  %v7312_v25 = vld [vmem:[#allocation11_spill] sm:$0xff] }
 0x1c1   : > { %2905 = vmatmul.bf16.gmra.mxu2 %v7294_v0  ;;  %7295 = vst [vmem:[#allocation25_spill] sm:$0xff] %v6392_v27  ;;  %v3986_v34 = vpop.eup %3985  ;;  %v2005_v20 = vadd.f32 %v5771_v32, %v2004_v58  ;;  %vm2007_vm5 = vweird.f32 %v5771_v32  ;;  %v2047_v5 = vmul.f32 %v7297_v36, %v7296_v48  ;;  %3995 = vrcp.f32 %v6384_v26 }
 0x1c2   : > { %v3988_v41 = vpop.eup %3987  ;;  %v7298_v2 = vpack.c.bf16 %v6143_v38, %v6137_v59  ;;  %v2012_v9 = vand.u32 2147483648, %v5643_v28  ;;  %v2020_v57 = vadd.f32 %v5808_v33, %v2019_v54  ;;  %vm2022_vm4 = vweird.f32 %v5808_v33 }
 0x1c3   : > { %v6424_v58 = vadd.f32 1.0, %v3986_v34  ;;  %vm2006_vm6 = vweird.f32 %v5643_v28  ;;  %v2010_v46 = vand.u32 2147483647, %v5643_v28  ;;  %v2027_v14 = vand.u32 2147483648, %v5672_v50 }
 0x1c4   : > { %v6422_v0 = vpop.eup %3989  ;;  %v6429_v16 = vadd.f32 1.0, %v3988_v41  ;;  %vm6431_vm7 = vmor %vm2006_vm6, %vm2007_vm5  ;;  %vm2021_vm8 = vweird.f32 %v5672_v50  ;;  %v2025_v38 = vand.u32 2147483647, %v5672_v50  ;;  %v2034_v54 = vmul.f32 %v7289_v40, %v2033_v55 }
 0x1c5   : > { %2954 = vmatmul.bf16.gmra.mxu3 %v7298_v2  ;;  %v6438_v34 = vpop.eup %3991  ;;  %v2318_v2 = vsub.f32 1.0, %v2317_v3  ;;  %v2009_v28 = vsel %vm6431_vm7, %v5771_v32, %v2005_v20  ;;  %vm6448_vm9 = vmor %vm2021_vm8, %vm2022_vm4  ;;  %v2048_v50 = vsub.f32 1.0, %v2047_v5  ;;  %v2122_v55 = vmul.f32 %v5921_v49, %v7304_v47  ;;  %v6469_v5 = vpop.f32.mrf.mxu2 }
 0x1c6   : > { %7301 = vst [vmem:[#allocation19_spill] sm:$0xff] %v6438_v34  ;;  %v6454_v21 = vpop.eup %3993  ;;  %v6458_v1 = vmul.f32 %v6422_v0, %v6327_v30  ;;  %v2013_v43 = vor.u32 1.1754944e-38, %v2012_v9  ;;  %v2024_v32 = vsel %vm6448_vm9, %v5808_v33, %v2020_v57  ;;  %3997 = vrcp.f32 %v6424_v58 }
 0x1c7   : > { %vm2011_vm10 = vcmp.eq.f32.partialorder %v2010_v46, 8.507059e+37  ;;  %v2028_v20 = vor.u32 1.1754944e-38, %v2027_v14  ;;  %v2040_v59 = vand.u32 2147483647, %v7288_v13  ;;  %v6472_v9 = vpop.eup %3995  ;;  %vm2026_vm11 = vcmp.eq.f32.partialorder %v2025_v38, 8.507059e+37  ;;  %v6476_v57 = vpop.f32.mrf.mxu0 }
 0x1c8   : > { %2812 = vmatmul.bf16.gmra.mxu0 %v2577_v61  ;;  %v7305_v61 = vld [vmem:[#allocation72_spill] sm:$0xff]  ;;  %v2014_v29 = vsel %vm2011_vm10, %v2013_v43, %v2009_v28  ;;  %v2035_v33 = vadd.f32 %v7289_v40, %v2034_v54  ;;  %vm2037_vm12 = vweird.f32 %v7289_v40  ;;  %v2319_v41 = vmul.f32 %v6378_v6, %v2318_v2  ;;  %v6486_v38 = vpop.f32.mrf.mxu1  ;;  %v7306_v2 = vld [vmem:[#allocation23_spill] sm:$0xff] }
 0x1c9   : > { %v2137_v3 = vmul.f32 %v5954_v63, %v7305_v61  ;;  %2861 = vmatmul.bf16.gmra.mxu1 %v2578_v24  ;;  %v2029_v18 = vsel %vm2026_vm11, %v2028_v20, %v2024_v32  ;;  %v2049_v37 = vmul.f32 %v7297_v36, %v2048_v50  ;;  %v2123_v24 = vsub.f32 1.0, %v2122_v55  ;;  %v6499_v32 = vpop.f32.mrf.mxu3 }
 0x1ca   : > { %v6482_v14 = vmul.f32 %v6438_v34, %v6349_v53  ;;  %vm2036_vm13 = vweird.f32 %v7288_v13  ;;  %v2042_v46 = vand.u32 2147483648, %v7288_v13  ;;  %3999 = vrcp.f32 %v6429_v16  ;;  %v7311_v13 = vld [vmem:[#allocation24_spill] sm:$0xff] }
 0x1cb   : > { %v2138_v54 = vsub.f32 1.0, %v2137_v3  ;;  %v2457_v43 = vmul.f32 %v2014_v29, %v7306_v2  ;;  %vm6491_vm14 = vmor %vm2036_vm13, %vm2037_vm12  ;;  %vm6495_vm15 = vcmp.eq.f32.partialorder %v2040_v59, 8.507059e+37  ;;  %v2458_v20 = vmul.f32 %v2029_v18, %v7311_v13 }
 0x1cc   : > { %v2039_v3 = vsel %vm6491_vm14, %v7289_v40, %v2035_v33  ;;  %vm2052_vm0 = vweird.f32 %v7297_v36  ;;  %v2055_v29 = vand.u32 2147483647, %v7296_v48  ;;  %v6507_v2 = vpop.eup %3997  ;;  %v2050_v59 = vadd.f32 %v7297_v36, %v2049_v37 }
 0x1cd   : > { %v2521_v28 = vmul.f32 %v2457_v43, %v6403_v19  ;;  %v2124_v53 = vmul.f32 %v5921_v49, %v2123_v24  ;;  %v2152_v34 = vmul.f32 %v7312_v25, %v5886_v51  ;;  %v7313_v18 = vpack.c.bf16 %v6317_v56, %v6311_v11  ;;  %v7314_v19 = vld [vmem:[#allocation66_spill] sm:$0xff]  ;;  %v7315_v24 = vld [vmem:[#allocation67_spill] sm:$0xff]  ;;  %v6546_v55 = vpop.f32.mrf.mxu2 }
 0x1ce   : > { %v2043_v40 = vor.u32 1.1754944e-38, %v2042_v46  ;;  %vm2051_vm1 = vweird.f32 %v7296_v48  ;;  %v2057_v33 = vand.u32 2147483648, %v7296_v48  ;;  %v2139_v50 = vmul.f32 %v5954_v63, %v2138_v54  ;;  %v7321_v46 = vld [vmem:[#allocation7_spill] sm:$0xff] }
 0x1cf   : > { %v2517_v43 = vmul.f32 %v7314_v19, %v6329_v60  ;;  %v2522_v37 = vmul.f32 %v2458_v20, %v6405_v17  ;;  %vm2126_vm2 = vweird.f32 %v7304_v47  ;;  %vm2127_vm3 = vweird.f32 %v5921_v49  ;;  %vm6531_vm5 = vmor %vm2051_vm1, %vm2052_vm0  ;;  %v7320_v17 = vld [vmem:[#allocation5_spill] sm:$0xff]  ;;  %v1045_v19 = vpop.f32.mrf.mxu0 }
 0x1d0   : > { %v2518_v11 = vmul.f32 %v7315_v24, %v6331_v8  ;;  %v2044_v56 = vsel %vm6495_vm15, %v2043_v40, %v2039_v3  ;;  %vm6535_vm4 = vcmp.eq.f32.partialorder %v2055_v29, 8.507059e+37  ;;  %v2167_v54 = vmul.f32 %v7321_v46, %v7320_v17  ;;  %v6541_v13 = vpop.eup %3999  ;;  %vm6564_vm7 = vmor %vm2126_vm2, %vm2127_vm3 }
 0x1d1   : > { %2910 = vmatmul.bf16.gmra.mxu2 %v7313_v18  ;;  %v2581_v20 = vpack.c.bf16 %v2521_v28, %v2517_v43  ;;  %v2054_v8 = vsel %vm6531_vm5, %v7297_v36, %v2050_v59  ;;  %v2125_v3 = vadd.f32 %v5921_v49, %v2124_v53  ;;  %v2153_v18 = vsub.f32 1.0, %v2152_v34  ;;  %v7323_v43 = vld [vmem:[#allocation27_spill] sm:$0xff] }
 0x1d2   : > { %v7322_v29 = vpack.c.bf16 %v6320_v22, %v6314_v42  ;;  %v2058_v40 = vor.u32 1.1754944e-38, %v2057_v33  ;;  %v2132_v24 = vand.u32 2147483648, %v7304_v47  ;;  %v2140_v27 = vadd.f32 %v5954_v63, %v2139_v50  ;;  %v1094_v22 = vpop.f32.mrf.mxu1 }
 0x1d3   : > { %vm2142_vm6 = vweird.f32 %v5954_v63  ;;  %v2582_v28 = vpack.c.bf16 %v2522_v37, %v2518_v11  ;;  %v2459_v36 = vmul.f32 %v2044_v56, %v7323_v43  ;;  %v2130_v59 = vand.u32 2147483647, %v7304_v47  ;;  %v6573_v11 = vpop.f32.mrf.mxu3  ;;  %v7331_v43 = vld [vmem:[#allocation68_spill] sm:$0xff] }
 0x1d4   : > { %v2147_v53 = vand.u32 2147483648, %v7305_v61  ;;  %v2059_v34 = vsel %vm6535_vm4, %v2058_v40, %v2054_v8  ;;  %vm2141_vm8 = vweird.f32 %v7305_v61  ;;  %v2145_v33 = vand.u32 2147483647, %v7305_v61  ;;  %v7328_v61 = vld [vmem:[#allocation8_spill] sm:$0xff]  ;;  %v7329_v8 = vld [vmem:[#allocation15_spill] sm:$0xff] }
 0x1d5   : > { %2959 = vmatmul.bf16.gmra.mxu3 %v7322_v29  ;;  %v2168_v50 = vsub.f32 1.0, %v2167_v54  ;;  %v6571_v37 = vadd.f32 %v6378_v6, %v2319_v41  ;;  %v2129_v47 = vsel %vm6564_vm7, %v5921_v49, %v2125_v3  ;;  %vm6580_vm9 = vmor %vm2141_vm8, %vm2142_vm6  ;;  %v2154_v48 = vmul.f32 %v7312_v25, %v2153_v18  ;;  %v7330_v3 = vld [vmem:[#allocation28_spill] sm:$0xff] }
 0x1d6   : > { %v2242_v60 = vmul.f32 %v6250_v12, %v7328_v61  ;;  %v2523_v41 = vmul.f32 %v2459_v36, %v6469_v5  ;;  %v2133_v54 = vor.u32 1.1754944e-38, %v2132_v24  ;;  %v2257_v49 = vmul.f32 %v6260_v10, %v7329_v8 }
 0x1d7   : > { %v2460_v29 = vmul.f32 %v2059_v34, %v7330_v3  ;;  %vm2131_vm10 = vcmp.eq.f32.partialorder %v2130_v59, 8.507059e+37  ;;  %v2148_v40 = vor.u32 1.1754944e-38, %v2147_v53  ;;  %v2160_v18 = vand.u32 2147483647, %v5886_v51  ;;  %v7332_v34 = vld [vmem:[#allocation20_spill] sm:$0xff] }
 0x1d8   : > { %2817 = vmatmul.bf16.gmra.mxu0 %v2581_v20  ;;  %v2144_v20 = vsel %vm6580_vm9, %v5954_v63, %v2140_v27  ;;  %v2519_v42 = vmul.f32 %v7331_v43, %v6389_v4  ;;  %v2134_v62 = vsel %vm2131_vm10, %v2133_v54, %v2129_v47  ;;  %vm2146_vm11 = vcmp.eq.f32.partialorder %v2145_v33, 8.507059e+37  ;;  %v7333_v4 = vld [vmem:[#allocation34_spill] sm:$0xff]  ;;  %v1143_v33 = vpop.f32.mrf.mxu2 }
 0x1d9   : > { %2866 = vmatmul.bf16.gmra.mxu1 %v2582_v28  ;;  %v2169_v5 = vmul.f32 %v7321_v46, %v2168_v50  ;;  %v2149_v24 = vsel %vm2146_vm11, %v2148_v40, %v2144_v20  ;;  %v2155_v63 = vadd.f32 %v7312_v25, %v2154_v48  ;;  %vm2157_vm12 = vweird.f32 %v7312_v25  ;;  %v7336_v48 = vld [vmem:[#allocation35_spill] sm:$0xff]  ;;  %v7339_v20 = vld [vmem:[#allocation21_spill] sm:$0xff] }
 0x1da   : > { %v2243_v27 = vsub.f32 1.0, %v2242_v60  ;;  %v2583_v28 = vpack.c.bf16 %v2523_v41, %v2519_v42  ;;  %v2524_v36 = vmul.f32 %v2460_v29, %v6499_v32  ;;  %v2162_v59 = vand.u32 2147483648, %v5886_v51  ;;  %v7344_v50 = vld [vmem:[#allocation39_spill] sm:$0xff] }
 0x1db   : > { %v2258_v53 = vsub.f32 1.0, %v2257_v49  ;;  %v2520_v56 = vmul.f32 %v7332_v34, %v6409_v52  ;;  %v2465_v47 = vmul.f32 %v2134_v62, %v7333_v4  ;;  %vm2156_vm13 = vweird.f32 %v5886_v51  ;;  %v6618_v62 = vpop.f32.mrf.mxu0 }
 0x1dc   : > { %vm6606_vm14 = vcmp.eq.f32.partialorder %v2160_v18, 8.507059e+37  ;;  %v2466_v60 = vmul.f32 %v2149_v24, %v7336_v48  ;;  %vm6611_vm15 = vmor %vm2156_vm13, %vm2157_vm12  ;;  %v2170_v32 = vadd.f32 %v7321_v46, %v2169_v5  ;;  %vm2171_vm0 = vweird.f32 %v7320_v17  ;;  %v6627_v18 = vpop.f32.mrf.mxu1  ;;  %v1192_v24 = vpop.f32.mrf.mxu3 }
 0x1dd   : > { %vm2172_vm1 = vweird.f32 %v7321_v46  ;;  %v2529_v52 = vmul.f32 %v2465_v47, %v1045_v19  ;;  %v2159_v51 = vsel %vm6611_vm15, %v7312_v25, %v2155_v63  ;;  %v2244_v54 = vmul.f32 %v6250_v12, %v2243_v27  ;;  %v7340_v19 = vld [vmem:[#allocation6_spill] sm:$0xff]  ;;  %v7343_v27 = vld [vmem:[#allocation12_spill] sm:$0xff] }
 0x1de   : > { %v2272_v49 = vmul.f32 %v6282_v39, %v7339_v20  ;;  %v2584_v3 = vpack.c.bf16 %v2524_v36, %v2520_v56  ;;  %v2163_v29 = vor.u32 1.1754944e-38, %v2162_v59  ;;  %v2177_v40 = vand.u32 2147483648, %v7320_v17  ;;  %vm6636_vm2 = vmor %vm2171_vm0, %vm2172_vm1 }
 0x1df   : > { %v2259_v43 = vmul.f32 %v6260_v10, %v2258_v53  ;;  %v2525_v42 = vmul.f32 %v7340_v19, %v6476_v57  ;;  %v2530_v5 = vmul.f32 %v2466_v60, %v1094_v22  ;;  %v2175_v63 = vand.u32 2147483647, %v7320_v17  ;;  %v7349_v19 = vld [vmem:[#allocation40_spill] sm:$0xff] }
 0x1e0   : > { %vm2246_vm3 = vweird.f32 %v7328_v61  ;;  %v2164_v57 = vsel %vm6606_vm14, %v2163_v29, %v2159_v51  ;;  %v2174_v22 = vsel %vm6636_vm2, %v7321_v46, %v2170_v32  ;;  %vm2247_vm5 = vweird.f32 %v6250_v12 }
 0x1e1   : > { %2915 = vmatmul.bf16.gmra.mxu2 %v2583_v28  ;;  %v2526_v28 = vmul.f32 %v7343_v27, %v6486_v38  ;;  %v2585_v36 = vpack.c.bf16 %v2529_v52, %v2525_v42  ;;  %v2245_v59 = vadd.f32 %v6250_v12, %v2244_v54  ;;  %v2273_v53 = vsub.f32 1.0, %v2272_v49  ;;  %vm6663_vm7 = vmor %vm2246_vm3, %vm2247_vm5  ;;  %v6669_v52 = vpop.f32.mrf.mxu2 }
 0x1e2   : > { %v2287_v17 = vmul.f32 %v6339_v23, %v6199_v31  ;;  %v2178_v34 = vor.u32 1.1754944e-38, %v2177_v40  ;;  %v2252_v38 = vand.u32 2147483648, %v7328_v61  ;;  %v2260_v56 = vadd.f32 %v6260_v10, %v2259_v43 }
 0x1e3   : > { %vm2262_vm4 = vweird.f32 %v6260_v10  ;;  %v2586_v4 = vpack.c.bf16 %v2530_v5, %v2526_v28  ;;  %vm2176_vm6 = vcmp.eq.f32.partialorder %v2175_v63, 8.507059e+37  ;;  %v2250_v46 = vand.u32 2147483647, %v7328_v61  ;;  %v1050_v40 = vpop.f32.mrf.mxu0 }
 0x1e4   : > { %v2267_v47 = vand.u32 2147483648, %v7329_v8  ;;  %v2467_v48 = vmul.f32 %v2164_v57, %v7344_v50  ;;  %v2179_v60 = vsel %vm2176_vm6, %v2178_v34, %v2174_v22  ;;  %vm2261_vm8 = vweird.f32 %v7329_v8  ;;  %v1099_v27 = vpop.f32.mrf.mxu1  ;;  %v6693_v28 = vpop.f32.mrf.mxu3  ;;  %v7353_v50 = vld [vmem:[#allocation48_spill] sm:$0xff] }
 0x1e5   : > { %2964 = vmatmul.bf16.gmra.mxu3 %v2584_v3  ;;  %v2265_v32 = vand.u32 2147483647, %v7329_v8  ;;  %v2249_v51 = vsel %vm6663_vm7, %v6250_v12, %v2245_v59  ;;  %vm6674_vm9 = vmor %vm2261_vm8, %vm2262_vm4  ;;  %v2274_v61 = vmul.f32 %v6282_v39, %v2273_v53  ;;  %v2288_v49 = vsub.f32 1.0, %v2287_v17 }
 0x1e6   : > { %v2362_v3 = vmul.f32 %v6454_v21, %v6366_v15  ;;  %v2531_v29 = vmul.f32 %v2467_v48, %v1143_v33  ;;  %v2253_v8 = vor.u32 1.1754944e-38, %v2252_v38  ;;  %v2264_v43 = vsel %vm6674_vm9, %v6260_v10, %v2260_v56  ;;  %v7350_v33 = vld [vmem:[#allocation13_spill] sm:$0xff] }
 0x1e7   : > { %v2377_v12 = vmul.f32 %v6472_v9, %v6384_v26  ;;  %v2468_v42 = vmul.f32 %v2179_v60, %v7349_v19  ;;  %vm2251_vm10 = vcmp.eq.f32.partialorder %v2250_v46, 8.507059e+37  ;;  %v2268_v5 = vor.u32 1.1754944e-38, %v2267_v47  ;;  %v7351_v56 = vld [vmem:[#allocation29_spill] sm:$0xff]  ;;  %v7352_v46 = vld [vmem:[#allocation47_spill] sm:$0xff] }
 0x1e8   : > { %2822 = vmatmul.bf16.gmra.mxu0 %v2585_v36  ;;  %vm2277_vm11 = vweird.f32 %v6282_v39  ;;  %vm2321_vm12 = vweird.f32 %v6265_v35  ;;  %vm2322_vm13 = vweird.f32 %v6378_v6  ;;  %v2527_v25 = vmul.f32 %v7350_v33, %v6546_v55 }
 0x1e9   : > { %2871 = vmatmul.bf16.gmra.mxu1 %v2586_v4  ;;  %v2254_v63 = vsel %vm2251_vm10, %v2253_v8, %v2249_v51  ;;  %vm2266_vm14 = vcmp.eq.f32.partialorder %v2265_v32, 8.507059e+37  ;;  %v2280_v10 = vand.u32 2147483647, %v7339_v20  ;;  %v2275_v22 = vadd.f32 %v6282_v39, %v2274_v61  ;;  %vm6765_vm9 = vmor %vm2321_vm12, %vm2322_vm13 }
 0x1ea   : > { %v2269_v57 = vsel %vm2266_vm14, %v2268_v5, %v2264_v43  ;;  %v2289_v36 = vmul.f32 %v6339_v23, %v2288_v49  ;;  %v2363_v59 = vsub.f32 1.0, %v2362_v3  ;;  %v2587_v53 = vpack.c.bf16 %v2531_v29, %v2527_v25 }
 0x1eb   : > { %v2532_v17 = vmul.f32 %v2468_v42, %v1192_v24  ;;  %v2282_v34 = vand.u32 2147483648, %v7339_v20  ;;  %v2378_v38 = vsub.f32 1.0, %v2377_v12  ;;  %v2348_v55 = vsub.f32 1.0, %v6482_v14  ;;  %v7377_v12 = vld [vmem:[#allocation22_spill] sm:$0xff] }
 0x1ec   : > { %v2528_v4 = vmul.f32 %v7351_v56, %v6573_v11  ;;  %v2473_v47 = vmul.f32 %v2254_v63, %v7352_v46  ;;  %vm2276_vm15 = vweird.f32 %v7339_v20  ;;  %v2474_v48 = vmul.f32 %v2269_v57, %v7353_v50  ;;  %v1197_v57 = vpop.f32.mrf.mxu3  ;;  %v7370_v50 = vld [vmem:[#allocation51_spill] sm:$0xff] }
 0x1ed   : > { %vm6706_vm0 = vmor %vm2276_vm15, %vm2277_vm11  ;;  %vm6710_vm1 = vcmp.eq.f32.partialorder %v2280_v10, 8.507059e+37  ;;  %vm2291_vm2 = vweird.f32 %v6199_v31  ;;  %vm2292_vm3 = vweird.f32 %v6339_v23  ;;  %v2290_v41 = vadd.f32 %v6339_v23, %v2289_v36 }
 0x1ee   : > { %v2537_v11 = vmul.f32 %v2473_v47, %v1050_v40  ;;  %v2279_v20 = vsel %vm6706_vm0, %v6282_v39, %v2275_v22  ;;  %v2364_v32 = vmul.f32 %v6454_v21, %v2363_v59  ;;  %v2588_v51 = vpack.c.bf16 %v2532_v17, %v2528_v4  ;;  %v1148_v40 = vpop.f32.mrf.mxu2  ;;  %vm6742_vm4 = vmor %vm2291_vm2, %vm2292_vm3 }
 0x1ef   : > { %v2283_v54 = vor.u32 1.1754944e-38, %v2282_v34  ;;  %v2379_v61 = vmul.f32 %v6472_v9, %v2378_v38  ;;  %v2392_v49 = vmul.f32 %v6507_v2, %v6424_v58  ;;  %v2533_v3 = vmul.f32 %v6353_v45, %v6618_v62  ;;  %v6746_v62 = vpop.f32.mrf.mxu0 }
 0x1f0   : > { %v2538_v29 = vmul.f32 %v2474_v48, %v1099_v27  ;;  %v2295_v8 = vand.u32 2147483647, %v6199_v31  ;;  %v2297_v39 = vand.u32 2147483648, %v6199_v31  ;;  %v7358_v43 = vand.u32 2147483647, %v6265_v35  ;;  %v6755_v31 = vpop.f32.mrf.mxu1 }
 0x1f1   : > { %2920 = vmatmul.bf16.gmra.mxu2 %v2587_v53  ;;  %v2534_v19 = vmul.f32 %v6356_v7, %v6627_v18  ;;  %v2284_v42 = vsel %vm6710_vm1, %v2283_v54, %v2279_v20  ;;  %vm2366_vm6 = vweird.f32 %v6366_v15  ;;  %vm2367_vm7 = vweird.f32 %v6454_v21  ;;  %v7365_v53 = vld [vmem:[#allocation49_spill] sm:$0xff] }
 0x1f2   : > { %vm6730_vm5 = vcmp.eq.f32.partialorder %v7358_v43, 8.507059e+37  ;;  %v2589_v5 = vpack.c.bf16 %v2537_v11, %v2533_v3  ;;  %v2294_v7 = vsel %vm6742_vm4, %v6339_v23, %v2290_v41  ;;  %v2365_v18 = vadd.f32 %v6454_v21, %v2364_v32  ;;  %vm6776_vm11 = vmor %vm2366_vm6, %vm2367_vm7  ;;  %v7372_v11 = vld [vmem:[#allocation18_spill] sm:$0xff] }
 0x1f3   : > { %v2372_v33 = vand.u32 2147483648, %v6366_v15  ;;  %v2380_v25 = vadd.f32 %v6472_v9, %v2379_v61  ;;  %vm2382_vm8 = vweird.f32 %v6472_v9  ;;  %v2393_v63 = vsub.f32 1.0, %v2392_v49  ;;  %v7373_v41 = vld [vmem:[#allocation50_spill] sm:$0xff] }
 0x1f4   : > { %v2407_v27 = vmul.f32 %v6541_v13, %v6429_v16  ;;  %v2590_v10 = vpack.c.bf16 %v2538_v29, %v2534_v19  ;;  %v2298_v22 = vor.u32 1.1754944e-38, %v2297_v39  ;;  %v2370_v36 = vand.u32 2147483647, %v6366_v15  ;;  %v7376_v39 = vld [vmem:[#allocation58_spill] sm:$0xff] }
 0x1f5   : > { %2969 = vmatmul.bf16.gmra.mxu3 %v2588_v51  ;;  %v2387_v59 = vand.u32 2147483648, %v6384_v26  ;;  %v2475_v17 = vmul.f32 %v2284_v42, %v7365_v53  ;;  %vm2296_vm10 = vcmp.eq.f32.partialorder %v2295_v8, 8.507059e+37  ;;  %vm2381_vm12 = vweird.f32 %v6384_v26 }
 0x1f6   : > { %v2385_v34 = vand.u32 2147483647, %v6384_v26  ;;  %v2324_v38 = vsel %vm6765_vm9, %v6378_v6, %v6571_v37  ;;  %v2299_v56 = vsel %vm2296_vm10, %v2298_v22, %v2294_v7  ;;  %v2369_v4 = vsel %vm6776_vm11, %v6454_v21, %v2365_v18  ;;  %vm6791_vm13 = vmor %vm2381_vm12, %vm2382_vm8  ;;  %v6814_v61 = vpop.f32.mrf.mxu2 }
 0x1f7   : > { %v2373_v15 = vor.u32 1.1754944e-38, %v2372_v33  ;;  %vm2336_vm14 = vweird.f32 %v6327_v30  ;;  %v2539_v26 = vmul.f32 %v2475_v17, %v1148_v40  ;;  %v2384_v6 = vsel %vm6791_vm13, %v6472_v9, %v2380_v25  ;;  %v7374_v9 = vld [vmem:[#allocation25_spill] sm:$0xff]  ;;  %v1200_v33 = vpop.f32.mrf.mxu3 }
 0x1f8   : > { %2827 = vmatmul.bf16.gmra.mxu0 %v2589_v5  ;;  %v2394_v37 = vmul.f32 %v6507_v2, %v2393_v63  ;;  %v2408_v47 = vsub.f32 1.0, %v2407_v27  ;;  %v2477_v21 = vmul.f32 %v6399_v44, %v7370_v50  ;;  %v7371_v48 = vsub.f32 1.0, %v6458_v1  ;;  %v7375_v44 = vld [vmem:[#allocation19_spill] sm:$0xff]  ;;  %v1104_v42 = vpop.f32.mrf.mxu1  ;;  %v7378_v5 = vld [vmem:[#allocation52_spill] sm:$0xff] }
 0x1f9   : > { %2876 = vmatmul.bf16.gmra.mxu1 %v2590_v10  ;;  %vm2371_vm15 = vcmp.eq.f32.partialorder %v2370_v36, 8.507059e+37  ;;  %v2388_v24 = vor.u32 1.1754944e-38, %v2387_v59  ;;  %v2535_v20 = vmul.f32 %v7372_v11, %v6669_v52  ;;  %v2476_v32 = vmul.f32 %v2299_v56, %v7373_v41  ;;  %v1055_v52 = vpop.f32.mrf.mxu0  ;;  %v7379_v63 = vld [vmem:[#allocation59_spill] sm:$0xff] }
 0x1fa   : > { %v2334_v60 = vmul.f32 %v6422_v0, %v7371_v48  ;;  %v2374_v51 = vsel %vm2371_vm15, %v2373_v15, %v2369_v4  ;;  %vm2386_vm0 = vcmp.eq.f32.partialorder %v2385_v34, 8.507059e+37  ;;  %v2329_v54 = vsel %vm6730_vm5, %v7374_v9, %v2324_v38 }
 0x1fb   : > { %v2349_v1 = vmul.f32 %v7375_v44, %v2348_v55  ;;  %v2389_v49 = vsel %vm2386_vm0, %v2388_v24, %v2384_v6  ;;  %vm2397_vm1 = vweird.f32 %v6507_v2  ;;  %v2591_v3 = vpack.c.bf16 %v2539_v26, %v2535_v20  ;;  %v7391_v24 = vld [vmem:[#allocation56_spill] sm:$0xff] }
 0x1fc   : > { %v2540_v29 = vmul.f32 %v2476_v32, %v1197_v57  ;;  %v2395_v40 = vadd.f32 %v6507_v2, %v2394_v37  ;;  %v2409_v8 = vmul.f32 %v6541_v13, %v2408_v47  ;;  %vm2337_vm2 = vweird.f32 %v6422_v0 }
 0x1fd   : > { %vm2352_vm3 = vweird.f32 %v7375_v44  ;;  %v2481_v14 = vmul.f32 %v2374_v51, %v7376_v39  ;;  %v2402_v55 = vand.u32 2147483648, %v6424_v58  ;;  %v2335_v43 = vadd.f32 %v6422_v0, %v2334_v60  ;;  %vm6846_vm7 = vmor %vm2336_vm14, %vm2337_vm2  ;;  %v7392_v51 = vld [vmem:[#allocation62_spill] sm:$0xff] }
 0x1fe   : > { %v2536_v19 = vmul.f32 %v7377_v12, %v6693_v28  ;;  %vm2396_vm5 = vweird.f32 %v6424_v58  ;;  %v2400_v45 = vand.u32 2147483647, %v6424_v58  ;;  %v2478_v7 = vmul.f32 %v2329_v54, %v7378_v5  ;;  %v1153_v6 = vpop.f32.mrf.mxu2  ;;  %v7393_v54 = vld [vmem:[#allocation57_spill] sm:$0xff] }
 0x1ff   : > { %v2350_v18 = vadd.f32 %v7375_v44, %v2349_v1  ;;  %v2545_v25 = vmul.f32 %v2481_v14, %v1055_v52  ;;  %v2482_v27 = vmul.f32 %v2389_v49, %v7379_v63  ;;  %vm6833_vm4 = vmor %vm2396_vm5, %vm2397_vm1  ;;  %v2410_v10 = vadd.f32 %v6541_v13, %v2409_v8  ;;  %v1202_v41 = vpop.f32.mrf.mxu3 }
 0x200   : > { %v2592_v28 = vpack.c.bf16 %v2540_v29, %v2536_v19  ;;  %v2399_v58 = vsel %vm6833_vm4, %v6507_v2, %v2395_v40  ;;  %vm2412_vm6 = vweird.f32 %v6541_v13  ;;  %v2541_v22 = vmul.f32 %v2477_v21, %v6746_v62 }
 0x201   : > { %2925 = vmatmul.bf16.gmra.mxu2 %v2591_v3  ;;  %v2546_v36 = vmul.f32 %v2482_v27, %v1104_v42  ;;  %v2403_v59 = vor.u32 1.1754944e-38, %v2402_v55  ;;  %v2417_v53 = vand.u32 2147483648, %v6429_v16  ;;  %v2339_v2 = vsel %vm6846_vm7, %v6422_v0, %v2335_v43  ;;  %v7388_v0 = vld [vmem:[#allocation17_spill] sm:$0xff] }
 0x202   : > { %vm2401_vm8 = vcmp.eq.f32.partialorder %v2400_v45, 8.507059e+37  ;;  %vm2411_vm9 = vweird.f32 %v6429_v16  ;;  %v2415_v17 = vand.u32 2147483647, %v6429_v16  ;;  %v7384_v35 = vand.u32 2147483648, %v6327_v30 }
 0x203   : > { %v2542_v38 = vmul.f32 %v2478_v7, %v6755_v31  ;;  %v2593_v56 = vpack.c.bf16 %v2545_v25, %v2541_v22  ;;  %v2404_v62 = vsel %vm2401_vm8, %v2403_v59, %v2399_v58  ;;  %vm6860_vm10 = vmor %vm2411_vm9, %vm2412_vm6  ;;  %v7387_v15 = vand.u32 2147483647, %v6327_v30  ;;  %v7389_v30 = vld [vmem:[#allocation61_spill] sm:$0xff] }
 0x204   : > { %v2343_v34 = vor.u32 1.1754944e-38, %v7384_v35  ;;  %vm2351_vm12 = vweird.f32 %v7388_v0  ;;  %v2355_v46 = vand.u32 2147483647, %v7388_v0  ;;  %v2414_v16 = vsel %vm6860_vm10, %v6541_v13, %v2410_v10 }
 0x205   : > { %vm2341_vm11 = vcmp.eq.f32.partialorder %v7387_v15, 8.507059e+37  ;;  %2974 = vmatmul.bf16.gmra.mxu3 %v2592_v28  ;;  %vm2353_vm13 = vmor %vm2351_vm12, %vm2352_vm3  ;;  %v2594_v31 = vpack.c.bf16 %v2546_v36, %v2542_v38  ;;  %v2418_v37 = vor.u32 1.1754944e-38, %v2417_v53  ;;  %v2483_v50 = vmul.f32 %v2404_v62, %v7389_v30 }
 0x206   : > { %v2344_v26 = vsel %vm2341_vm11, %v2343_v34, %v2339_v2  ;;  %v2354_v47 = vsel %vm2353_vm13, %v7375_v44, %v2350_v18  ;;  %vm2416_vm14 = vcmp.eq.f32.partialorder %v2415_v17, 8.507059e+37  ;;  %v7390_v21 = vand.u32 2147483648, %v7388_v0 }
 0x207   : > { %v2419_v60 = vsel %vm2416_vm14, %v2418_v37, %v2414_v16  ;;  %v2479_v11 = vmul.f32 %v2344_v26, %v7391_v24  ;;  %vm2356_vm15 = vcmp.eq.f32.partialorder %v2355_v46, 8.507059e+37  ;;  %v2547_v13 = vmul.f32 %v2483_v50, %v1153_v6 }
 0x208   : > { %v2358_v48 = vor.u32 1.1754944e-38, %v7390_v21  ;;  %2832 = vmatmul.bf16.gmra.mxu0 %v2593_v56  ;;  %v2484_v9 = vmul.f32 %v2419_v60, %v7392_v51 }
 0x209   : > { %2881 = vmatmul.bf16.gmra.mxu1 %v2594_v31  ;;  %v2543_v32 = vmul.f32 %v2479_v11, %v6814_v61 }
 0x20a   : > { %v2359_v20 = vsel %vm2356_vm15, %v2358_v48, %v2354_v47  ;;  %v2548_v49 = vmul.f32 %v2484_v9, %v1202_v41 }
 0x20b   : > { %v2480_v44 = vmul.f32 %v2359_v20, %v7393_v54  ;;  %v2595_v1 = vpack.c.bf16 %v2547_v13, %v2543_v32 }
 0x20d   : > { %v2544_v3 = vmul.f32 %v2480_v44, %v1200_v33 }
 0x20f   : > { %v2596_v29 = vpack.c.bf16 %v2548_v49, %v2544_v3 }
 0x211   : > { %2930 = vmatmul.bf16.gmra.mxu2 %v2595_v1  ;;  %v2798_v52 = vpop.f32.mrf.mxu0 }
 0x213   : > { %v2847_v40 = vpop.f32.mrf.mxu1 }
 0x214   : > { %v2848_v14 = vadd.f32 %v2847_v40, %v2798_v52 }
 0x215   : > { %2979 = vmatmul.bf16.gmra.mxu3 %v2596_v29 }
 0x219   : > { %v2800_v8 = vpop.f32.mrf.mxu0 }
 0x21b   : > { %v2849_v39 = vpop.f32.mrf.mxu1 }
 0x21c   : > { %v2850_v45 = vadd.f32 %v2849_v39, %v2800_v8 }
 0x221   : > { %v2896_v55 = vpop.f32.mrf.mxu2  ;;  %v2803_v12 = vpop.f32.mrf.mxu0 }
 0x222   : > { %v2897_v43 = vadd.f32 %v2896_v55, %v2848_v14 }
 0x223   : > { %v2852_v61 = vpop.f32.mrf.mxu1 }
 0x224   : > { %v2945_v19 = vpop.f32.mrf.mxu3  ;;  %v2853_v27 = vadd.f32 %v2852_v61, %v2803_v12 }
 0x225   : > { %v2946_v42 = vadd.f32 %v2945_v19, %v2897_v43 }
 0x227   : > { %3001 = vst [vmem:[%s6885_s15] sm:$0xff] %v2946_v42 }
 0x229   : > { %v2898_v5 = vpop.f32.mrf.mxu2  ;;  %v2805_v18 = vpop.f32.mrf.mxu0 }
 0x22a   : > { %v2899_v7 = vadd.f32 %v2898_v5, %v2850_v45 }
 0x22b   : > { %v2854_v33 = vpop.f32.mrf.mxu1 }
 0x22c   : > { %v2947_v25 = vpop.f32.mrf.mxu3  ;;  %v2855_v36 = vadd.f32 %v2854_v33, %v2805_v18 }
 0x22d   : > { %v2948_v63 = vadd.f32 %v2947_v25, %v2899_v7 }
 0x22f   : > { %3002 = vst [vmem:[%s6885_s15 + $0x8] sm:$0xff] %v2948_v63 }
 0x231   : > { %v2901_v23 = vpop.f32.mrf.mxu2 }
 0x232   : > { %v2902_v28 = vadd.f32 %v2901_v23, %v2853_v27 }
 0x235   : > { %v2808_v58 = vpop.f32.mrf.mxu0 }
 0x236   : > { %v2857_v10 = vpop.f32.mrf.mxu1 }
 0x237   : > { %v2858_v38 = vadd.f32 %v2857_v10, %v2808_v58 }
 0x238   : > { %v2950_v57 = vpop.f32.mrf.mxu3 }
 0x239   : > { %v2951_v22 = vadd.f32 %v2950_v57, %v2902_v28  ;;  %v2903_v59 = vpop.f32.mrf.mxu2 }
 0x23a   : > { %v2904_v53 = vadd.f32 %v2903_v59, %v2855_v36 }
 0x23b   : > { %3003 = vst [vmem:[%s6885_s15 + $0x10] sm:$0xff] %v2951_v22 }
 0x23d   : > { %v2810_v2 = vpop.f32.mrf.mxu0 }
 0x23e   : > { %v2859_v17 = vpop.f32.mrf.mxu1 }
 0x23f   : > { %v2860_v16 = vadd.f32 %v2859_v17, %v2810_v2 }
 0x240   : > { %v2952_v35 = vpop.f32.mrf.mxu3 }
 0x241   : > { %v2953_v34 = vadd.f32 %v2952_v35, %v2904_v53 }
 0x243   : > { %3004 = vst [vmem:[%s6885_s15 + $0x18] sm:$0xff] %v2953_v34 }
 0x244   : > { %v2906_v56 = vpop.f32.mrf.mxu2 }
 0x245   : > { %v2907_v62 = vadd.f32 %v2906_v56, %v2858_v38  ;;  %v2813_v4 = vpop.f32.mrf.mxu0 }
 0x246   : > { %v2862_v15 = vpop.f32.mrf.mxu1 }
 0x247   : > { %v2863_v50 = vadd.f32 %v2862_v15, %v2813_v4 }
 0x248   : > { %v2955_v0 = vpop.f32.mrf.mxu3 }
 0x249   : > { %v2956_v46 = vadd.f32 %v2955_v0, %v2907_v62 }
 0x24b   : > { %3005 = vst [vmem:[%s6885_s15 + $0x20] sm:$0xff] %v2956_v46 }
 0x24c   : > { %v2908_v26 = vpop.f32.mrf.mxu2 }
 0x24d   : > { %v2909_v31 = vadd.f32 %v2908_v26, %v2860_v16  ;;  %v2815_v6 = vpop.f32.mrf.mxu0 }
 0x24e   : > { %v2864_v37 = vpop.f32.mrf.mxu1 }
 0x24f   : > { %v2865_v20 = vadd.f32 %v2864_v37, %v2815_v6 }
 0x250   : > { %v2957_v47 = vpop.f32.mrf.mxu3 }
 0x251   : > { %v2958_v30 = vadd.f32 %v2957_v47, %v2909_v31 }
 0x253   : > { %3006 = vst [vmem:[%s6885_s15 + $0x28] sm:$0xff] %v2958_v30 }
 0x254   : > { %v2911_v21 = vpop.f32.mrf.mxu2 }
 0x255   : > { %v2912_v48 = vadd.f32 %v2911_v21, %v2863_v50  ;;  %v2818_v60 = vpop.f32.mrf.mxu0 }
 0x256   : > { %v2867_v24 = vpop.f32.mrf.mxu1 }
 0x257   : > { %v2868_v1 = vadd.f32 %v2867_v24, %v2818_v60 }
 0x258   : > { %v2960_v11 = vpop.f32.mrf.mxu3 }
 0x259   : > { %v2961_v13 = vadd.f32 %v2960_v11, %v2912_v48 }
 0x25b   : > { %3007 = vst [vmem:[%s6885_s15 + $0x30] sm:$0xff] %v2961_v13 }
 0x25c   : > { %v2913_v41 = vpop.f32.mrf.mxu2 }
 0x25d   : > { %v2914_v32 = vadd.f32 %v2913_v41, %v2865_v20  ;;  %v2820_v51 = vpop.f32.mrf.mxu0 }
 0x25e   : > { %v2869_v9 = vpop.f32.mrf.mxu1 }
 0x25f   : > { %v2870_v39 = vadd.f32 %v2869_v9, %v2820_v51 }
 0x260   : > { %v2962_v54 = vpop.f32.mrf.mxu3 }
 0x261   : > { %v2963_v44 = vadd.f32 %v2962_v54, %v2914_v32 }
 0x263   : > { %3008 = vst [vmem:[%s6885_s15 + $0x38] sm:$0xff] %v2963_v44 }
 0x264   : > { %v2916_v49 = vpop.f32.mrf.mxu2 }
 0x265   : > { %v2917_v3 = vadd.f32 %v2916_v49, %v2868_v1  ;;  %v2823_v29 = vpop.f32.mrf.mxu0 }
 0x266   : > { %v2872_v52 = vpop.f32.mrf.mxu1 }
 0x267   : > { %v2873_v42 = vadd.f32 %v2872_v52, %v2823_v29 }
 0x268   : > { %v2965_v40 = vpop.f32.mrf.mxu3 }
 0x269   : > { %v2966_v8 = vadd.f32 %v2965_v40, %v2917_v3 }
 0x26b   : > { %3009 = vst [vmem:[%s6885_s15 + $0x40] sm:$0xff] %v2966_v8 }
 0x26c   : > { %v2918_v14 = vpop.f32.mrf.mxu2 }
 0x26d   : > { %v2919_v55 = vadd.f32 %v2918_v14, %v2870_v39  ;;  %v2825_v43 = vpop.f32.mrf.mxu0 }
 0x26e   : > { %v2874_v61 = vpop.f32.mrf.mxu1 }
 0x26f   : > { %v2875_v63 = vadd.f32 %v2874_v61, %v2825_v43 }
 0x270   : > { %v2967_v12 = vpop.f32.mrf.mxu3 }
 0x271   : > { %v2968_v19 = vadd.f32 %v2967_v12, %v2919_v55 }
 0x273   : > { %3010 = vst [vmem:[%s6885_s15 + $0x48] sm:$0xff] %v2968_v19 }
 0x274   : > { %v2921_v45 = vpop.f32.mrf.mxu2 }
 0x275   : > { %v2922_v5 = vadd.f32 %v2921_v45, %v2873_v42  ;;  %v2828_v33 = vpop.f32.mrf.mxu0 }
 0x276   : > { %v2877_v25 = vpop.f32.mrf.mxu1 }
 0x277   : > { %v2878_v10 = vadd.f32 %v2877_v25, %v2828_v33 }
 0x278   : > { %v2970_v7 = vpop.f32.mrf.mxu3 }
 0x279   : > { %v2971_v18 = vadd.f32 %v2970_v7, %v2922_v5 }
 0x27b   : > { %3011 = vst [vmem:[%s6885_s15 + $0x50] sm:$0xff] %v2971_v18 }
 0x27c   : > { %v2923_v27 = vpop.f32.mrf.mxu2 }
 0x27d   : > { %v2924_v23 = vadd.f32 %v2923_v27, %v2875_v63  ;;  %v2830_v57 = vpop.f32.mrf.mxu0 }
 0x27e   : > { %v2879_v22 = vpop.f32.mrf.mxu1 }
 0x27f   : > { %v2880_v17 = vadd.f32 %v2879_v22, %v2830_v57 }
 0x280   : > { %v2972_v28 = vpop.f32.mrf.mxu3 }
 0x281   : > { %v2973_v58 = vadd.f32 %v2972_v28, %v2924_v23 }
 0x283   : > { %3012 = vst [vmem:[%s6885_s15 + $0x58] sm:$0xff] %v2973_v58 }
 0x284   : > { %v2926_v36 = vpop.f32.mrf.mxu2 }
 0x285   : > { %v2927_v59 = vadd.f32 %v2926_v36, %v2878_v10  ;;  %v2833_v34 = vpop.f32.mrf.mxu0 }
 0x286   : > { %v2882_v56 = vpop.f32.mrf.mxu1 }
 0x287   : > { %v2883_v15 = vadd.f32 %v2882_v56, %v2833_v34 }
 0x288   : > { %v2975_v53 = vpop.f32.mrf.mxu3 }
 0x289   : > { %v2976_v2 = vadd.f32 %v2975_v53, %v2927_v59 }
 0x28b   : > { %3013 = vst [vmem:[%s6885_s15 + $0x60] sm:$0xff] %v2976_v2 }
 0x28c   : > { %v2928_v35 = vpop.f32.mrf.mxu2 }
 0x28d   : > { %v2929_v38 = vadd.f32 %v2928_v35, %v2880_v17  ;;  %v2835_v16 = vpop.f32.mrf.mxu0 }
 0x28e   : > { %v2884_v26 = vpop.f32.mrf.mxu1 }
 0x28f   : > { %v2885_v37 = vadd.f32 %v2884_v26, %v2835_v16 }
 0x290   : > { %v2977_v62 = vpop.f32.mrf.mxu3 }
 0x291   : > { %v2978_v4 = vadd.f32 %v2977_v62, %v2929_v38 }
 0x293   : > { %3014 = vst [vmem:[%s6885_s15 + $0x68] sm:$0xff] %v2978_v4 }
 0x294   : > { %v2931_v0 = vpop.f32.mrf.mxu2 }
 0x295   : > { %v2932_v46 = vadd.f32 %v2931_v0, %v2883_v15 }
 0x298   : > { %v2980_v31 = vpop.f32.mrf.mxu3 }
 0x299   : > { %v2981_v6 = vadd.f32 %v2980_v31, %v2932_v46 }
 0x29b   : > { %3015 = vst [vmem:[%s6885_s15 + $0x70] sm:$0xff] %v2981_v6 }
 0x29c   : > { %v2933_v47 = vpop.f32.mrf.mxu2 }
 0x29d   : > { %v2934_v30 = vadd.f32 %v2933_v47, %v2885_v37 }
 0x2a0   : > { %v2982_v50 = vpop.f32.mrf.mxu3 }
 0x2a1   : > { %v2983_v21 = vadd.f32 %v2982_v50, %v2934_v30 }
 0x2a3   : > { %3016 = vst [vmem:[%s6885_s15 + $0x78] sm:$0xff] %v2983_v21 }
 0x2a4 PF: > { %s22_s21 = sadd.s32 1, %s4037_s21   ;;  %s7394_s19 = smov %s4033_s20 }
 0x2a5   : > { %p19_p7 = scmp.ge.s32.totalorder %s22_s21, 14   ;;  %s7395_s20 = smov %s7397_s0 }
 0x2a7   :  { %21 = sbr.rel (!%p19_p7) target bundleno = 8 (0x8), region = 72 }

</bundles_post_ra>
